<compile_context>
chip_gen: v6e
topology: v6e:2x2x1
jax: 0.10.0
libtpu: 0.0.40
codegen_flags: <defaults>
</compile_context>

<pallas_src>
import functools

import jax
import jax.numpy as jnp
from jax.experimental import pallas as pl
from jax.experimental.pallas import tpu as pltpu


def _round_up(x, m):
    return (x + m - 1) // m * m


def _slack_rows(compute_dtype):
    # Sublane-tile-aligned slack bands: 8 rows for 32-bit, 16 for 16-bit packed.
    return 8 if jnp.dtype(compute_dtype).itemsize == 4 else 16


def _vmem_capacity_bytes():
    """Per-core VMEM capacity; conservative 64 MiB (v7x) fallback."""
    try:
        info = pltpu.get_tpu_info()
        return int(getattr(info, "vmem_capacity_bytes", 64 << 20))
    except Exception:
        return 64 << 20


def _estimate_vmem_bytes(th, W, cin_p, cp, compute_dtype):
    """Rough per-grid-step VMEM footprint for an H-tile of `th` rows."""
    cbytes = jnp.dtype(compute_dtype).itemsize
    p1, p2 = (th + 2) * W, th * W
    r_in = (th + 6) * W
    pad2 = _slack_rows(compute_dtype)
    b = 2 * r_in * cin_p * cbytes             # input tile block (double-buffered)
    b += 2 * p2 * cp * cbytes                 # output tile block (double-buffered)
    b += 2 * 9 * cin_p * cp * cbytes          # w1 (double-buffered, grid-invariant)
    b += 2 * 9 * cp * cp * cbytes             # w2 (double-buffered, grid-invariant)
    b += p1 * 9 * cin_p * cbytes              # stage-1 im2col patches
    b += p2 * 9 * cp * cbytes                 # stage-2 im2col patches
    b += (p1 + 2 * pad2) * cp * cbytes        # stage-1 staging slab
    b += (p1 + p2) * cp * 4                   # undeclared f32 y1 / y2 temporaries
    b += (p1 * cin_p + p2 * cp) * 2           # boolean masks / misc temporaries
    return b


def _pick_tile_h(H, W, cin_p, cp, compute_dtype, budget):
    for th in [d for d in range(H, 0, -1) if H % d == 0]:
        if _estimate_vmem_bytes(th, W, cin_p, cp, compute_dtype) <= budget:
            return th
    return 1


def _make_double_conv_kernel(tile_h, W, cin_p, cp, compute_dtype):
    TH = tile_h
    P1 = (TH + 2) * W          # stage-1 rows (1-row halo each side), flattened
    P2 = TH * W                # stage-2 / final output rows, flattened
    PAD2 = _slack_rows(compute_dtype)

    def col_masks(P, C):
        # W-boundary masks, broadcast to the stage's channel width ONCE and
        # reused by every masked tap (JAX does not CSE broadcast_in_dim).
        col = jax.lax.broadcasted_iota(jnp.int32, (P, 1), 0) % W
        ml = jnp.broadcast_to(col > 0, (P, C))         # column w-1 is valid
        mr = jnp.broadcast_to(col < W - 1, (P, C))     # column w+1 is valid
        return ml, mr

    def conv3x3_bn_relu(src_ref, src_off, P, C, patch_ref, w_ref, scale, shift):
        """3x3 conv (W padding via masks) + folded bias/BN + ReLU.

        src_ref holds >= P + 2*W flattened (rows*W, C) input rows starting at
        flat offset `src_off`; output element p reads src_off + p + kh*W + kw-1.
        All slice starts are static Python ints.
        """
        ml, mr = col_masks(P, C)
        for kh in range(3):
            for kw in range(3):
                k = kh * 3 + kw
                start = src_off + kh * W + (kw - 1)
                tap = src_ref[pl.ds(start, P), :]
                if kw == 0:          # reads column w-1: invalid where w == 0
                    tap = jnp.where(ml, tap, 0)
                elif kw == 2:        # reads column w+1: invalid where w == W-1
                    tap = jnp.where(mr, tap, 0)
                patch_ref[:, pl.ds(k * C, C)] = tap
        acc = jnp.dot(patch_ref[...], w_ref[...],
                      preferred_element_type=jnp.float32)   # one fat MXU matmul
        return jnp.maximum(acc * scale + shift, 0.0)         # f32 epilogue

    def kernel(x_ref, w1_ref, s1_ref, t1_ref, w2_ref, s2_ref, t2_ref,
               out_ref, patch1_ref, xpad2_ref, patch2_ref):
        t = pl.program_id(1)

        # ---- stage 1: conv+BN+ReLU on TH+2 rows; taps sliced straight out of
        #      the haloed input block (tile-local row 1 is the first needed row).
        y1 = conv3x3_bn_relu(x_ref, W, P1, cin_p, patch1_ref, w1_ref,
                             s1_ref[...], t1_ref[...])

        # ---- stage-1 -> stage-2 staging slab (compute dtype) ----
        band = jnp.zeros((PAD2, cp), compute_dtype)
        xpad2_ref[pl.ds(0, PAD2), :] = band           # slack bands: only ever read
        xpad2_ref[pl.ds(PAD2 + P1, PAD2), :] = band   # into masked tap positions
        xpad2_ref[pl.ds(PAD2, P1), :] = y1.astype(compute_dtype)

        # conv2's zero padding: stage-1 halo rows that fall OUTSIDE the image
        # must be exact zeros (otherwise they'd be ReLU(shift)).  Content-based
        # per-tile condition, safe under "parallel" grid semantics.
        zrow = jnp.zeros((W, cp), compute_dtype)

        @pl.when(t == 0)
        def _():
            xpad2_ref[pl.ds(PAD2, W), :] = zrow

        @pl.when(t == pl.num_programs(1) - 1)
        def _():
            xpad2_ref[pl.ds(PAD2 + (TH + 1) * W, W), :] = zrow

        # ---- stage 2 ----
        y2 = conv3x3_bn_relu(xpad2_ref, PAD2, P2, cp, patch2_ref, w2_ref,
                             s2_ref[...], t2_ref[...])
        out_ref[...] = y2.astype(out_ref.dtype)

    return kernel


def _fold_bn(conv_bias, gamma, beta, mean, var, eps=1e-5):
    scale = gamma / jnp.sqrt(var + eps)
    shift = beta + (conv_bias - mean) * scale
    return scale.astype(jnp.float32), shift.astype(jnp.float32)


def _pack_conv_weight(w_oihw, cin_pad, cout_pad, dtype):
    """PyTorch (O, I, 3, 3) -> im2col-folded, channel-padded (9*cin_pad, cout_pad)."""
    o, i = w_oihw.shape[0], w_oihw.shape[1]
    w = jnp.transpose(w_oihw, (2, 3, 1, 0))               # (3, 3, I, O)
    w = jnp.pad(w, ((0, 0), (0, 0), (0, cin_pad - i), (0, cout_pad - o)))
    return w.reshape(9 * cin_pad, cout_pad).astype(dtype)


def _pad_row(v, n):
    return jnp.pad(v, (0, n - v.shape[0])).reshape(1, n).astype(jnp.float32)


def double_conv(x_nchw, params, *, compute_dtype=jnp.bfloat16, tile_h=None,
                lane_multiple=128):
    """Equivalent of DoubleConv.forward on an NCHW input (eval-mode BN).

    Returns an NCHW array in `compute_dtype`.
    """
    N, cin, H, W = x_nchw.shape
    cout = params["w1"].shape[0]
    cbytes = jnp.dtype(compute_dtype).itemsize

    cp = _round_up(cout, lane_multiple)                  # lane-dense padded Cout
    cin_p = _round_up(cin, 16 if cbytes == 2 else 8)     # avoid sub-vreg tap stores

    vmem_cap = _vmem_capacity_bytes()
    vmem_limit = int(max(32 << 20, min(vmem_cap - (8 << 20), 120 << 20)))
    if tile_h is None:
        tile_h = _pick_tile_h(H, W, cin_p, cp, compute_dtype,
                              budget=(3 * vmem_limit) // 4)
    if H % tile_h != 0:
        raise ValueError(f"tile_h={tile_h} must divide H={H}")
    TH = tile_h
    n_th = H // TH
    p1 = (TH + 2) * W
    p2 = TH * W
    r_in = (TH + 6) * W   # TH rows + 2-row halo each side + 1 slack row each side
    pad2 = _slack_rows(compute_dtype)

    # NCHW -> NHWC (channels on lanes), zero-pad 3 rows top/bottom (2-row halo
    # + 1 slice-slack row) and the input channels, then gather per-tile slabs.
    x = jnp.transpose(x_nchw, (0, 2, 3, 1)).astype(compute_dtype)
    x = jnp.pad(x, ((0, 0), (3, 3), (0, 0), (0, cin_p - cin)))
    row_idx = jnp.arange(n_th)[:, None] * TH + jnp.arange(TH + 6)[None, :]
    x_tiles = x[:, row_idx].reshape(N, n_th, r_in, cin_p)

    w1 = _pack_conv_weight(params["w1"], cin_p, cp, compute_dtype)
    w2 = _pack_conv_weight(params["w2"], cp, cp, compute_dtype)
    s1, t1 = _fold_bn(params["b1"], params["gamma1"], params["beta1"],
                      params["mean1"], params["var1"])
    s2, t2 = _fold_bn(params["b2"], params["gamma2"], params["beta2"],
                      params["mean2"], params["var2"])
    s1, t1, s2, t2 = [_pad_row(v, cp) for v in (s1, t1, s2, t2)]

    kernel = _make_double_conv_kernel(TH, W, cin_p, cp, compute_dtype)

    def _const_spec(shape):
        # Grid-invariant blocks (constant index_map) are only fetched once.
        return pl.BlockSpec(shape, lambda n, t: (0, 0))

    out = pl.pallas_call(
        kernel,
        out_shape=jax.ShapeDtypeStruct((N, n_th, p2, cp), compute_dtype),
        grid=(N, n_th),
        in_specs=[
            pl.BlockSpec((None, None, r_in, cin_p), lambda n, t: (n, t, 0, 0)),
            _const_spec((9 * cin_p, cp)),      # w1
            _const_spec((1, cp)),              # scale1
            _const_spec((1, cp)),              # shift1
            _const_spec((9 * cp, cp)),         # w2
            _const_spec((1, cp)),              # scale2
            _const_spec((1, cp)),              # shift2
        ],
        out_specs=pl.BlockSpec((None, None, p2, cp), lambda n, t: (n, t, 0, 0)),
        scratch_shapes=[
            pltpu.VMEM((p1, 9 * cin_p), compute_dtype),       # stage-1 im2col
            pltpu.VMEM((p1 + 2 * pad2, cp), compute_dtype),   # stage-1 staging slab
            pltpu.VMEM((p2, 9 * cp), compute_dtype),          # stage-2 im2col
        ],
        compiler_params=pltpu.CompilerParams(
            dimension_semantics=("parallel", "parallel"),
            vmem_limit_bytes=vmem_limit,
        ),
    )(x_tiles, w1, s1, t1, w2, s2, t2)

    out = out.reshape(N, H, W, cp)[..., :cout]
    return jnp.transpose(out, (0, 3, 1, 2))    # NHWC -> NCHW


def _reference_double_conv(x_nchw, params):
    """Pure-JAX (XLA) f32 reference for correctness checking."""
    def conv_bn_relu(x, w_oihw, bias, gamma, beta, mean, var):
        y = jax.lax.conv_general_dilated(
            x, w_oihw, window_strides=(1, 1), padding=((1, 1), (1, 1)),
            dimension_numbers=("NCHW", "OIHW", "NCHW"))
        s, t = _fold_bn(bias, gamma, beta, mean, var)
        y = y * s[None, :, None, None] + t[None, :, None, None]
        return jnp.maximum(y, 0.0)

    h = conv_bn_relu(x_nchw, params["w1"], params["b1"], params["gamma1"],
                     params["beta1"], params["mean1"], params["var1"])
    return conv_bn_relu(h, params["w2"], params["b2"], params["gamma2"],
                        params["beta2"], params["mean2"], params["var2"])


def _init_params(key, in_ch, out_ch):
    ks = jax.random.split(key, 12)
    return {
        "w1": 0.1 * jax.random.normal(ks[0], (out_ch, in_ch, 3, 3), jnp.float32),
        "b1": 0.1 * jax.random.normal(ks[1], (out_ch,), jnp.float32),
        "gamma1": 1.0 + 0.1 * jax.random.normal(ks[2], (out_ch,), jnp.float32),
        "beta1": 0.1 * jax.random.normal(ks[3], (out_ch,), jnp.float32),
        "mean1": 0.1 * jax.random.normal(ks[4], (out_ch,), jnp.float32),
        "var1": jax.random.uniform(ks[5], (out_ch,), jnp.float32, 0.5, 1.5),
        "w2": 0.1 * jax.random.normal(ks[6], (out_ch, out_ch, 3, 3), jnp.float32),
        "b2": 0.1 * jax.random.normal(ks[7], (out_ch,), jnp.float32),
        "gamma2": 1.0 + 0.1 * jax.random.normal(ks[8], (out_ch,), jnp.float32),
        "beta2": 0.1 * jax.random.normal(ks[9], (out_ch,), jnp.float32),
        "mean2": 0.1 * jax.random.normal(ks[10], (out_ch,), jnp.float32),
        "var2": jax.random.uniform(ks[11], (out_ch,), jnp.float32, 0.5, 1.5),
    }


if __name__ == "__main__":
    key = jax.random.PRNGKey(0)
    k_x, k_p = jax.random.split(key)

    N, in_ch, out_ch, H, W = 2, 4, 8, 16, 16
    x = jax.random.normal(k_x, (N, in_ch, H, W), jnp.float32)  # NCHW, like PyTorch
    params = _init_params(k_p, in_ch, out_ch)

    ref = jax.block_until_ready(_reference_double_conv(x, params))

    # 1) Exact-math path (f32 compute), forced 2-tile H split -> exercises the
    #    halo / boundary-zeroing logic; checked tightly against the reference.
    f32_fn = jax.jit(functools.partial(double_conv,
                                       compute_dtype=jnp.float32, tile_h=8))
    out_f32 = jax.block_until_ready(f32_fn(x, params))
    assert out_f32.shape == (N, out_ch, H, W), out_f32.shape
    err = float(jnp.max(jnp.abs(out_f32 - ref)))
    assert jnp.allclose(out_f32, ref, rtol=1e-4, atol=1e-4), err

    # 2) Performance path (bf16 compute, auto H tile) -> loose tolerance.
    bf16_fn = jax.jit(functools.partial(double_conv, compute_dtype=jnp.bfloat16))
    out_bf16 = jax.block_until_ready(bf16_fn(x, params))
    assert out_bf16.shape == (N, out_ch, H, W), out_bf16.shape
    err_bf = float(jnp.max(jnp.abs(out_bf16.astype(jnp.float32) - ref)))
    assert jnp.allclose(out_bf16.astype(jnp.float32), ref,
                        rtol=5e-2, atol=5e-2), err_bf

    print("KERNEL_OK")
</pallas_src>

<mosaic_0001>
module attributes {stable_mosaic.version = 11 : i64} {
  func.func @kernel(%arg0: i32, %arg1: i32, %arg2: memref<1x1x224x8xf32, #tpu.memory_space<vmem>>, %arg3: memref<72x128xf32, #tpu.memory_space<vmem>>, %arg4: memref<1x128xf32, #tpu.memory_space<vmem>>, %arg5: memref<1x128xf32, #tpu.memory_space<vmem>>, %arg6: memref<1152x128xf32, #tpu.memory_space<vmem>>, %arg7: memref<1x128xf32, #tpu.memory_space<vmem>>, %arg8: memref<1x128xf32, #tpu.memory_space<vmem>>, %arg9: memref<1x1x128x128xf32, #tpu.memory_space<vmem>>, %arg10: memref<160x72xf32, #tpu.memory_space<vmem>>, %arg11: memref<176x128xf32, #tpu.memory_space<vmem>>, %arg12: memref<128x1152xf32, #tpu.memory_space<vmem>>) attributes {dimension_semantics = [#tpu.dimension_semantics<parallel>, #tpu.dimension_semantics<parallel>], iteration_bounds = array<i64: 2, 2>, scalar_prefetch = 0 : i64, scratch_operands = 3 : i64, tpu.core_type = #tpu.core_type<tc>, window_params = [{transform_indices = @transform_0, window_bounds = array<i64: 1, 1, 224, 8>}, {pipeline_mode = #tpu.pipeline_mode<synchronous>, transform_indices = @transform_1, window_bounds = array<i64: 72, 128>}, {pipeline_mode = #tpu.pipeline_mode<synchronous>, transform_indices = @transform_2, window_bounds = array<i64: 1, 128>}, {pipeline_mode = #tpu.pipeline_mode<synchronous>, transform_indices = @transform_3, window_bounds = array<i64: 1, 128>}, {pipeline_mode = #tpu.pipeline_mode<synchronous>, transform_indices = @transform_4, window_bounds = array<i64: 1152, 128>}, {pipeline_mode = #tpu.pipeline_mode<synchronous>, transform_indices = @transform_5, window_bounds = array<i64: 1, 128>}, {pipeline_mode = #tpu.pipeline_mode<synchronous>, transform_indices = @transform_6, window_bounds = array<i64: 1, 128>}, {transform_indices = @transform_7, window_bounds = array<i64: 1, 1, 128, 128>}]} {
    %c0 = arith.constant 0 : index
    %c0_0 = arith.constant 0 : index
    %0 = vector.load %arg4[%c0, %c0_0] : memref<1x128xf32, #tpu.memory_space<vmem>>, vector<1x128xf32>
    %c0_1 = arith.constant 0 : index
    %c0_2 = arith.constant 0 : index
    %1 = vector.load %arg5[%c0_1, %c0_2] : memref<1x128xf32, #tpu.memory_space<vmem>>, vector<1x128xf32>
    %2 = tpu.iota {dimensions = array<i32: 0>} : vector<160x1xi32>
    %c16_i32 = arith.constant 16 : i32
    %c0_i32 = arith.constant 0 : i32
    %3 = arith.cmpi eq, %c16_i32, %c0_i32 : i32
    %c1_i32 = arith.constant 1 : i32
    %4 = arith.select %3, %c1_i32, %c16_i32 : i32
    %5 = vector.broadcast %4 : i32 to vector<160x1xi32>
    %6 = arith.remsi %2, %5 : vector<160x1xi32>
    %c0_i32_3 = arith.constant 0 : i32
    %7 = vector.broadcast %c0_i32_3 : i32 to vector<160x1xi32>
    %8 = arith.cmpi ne, %6, %7 : vector<160x1xi32>
    %c0_i32_4 = arith.constant 0 : i32
    %9 = vector.broadcast %c0_i32_4 : i32 to vector<160x1xi32>
    %10 = arith.cmpi slt, %6, %9 : vector<160x1xi32>
    %c0_i32_5 = arith.constant 0 : i32
    %11 = arith.cmpi slt, %4, %c0_i32_5 : i32
    %12 = vector.broadcast %11 : i1 to vector<160x1xi1>
    %13 = vector.broadcast %12 : vector<160x1xi1> to vector<160x1xi1>
    %14 = arith.xori %10, %13 : vector<160x1xi1>
    %15 = arith.andi %14, %8 : vector<160x1xi1>
    %16 = vector.broadcast %4 : i32 to vector<160x1xi32>
    %17 = arith.addi %6, %16 : vector<160x1xi32>
    %18 = arith.select %15, %17, %6 : vector<160x1xi1>, vector<160x1xi32>
    %c0_i32_6 = arith.constant 0 : i32
    %19 = vector.broadcast %c0_i32_6 : i32 to vector<160x1xi32>
    %20 = arith.cmpi sgt, %18, %19 : vector<160x1xi32>
    %21 = vector.shape_cast %20 : vector<160x1xi1> to vector<160x1xi1>
    %22 = vector.broadcast %21 : vector<160x1xi1> to vector<160x8xi1>
    %c15_i32 = arith.constant 15 : i32
    %23 = vector.broadcast %c15_i32 : i32 to vector<160x1xi32>
    %24 = arith.cmpi slt, %18, %23 : vector<160x1xi32>
    %25 = vector.shape_cast %24 : vector<160x1xi1> to vector<160x1xi1>
    %26 = vector.broadcast %25 : vector<160x1xi1> to vector<160x8xi1>
    %c0_7 = arith.constant 0 : index
    %c0_8 = arith.constant 0 : index
    %c15 = arith.constant 15 : index
    %c0_9 = arith.constant 0 : index
    %27 = vector.load %arg2[%c0_7, %c0_8, %c15, %c0_9] : memref<1x1x224x8xf32, #tpu.memory_space<vmem>>, vector<1x1x160x8xf32>
    %28 = vector.shape_cast %27 : vector<1x1x160x8xf32> to vector<160x8xf32>
    %c0_i32_10 = arith.constant 0 : i32
    %29 = arith.sitofp %c0_i32_10 : i32 to f32
    %30 = vector.broadcast %29 : f32 to vector<160x8xf32>
    %31 = arith.select %22, %28, %30 : vector<160x8xi1>, vector<160x8xf32>
    %c0_11 = arith.constant 0 : index
    %c0_12 = arith.constant 0 : index
    %32 = vector.load %arg10[%c0_11, %c0_12] : memref<160x72xf32, #tpu.memory_space<vmem>>, vector<160x8xf32>
    tpu.vector_store %arg10[%c0_11, %c0_12], %31 {strides = array<i32>} : memref<160x72xf32, #tpu.memory_space<vmem>>, vector<160x8xf32>,
    %c0_13 = arith.constant 0 : index
    %c0_14 = arith.constant 0 : index
    %c16 = arith.constant 16 : index
    %c0_15 = arith.constant 0 : index
    %33 = vector.load %arg2[%c0_13, %c0_14, %c16, %c0_15] : memref<1x1x224x8xf32, #tpu.memory_space<vmem>>, vector<1x1x160x8xf32>
    %34 = vector.shape_cast %33 : vector<1x1x160x8xf32> to vector<160x8xf32>
    %c0_16 = arith.constant 0 : index
    %c8 = arith.constant 8 : index
    %35 = vector.load %arg10[%c0_16, %c8] : memref<160x72xf32, #tpu.memory_space<vmem>>, vector<160x8xf32>
    tpu.vector_store %arg10[%c0_16, %c8], %34 {strides = array<i32>} : memref<160x72xf32, #tpu.memory_space<vmem>>, vector<160x8xf32>,
    %c0_17 = arith.constant 0 : index
    %c0_18 = arith.constant 0 : index
    %c17 = arith.constant 17 : index
    %c0_19 = arith.constant 0 : index
    %36 = vector.load %arg2[%c0_17, %c0_18, %c17, %c0_19] : memref<1x1x224x8xf32, #tpu.memory_space<vmem>>, vector<1x1x160x8xf32>
    %37 = vector.shape_cast %36 : vector<1x1x160x8xf32> to vector<160x8xf32>
    %c0_i32_20 = arith.constant 0 : i32
    %38 = arith.sitofp %c0_i32_20 : i32 to f32
    %39 = vector.broadcast %38 : f32 to vector<160x8xf32>
    %40 = arith.select %26, %37, %39 : vector<160x8xi1>, vector<160x8xf32>
    %c0_21 = arith.constant 0 : index
    %c16_22 = arith.constant 16 : index
    %41 = vector.load %arg10[%c0_21, %c16_22] : memref<160x72xf32, #tpu.memory_space<vmem>>, vector<160x8xf32>
    tpu.vector_store %arg10[%c0_21, %c16_22], %40 {strides = array<i32>} : memref<160x72xf32, #tpu.memory_space<vmem>>, vector<160x8xf32>,
    %c0_23 = arith.constant 0 : index
    %c0_24 = arith.constant 0 : index
    %c31 = arith.constant 31 : index
    %c0_25 = arith.constant 0 : index
    %42 = vector.load %arg2[%c0_23, %c0_24, %c31, %c0_25] : memref<1x1x224x8xf32, #tpu.memory_space<vmem>>, vector<1x1x160x8xf32>
    %43 = vector.shape_cast %42 : vector<1x1x160x8xf32> to vector<160x8xf32>
    %c0_i32_26 = arith.constant 0 : i32
    %44 = arith.sitofp %c0_i32_26 : i32 to f32
    %45 = vector.broadcast %44 : f32 to vector<160x8xf32>
    %46 = arith.select %22, %43, %45 : vector<160x8xi1>, vector<160x8xf32>
    %c0_27 = arith.constant 0 : index
    %c24 = arith.constant 24 : index
    %47 = vector.load %arg10[%c0_27, %c24] : memref<160x72xf32, #tpu.memory_space<vmem>>, vector<160x8xf32>
    tpu.vector_store %arg10[%c0_27, %c24], %46 {strides = array<i32>} : memref<160x72xf32, #tpu.memory_space<vmem>>, vector<160x8xf32>,
    %c0_28 = arith.constant 0 : index
    %c0_29 = arith.constant 0 : index
    %c32 = arith.constant 32 : index
    %c0_30 = arith.constant 0 : index
    %48 = vector.load %arg2[%c0_28, %c0_29, %c32, %c0_30] : memref<1x1x224x8xf32, #tpu.memory_space<vmem>>, vector<1x1x160x8xf32>
    %49 = vector.shape_cast %48 : vector<1x1x160x8xf32> to vector<160x8xf32>
    %c0_31 = arith.constant 0 : index
    %c32_32 = arith.constant 32 : index
    %50 = vector.load %arg10[%c0_31, %c32_32] : memref<160x72xf32, #tpu.memory_space<vmem>>, vector<160x8xf32>
    tpu.vector_store %arg10[%c0_31, %c32_32], %49 {strides = array<i32>} : memref<160x72xf32, #tpu.memory_space<vmem>>, vector<160x8xf32>,
    %c0_33 = arith.constant 0 : index
    %c0_34 = arith.constant 0 : index
    %c33 = arith.constant 33 : index
    %c0_35 = arith.constant 0 : index
    %51 = vector.load %arg2[%c0_33, %c0_34, %c33, %c0_35] : memref<1x1x224x8xf32, #tpu.memory_space<vmem>>, vector<1x1x160x8xf32>
    %52 = vector.shape_cast %51 : vector<1x1x160x8xf32> to vector<160x8xf32>
    %c0_i32_36 = arith.constant 0 : i32
    %53 = arith.sitofp %c0_i32_36 : i32 to f32
    %54 = vector.broadcast %53 : f32 to vector<160x8xf32>
    %55 = arith.select %26, %52, %54 : vector<160x8xi1>, vector<160x8xf32>
    %c0_37 = arith.constant 0 : index
    %c40 = arith.constant 40 : index
    %56 = vector.load %arg10[%c0_37, %c40] : memref<160x72xf32, #tpu.memory_space<vmem>>, vector<160x8xf32>
    tpu.vector_store %arg10[%c0_37, %c40], %55 {strides = array<i32>} : memref<160x72xf32, #tpu.memory_space<vmem>>, vector<160x8xf32>,
    %c0_38 = arith.constant 0 : index
    %c0_39 = arith.constant 0 : index
    %c47 = arith.constant 47 : index
    %c0_40 = arith.constant 0 : index
    %57 = vector.load %arg2[%c0_38, %c0_39, %c47, %c0_40] : memref<1x1x224x8xf32, #tpu.memory_space<vmem>>, vector<1x1x160x8xf32>
    %58 = vector.shape_cast %57 : vector<1x1x160x8xf32> to vector<160x8xf32>
    %c0_i32_41 = arith.constant 0 : i32
    %59 = arith.sitofp %c0_i32_41 : i32 to f32
    %60 = vector.broadcast %59 : f32 to vector<160x8xf32>
    %61 = arith.select %22, %58, %60 : vector<160x8xi1>, vector<160x8xf32>
    %c0_42 = arith.constant 0 : index
    %c48 = arith.constant 48 : index
    %62 = vector.load %arg10[%c0_42, %c48] : memref<160x72xf32, #tpu.memory_space<vmem>>, vector<160x8xf32>
    tpu.vector_store %arg10[%c0_42, %c48], %61 {strides = array<i32>} : memref<160x72xf32, #tpu.memory_space<vmem>>, vector<160x8xf32>,
    %c0_43 = arith.constant 0 : index
    %c0_44 = arith.constant 0 : index
    %c48_45 = arith.constant 48 : index
    %c0_46 = arith.constant 0 : index
    %63 = vector.load %arg2[%c0_43, %c0_44, %c48_45, %c0_46] : memref<1x1x224x8xf32, #tpu.memory_space<vmem>>, vector<1x1x160x8xf32>
    %64 = vector.shape_cast %63 : vector<1x1x160x8xf32> to vector<160x8xf32>
    %c0_47 = arith.constant 0 : index
    %c56 = arith.constant 56 : index
    %65 = vector.load %arg10[%c0_47, %c56] : memref<160x72xf32, #tpu.memory_space<vmem>>, vector<160x8xf32>
    tpu.vector_store %arg10[%c0_47, %c56], %64 {strides = array<i32>} : memref<160x72xf32, #tpu.memory_space<vmem>>, vector<160x8xf32>,
    %c0_48 = arith.constant 0 : index
    %c0_49 = arith.constant 0 : index
    %c49 = arith.constant 49 : index
    %c0_50 = arith.constant 0 : index
    %66 = vector.load %arg2[%c0_48, %c0_49, %c49, %c0_50] : memref<1x1x224x8xf32, #tpu.memory_space<vmem>>, vector<1x1x160x8xf32>
    %67 = vector.shape_cast %66 : vector<1x1x160x8xf32> to vector<160x8xf32>
    %c0_i32_51 = arith.constant 0 : i32
    %68 = arith.sitofp %c0_i32_51 : i32 to f32
    %69 = vector.broadcast %68 : f32 to vector<160x8xf32>
    %70 = arith.select %26, %67, %69 : vector<160x8xi1>, vector<160x8xf32>
    %c0_52 = arith.constant 0 : index
    %c64 = arith.constant 64 : index
    %71 = vector.load %arg10[%c0_52, %c64] : memref<160x72xf32, #tpu.memory_space<vmem>>, vector<160x8xf32>
    tpu.vector_store %arg10[%c0_52, %c64], %70 {strides = array<i32>} : memref<160x72xf32, #tpu.memory_space<vmem>>, vector<160x8xf32>,
    %c0_53 = arith.constant 0 : index
    %c0_54 = arith.constant 0 : index
    %72 = vector.load %arg10[%c0_53, %c0_54] : memref<160x72xf32, #tpu.memory_space<vmem>>, vector<160x72xf32>
    %c0_55 = arith.constant 0 : index
    %c0_56 = arith.constant 0 : index
    %73 = vector.load %arg3[%c0_55, %c0_56] : memref<72x128xf32, #tpu.memory_space<vmem>>, vector<72x128xf32>
    %cst = arith.constant dense<0.000000e+00> : vector<160x128xf32>
    %74 = tpu.matmul %72, %73, %cst {dimension_numbers = #tpu.dot_dimension_numbers<[1], [0], [0], [1], [0, 0, 1, 1], [], []>} : vector<160x72xf32>, vector<72x128xf32>, vector<160x128xf32> -> vector<160x128xf32>
    %75 = vector.broadcast %0 : vector<1x128xf32> to vector<160x128xf32>
    %76 = arith.mulf %74, %75 : vector<160x128xf32>
    %77 = vector.broadcast %1 : vector<1x128xf32> to vector<160x128xf32>
    %78 = arith.addf %76, %77 : vector<160x128xf32>
    %cst_57 = arith.constant 0.000000e+00 : f32
    %79 = vector.broadcast %cst_57 : f32 to vector<160x128xf32>
    %80 = arith.maximumf %78, %79 : vector<160x128xf32>
    %cst_58 = arith.constant 0.000000e+00 : f32
    %81 = vector.broadcast %cst_58 : f32 to vector<8x128xf32>
    %c0_59 = arith.constant 0 : index
    %c0_60 = arith.constant 0 : index
    %82 = vector.load %arg11[%c0_59, %c0_60] : memref<176x128xf32, #tpu.memory_space<vmem>>, vector<8x128xf32>
    tpu.vector_store %arg11[%c0_59, %c0_60], %81 {strides = array<i32>} : memref<176x128xf32, #tpu.memory_space<vmem>>, vector<8x128xf32>,
    %c168 = arith.constant 168 : index
    %c0_61 = arith.constant 0 : index
    %83 = vector.load %arg11[%c168, %c0_61] : memref<176x128xf32, #tpu.memory_space<vmem>>, vector<8x128xf32>
    tpu.vector_store %arg11[%c168, %c0_61], %81 {strides = array<i32>} : memref<176x128xf32, #tpu.memory_space<vmem>>, vector<8x128xf32>,
    %c8_62 = arith.constant 8 : index
    %c0_63 = arith.constant 0 : index
    %84 = vector.load %arg11[%c8_62, %c0_63] : memref<176x128xf32, #tpu.memory_space<vmem>>, vector<160x128xf32>
    tpu.vector_store %arg11[%c8_62, %c0_63], %80 {strides = array<i32>} : memref<176x128xf32, #tpu.memory_space<vmem>>, vector<160x128xf32>,
    %cst_64 = arith.constant 0.000000e+00 : f32
    %85 = vector.broadcast %cst_64 : f32 to vector<16x128xf32>
    %c0_i32_65 = arith.constant 0 : i32
    %86 = arith.cmpi eq, %arg1, %c0_i32_65 : i32
    %87 = arith.extui %86 : i1 to i32
    %c0_i32_66 = arith.constant 0 : i32
    %88 = arith.cmpi ne, %87, %c0_i32_66 : i32
    scf.if %88 {
      %c8_119 = arith.constant 8 : index
      %c0_120 = arith.constant 0 : index
      %167 = vector.load %arg11[%c8_119, %c0_120] : memref<176x128xf32, #tpu.memory_space<vmem>>, vector<16x128xf32>
      tpu.vector_store %arg11[%c8_119, %c0_120], %85 {strides = array<i32>} : memref<176x128xf32, #tpu.memory_space<vmem>>, vector<16x128xf32>,
    } else {
    }
    %c1_i32_67 = arith.constant 1 : i32
    %89 = arith.cmpi eq, %arg1, %c1_i32_67 : i32
    %90 = arith.extui %89 : i1 to i32
    %c0_i32_68 = arith.constant 0 : i32
    %91 = arith.cmpi ne, %90, %c0_i32_68 : i32
    scf.if %91 {
      %c152 = arith.constant 152 : index
      %c0_119 = arith.constant 0 : index
      %167 = vector.load %arg11[%c152, %c0_119] : memref<176x128xf32, #tpu.memory_space<vmem>>, vector<16x128xf32>
      tpu.vector_store %arg11[%c152, %c0_119], %85 {strides = array<i32>} : memref<176x128xf32, #tpu.memory_space<vmem>>, vector<16x128xf32>,
    } else {
    }
    %c0_69 = arith.constant 0 : index
    %c0_70 = arith.constant 0 : index
    %92 = vector.load %arg7[%c0_69, %c0_70] : memref<1x128xf32, #tpu.memory_space<vmem>>, vector<1x128xf32>
    %c0_71 = arith.constant 0 : index
    %c0_72 = arith.constant 0 : index
    %93 = vector.load %arg8[%c0_71, %c0_72] : memref<1x128xf32, #tpu.memory_space<vmem>>, vector<1x128xf32>
    %94 = tpu.iota {dimensions = array<i32: 0>} : vector<128x1xi32>
    %c16_i32_73 = arith.constant 16 : i32
    %c0_i32_74 = arith.constant 0 : i32
    %95 = arith.cmpi eq, %c16_i32_73, %c0_i32_74 : i32
    %c1_i32_75 = arith.constant 1 : i32
    %96 = arith.select %95, %c1_i32_75, %c16_i32_73 : i32
    %97 = vector.broadcast %96 : i32 to vector<128x1xi32>
    %98 = arith.remsi %94, %97 : vector<128x1xi32>
    %c0_i32_76 = arith.constant 0 : i32
    %99 = vector.broadcast %c0_i32_76 : i32 to vector<128x1xi32>
    %100 = arith.cmpi ne, %98, %99 : vector<128x1xi32>
    %c0_i32_77 = arith.constant 0 : i32
    %101 = vector.broadcast %c0_i32_77 : i32 to vector<128x1xi32>
    %102 = arith.cmpi slt, %98, %101 : vector<128x1xi32>
    %c0_i32_78 = arith.constant 0 : i32
    %103 = arith.cmpi slt, %96, %c0_i32_78 : i32
    %104 = vector.broadcast %103 : i1 to vector<128x1xi1>
    %105 = vector.broadcast %104 : vector<128x1xi1> to vector<128x1xi1>
    %106 = arith.xori %102, %105 : vector<128x1xi1>
    %107 = arith.andi %106, %100 : vector<128x1xi1>
    %108 = vector.broadcast %96 : i32 to vector<128x1xi32>
    %109 = arith.addi %98, %108 : vector<128x1xi32>
    %110 = arith.select %107, %109, %98 : vector<128x1xi1>, vector<128x1xi32>
    %c0_i32_79 = arith.constant 0 : i32
    %111 = vector.broadcast %c0_i32_79 : i32 to vector<128x1xi32>
    %112 = arith.cmpi sgt, %110, %111 : vector<128x1xi32>
    %113 = vector.shape_cast %112 : vector<128x1xi1> to vector<128x1xi1>
    %114 = vector.broadcast %113 : vector<128x1xi1> to vector<128x128xi1>
    %c15_i32_80 = arith.constant 15 : i32
    %115 = vector.broadcast %c15_i32_80 : i32 to vector<128x1xi32>
    %116 = arith.cmpi slt, %110, %115 : vector<128x1xi32>
    %117 = vector.shape_cast %116 : vector<128x1xi1> to vector<128x1xi1>
    %118 = vector.broadcast %117 : vector<128x1xi1> to vector<128x128xi1>
    %c7 = arith.constant 7 : index
    %c0_81 = arith.constant 0 : index
    %119 = vector.load %arg11[%c7, %c0_81] : memref<176x128xf32, #tpu.memory_space<vmem>>, vector<128x128xf32>
    %c0_i32_82 = arith.constant 0 : i32
    %120 = arith.sitofp %c0_i32_82 : i32 to f32
    %121 = vector.broadcast %120 : f32 to vector<128x128xf32>
    %122 = arith.select %114, %119, %121 : vector<128x128xi1>, vector<128x128xf32>
    %c0_83 = arith.constant 0 : index
    %c0_84 = arith.constant 0 : index
    %123 = vector.load %arg12[%c0_83, %c0_84] : memref<128x1152xf32, #tpu.memory_space<vmem>>, vector<128x128xf32>
    tpu.vector_store %arg12[%c0_83, %c0_84], %122 {strides = array<i32>} : memref<128x1152xf32, #tpu.memory_space<vmem>>, vector<128x128xf32>,
    %c8_85 = arith.constant 8 : index
    %c0_86 = arith.constant 0 : index
    %124 = vector.load %arg11[%c8_85, %c0_86] : memref<176x128xf32, #tpu.memory_space<vmem>>, vector<128x128xf32>
    %c0_87 = arith.constant 0 : index
    %c128 = arith.constant 128 : index
    %125 = vector.load %arg12[%c0_87, %c128] : memref<128x1152xf32, #tpu.memory_space<vmem>>, vector<128x128xf32>
    tpu.vector_store %arg12[%c0_87, %c128], %124 {strides = array<i32>} : memref<128x1152xf32, #tpu.memory_space<vmem>>, vector<128x128xf32>,
    %c9 = arith.constant 9 : index
    %c0_88 = arith.constant 0 : index
    %126 = vector.load %arg11[%c9, %c0_88] : memref<176x128xf32, #tpu.memory_space<vmem>>, vector<128x128xf32>
    %c0_i32_89 = arith.constant 0 : i32
    %127 = arith.sitofp %c0_i32_89 : i32 to f32
    %128 = vector.broadcast %127 : f32 to vector<128x128xf32>
    %129 = arith.select %118, %126, %128 : vector<128x128xi1>, vector<128x128xf32>
    %c0_90 = arith.constant 0 : index
    %c256 = arith.constant 256 : index
    %130 = vector.load %arg12[%c0_90, %c256] : memref<128x1152xf32, #tpu.memory_space<vmem>>, vector<128x128xf32>
    tpu.vector_store %arg12[%c0_90, %c256], %129 {strides = array<i32>} : memref<128x1152xf32, #tpu.memory_space<vmem>>, vector<128x128xf32>,
    %c23 = arith.constant 23 : index
    %c0_91 = arith.constant 0 : index
    %131 = vector.load %arg11[%c23, %c0_91] : memref<176x128xf32, #tpu.memory_space<vmem>>, vector<128x128xf32>
    %c0_i32_92 = arith.constant 0 : i32
    %132 = arith.sitofp %c0_i32_92 : i32 to f32
    %133 = vector.broadcast %132 : f32 to vector<128x128xf32>
    %134 = arith.select %114, %131, %133 : vector<128x128xi1>, vector<128x128xf32>
    %c0_93 = arith.constant 0 : index
    %c384 = arith.constant 384 : index
    %135 = vector.load %arg12[%c0_93, %c384] : memref<128x1152xf32, #tpu.memory_space<vmem>>, vector<128x128xf32>
    tpu.vector_store %arg12[%c0_93, %c384], %134 {strides = array<i32>} : memref<128x1152xf32, #tpu.memory_space<vmem>>, vector<128x128xf32>,
    %c24_94 = arith.constant 24 : index
    %c0_95 = arith.constant 0 : index
    %136 = vector.load %arg11[%c24_94, %c0_95] : memref<176x128xf32, #tpu.memory_space<vmem>>, vector<128x128xf32>
    %c0_96 = arith.constant 0 : index
    %c512 = arith.constant 512 : index
    %137 = vector.load %arg12[%c0_96, %c512] : memref<128x1152xf32, #tpu.memory_space<vmem>>, vector<128x128xf32>
    tpu.vector_store %arg12[%c0_96, %c512], %136 {strides = array<i32>} : memref<128x1152xf32, #tpu.memory_space<vmem>>, vector<128x128xf32>,
    %c25 = arith.constant 25 : index
    %c0_97 = arith.constant 0 : index
    %138 = vector.load %arg11[%c25, %c0_97] : memref<176x128xf32, #tpu.memory_space<vmem>>, vector<128x128xf32>
    %c0_i32_98 = arith.constant 0 : i32
    %139 = arith.sitofp %c0_i32_98 : i32 to f32
    %140 = vector.broadcast %139 : f32 to vector<128x128xf32>
    %141 = arith.select %118, %138, %140 : vector<128x128xi1>, vector<128x128xf32>
    %c0_99 = arith.constant 0 : index
    %c640 = arith.constant 640 : index
    %142 = vector.load %arg12[%c0_99, %c640] : memref<128x1152xf32, #tpu.memory_space<vmem>>, vector<128x128xf32>
    tpu.vector_store %arg12[%c0_99, %c640], %141 {strides = array<i32>} : memref<128x1152xf32, #tpu.memory_space<vmem>>, vector<128x128xf32>,
    %c39 = arith.constant 39 : index
    %c0_100 = arith.constant 0 : index
    %143 = vector.load %arg11[%c39, %c0_100] : memref<176x128xf32, #tpu.memory_space<vmem>>, vector<128x128xf32>
    %c0_i32_101 = arith.constant 0 : i32
    %144 = arith.sitofp %c0_i32_101 : i32 to f32
    %145 = vector.broadcast %144 : f32 to vector<128x128xf32>
    %146 = arith.select %114, %143, %145 : vector<128x128xi1>, vector<128x128xf32>
    %c0_102 = arith.constant 0 : index
    %c768 = arith.constant 768 : index
    %147 = vector.load %arg12[%c0_102, %c768] : memref<128x1152xf32, #tpu.memory_space<vmem>>, vector<128x128xf32>
    tpu.vector_store %arg12[%c0_102, %c768], %146 {strides = array<i32>} : memref<128x1152xf32, #tpu.memory_space<vmem>>, vector<128x128xf32>,
    %c40_103 = arith.constant 40 : index
    %c0_104 = arith.constant 0 : index
    %148 = vector.load %arg11[%c40_103, %c0_104] : memref<176x128xf32, #tpu.memory_space<vmem>>, vector<128x128xf32>
    %c0_105 = arith.constant 0 : index
    %c896 = arith.constant 896 : index
    %149 = vector.load %arg12[%c0_105, %c896] : memref<128x1152xf32, #tpu.memory_space<vmem>>, vector<128x128xf32>
    tpu.vector_store %arg12[%c0_105, %c896], %148 {strides = array<i32>} : memref<128x1152xf32, #tpu.memory_space<vmem>>, vector<128x128xf32>,
    %c41 = arith.constant 41 : index
    %c0_106 = arith.constant 0 : index
    %150 = vector.load %arg11[%c41, %c0_106] : memref<176x128xf32, #tpu.memory_space<vmem>>, vector<128x128xf32>
    %c0_i32_107 = arith.constant 0 : i32
    %151 = arith.sitofp %c0_i32_107 : i32 to f32
    %152 = vector.broadcast %151 : f32 to vector<128x128xf32>
    %153 = arith.select %118, %150, %152 : vector<128x128xi1>, vector<128x128xf32>
    %c0_108 = arith.constant 0 : index
    %c1024 = arith.constant 1024 : index
    %154 = vector.load %arg12[%c0_108, %c1024] : memref<128x1152xf32, #tpu.memory_space<vmem>>, vector<128x128xf32>
    tpu.vector_store %arg12[%c0_108, %c1024], %153 {strides = array<i32>} : memref<128x1152xf32, #tpu.memory_space<vmem>>, vector<128x128xf32>,
    %c0_109 = arith.constant 0 : index
    %c0_110 = arith.constant 0 : index
    %155 = vector.load %arg12[%c0_109, %c0_110] : memref<128x1152xf32, #tpu.memory_space<vmem>>, vector<128x1152xf32>
    %c0_111 = arith.constant 0 : index
    %c0_112 = arith.constant 0 : index
    %156 = vector.load %arg6[%c0_111, %c0_112] : memref<1152x128xf32, #tpu.memory_space<vmem>>, vector<1152x128xf32>
    %cst_113 = arith.constant dense<0.000000e+00> : vector<128x128xf32>
    %157 = tpu.matmul %155, %156, %cst_113 {dimension_numbers = #tpu.dot_dimension_numbers<[1], [0], [0], [1], [0, 0, 1, 1], [], []>} : vector<128x1152xf32>, vector<1152x128xf32>, vector<128x128xf32> -> vector<128x128xf32>
    %158 = vector.broadcast %92 : vector<1x128xf32> to vector<128x128xf32>
    %159 = arith.mulf %157, %158 : vector<128x128xf32>
    %160 = vector.broadcast %93 : vector<1x128xf32> to vector<128x128xf32>
    %161 = arith.addf %159, %160 : vector<128x128xf32>
    %cst_114 = arith.constant 0.000000e+00 : f32
    %162 = vector.broadcast %cst_114 : f32 to vector<128x128xf32>
    %163 = arith.maximumf %161, %162 : vector<128x128xf32>
    %c0_115 = arith.constant 0 : index
    %c0_116 = arith.constant 0 : index
    %c0_117 = arith.constant 0 : index
    %c0_118 = arith.constant 0 : index
    %164 = vector.load %arg9[%c0_115, %c0_116, %c0_117, %c0_118] : memref<1x1x128x128xf32, #tpu.memory_space<vmem>>, vector<1x1x128x128xf32>
    %165 = vector.shape_cast %164 : vector<1x1x128x128xf32> to vector<128x128xf32>
    %166 = vector.shape_cast %163 : vector<128x128xf32> to vector<1x1x128x128xf32>
    tpu.vector_store %arg9[%c0_115, %c0_116, %c0_117, %c0_118], %166 {strides = array<i32>} : memref<1x1x128x128xf32, #tpu.memory_space<vmem>>, vector<1x1x128x128xf32>,
    return
  }
  func.func @transform_0(%arg0: i32, %arg1: i32) -> (i32, i32, i32, i32) {
    %c0_i32 = arith.constant 0 : i32
    %c0_i32_0 = arith.constant 0 : i32
    %c0_i32_1 = arith.constant 0 : i32
    return %arg0, %arg1, %c0_i32, %c0_i32_0 : i32, i32, i32, i32
  }
  func.func @transform_1(%arg0: i32, %arg1: i32) -> (i32, i32) {
    %c0_i32 = arith.constant 0 : i32
    %c0_i32_0 = arith.constant 0 : i32
    %c0_i32_1 = arith.constant 0 : i32
    return %c0_i32, %c0_i32_0 : i32, i32
  }
  func.func @transform_2(%arg0: i32, %arg1: i32) -> (i32, i32) {
    %c0_i32 = arith.constant 0 : i32
    %c0_i32_0 = arith.constant 0 : i32
    %c0_i32_1 = arith.constant 0 : i32
    return %c0_i32, %c0_i32_0 : i32, i32
  }
  func.func @transform_3(%arg0: i32, %arg1: i32) -> (i32, i32) {
    %c0_i32 = arith.constant 0 : i32
    %c0_i32_0 = arith.constant 0 : i32
    %c0_i32_1 = arith.constant 0 : i32
    return %c0_i32, %c0_i32_0 : i32, i32
  }
  func.func @transform_4(%arg0: i32, %arg1: i32) -> (i32, i32) {
    %c0_i32 = arith.constant 0 : i32
    %c0_i32_0 = arith.constant 0 : i32
    %c0_i32_1 = arith.constant 0 : i32
    return %c0_i32, %c0_i32_0 : i32, i32
  }
  func.func @transform_5(%arg0: i32, %arg1: i32) -> (i32, i32) {
    %c0_i32 = arith.constant 0 : i32
    %c0_i32_0 = arith.constant 0 : i32
    %c0_i32_1 = arith.constant 0 : i32
    return %c0_i32, %c0_i32_0 : i32, i32
  }
  func.func @transform_6(%arg0: i32, %arg1: i32) -> (i32, i32) {
    %c0_i32 = arith.constant 0 : i32
    %c0_i32_0 = arith.constant 0 : i32
    %c0_i32_1 = arith.constant 0 : i32
    return %c0_i32, %c0_i32_0 : i32, i32
  }
  func.func @transform_7(%arg0: i32, %arg1: i32) -> (i32, i32, i32, i32) {
    %c0_i32 = arith.constant 0 : i32
    %c0_i32_0 = arith.constant 0 : i32
    %c0_i32_1 = arith.constant 0 : i32
    return %arg0, %arg1, %c0_i32, %c0_i32_0 : i32, i32, i32, i32
  }
}

</mosaic_0001>

<bundles_post_ra>
// kernel: double_conv.1
= control target key start
LH: loop header
LB: loop body
LE: loop exit
PB: predicated region body
PF: predicated region fallthrough
CT: control target
= control target key end

     0   :  { %s4472_s24 = smov 0   ;;  %s4474_s25 = smov 0   ;;  %s6278_s0 = inlined_call_operand.vmem [shape: f32[2,2,224,8], index: 0, kind: input, shape index: {}]   ;;  %s6279_s1 = inlined_call_operand.vmem [shape: f32[72,128], index: 1, kind: input, shape index: {}]   ;;  %s6280_s2 = inlined_call_operand.vmem [shape: f32[1,128], index: 2, kind: input, shape index: {}]   ;;  %s6281_s3 = inlined_call_operand.vmem [shape: f32[1,128], index: 3, kind: input, shape index: {}]   ;;  %s6282_s4 = inlined_call_operand.vmem [shape: f32[1152,128], index: 4, kind: input, shape index: {}]   ;;  %s6283_s5 = inlined_call_operand.vmem [shape: f32[1,128], index: 5, kind: input, shape index: {}]   ;;  %s6284_s6 = inlined_call_operand.vmem [shape: f32[1,128], index: 6, kind: input, shape index: {}]   ;;  %s6285_s7 = inlined_call_operand.vmem [shape: f32[2,2,128,128], index: 7, kind: output, shape index: {}]  }
   0x1   :  { %s4476_s26 = smov 0   ;;  %s4478_s27 = smov 0  }
   0x2   :  { %s4480_s28 = smov 0  }
   0x3 LB: > { %s26_s29 = sadd.s32 1, %s4411_s26  ;;  %s29_s30 = sadd.s32 1, %s4415_s27  ;;  %s4419_s28 = sphi %s4480_s28, %s17_s28   ;;  %s4415_s27 = sphi %s4478_s27, %s6551_s27   ;;  %s4411_s26 = sphi %s4476_s26, %s6550_s26   ;;  %s4407_s25 = sphi %s4474_s25, %s6549_s25   ;;  %s4403_s24 = sphi %s4472_s24, %s6548_s24  }
   0x4   : > { %p27_p0 = scmp.ge.s32.totalorder %s26_s29, 2  ;;  %p3762_p1 = scmp.ge.s32.totalorder %s4419_s28, 1 }
   0x5   : > { %p257_p2 = scmp.lt.s32.totalorder %s4419_s28, 5 }
   0x6   : > { %s6553_s29 = smov (%p27_p0, %s26_s29), 0  ;;  %s6555_s30 = smov (!%p27_p0, %s29_s30), %s4415_s27 }
   0x7   : > { %p258_p3 = pnand %p3762_p1, %p257_p2  ;;  %p31_p4 = scmp.ge.s32.totalorder %s6555_s30, 2 }
   0x9   : > { %s6557_s30 = smov (%p31_p4, %s6555_s30), 0  ;;  %261 = sbr.rel (%p258_p3) target bundleno = 1075 (0x433), region = 48 }
   0xe   : > { %p297_p5 = scmp.lt.s32.totalorder %s4407_s25, 1  ;;  %p299_p6 = scmp.lt.s32.totalorder %s4403_s24, 1  ;;  %v317_v0 = vlaneseq  ;;  %vm6287_vm0 = vcmask 64512   ;;  %v1855_v40 = vld [vmem:[%s6279_s1 + $0x40] sm:$0xff]  ;;  %v1854_v43 = vld [vmem:[%s6279_s1 + $0x38] sm:$0xff]  ;;  %v1853_v44 = vld [vmem:[%s6279_s1 + $0x30] sm:$0xff] }
   0xf   : > { %s4421_s23 = smov 8   ;;  %4224 = vmatprep.subr.mxu0 %v1855_v40  ;;  %v1852_v46 = vld [vmem:[%s6279_s1 + $0x28] sm:$0xff]  ;;  %v1851_v48 = vld [vmem:[%s6279_s1 + $0x20] sm:$0xff]  ;;  %v1850_v49 = vld [vmem:[%s6279_s1 + $0x18] sm:$0xff]  ;;  %vm6286_vm10 = vcmask 130112   ;;  %vm6289_vm12 = vcmask 195712  }
  0x10   : > { %s6559_s25 = smov (!%p297_p5, %s4407_s25), 1  ;;  %v4505_v1 = vshrl.u32 %v317_v0, 7  ;;  %4225 = vmatpush3.msra.mxu0 %v1855_v40  ;;  %v1849_v51 = vld [vmem:[%s6279_s1 + $0x10] sm:$0xff]  ;;  %v1848_v52 = vld [vmem:[%s6279_s1 + $0x8] sm:$0xff]  ;;  %v1847_v55 = vld [vmem:[%s6279_s1] sm:$0xff]  ;;  %vm6290_vm13 = vcmask 261312  }
  0x11   : > { %s300_s8 = scalar_select %p299_p6, %s4403_s24, 1  ;;  %4226 = vmatprep.subr.mxu0 %v1854_v43  ;;  %vm6295_vm15 = vcmask 326912  }
  0x12   : > { %s4329_s9 = smul.u32 56, %s6559_s25  ;;  %s3765_s10 = sshll.u32 %s6559_s25, 5  ;;  %v320_v2 = vadd.s32 16, %v4505_v1  ;;  %v322_v3 = vadd.s32 32, %v4505_v1  ;;  %v319_v5 = vadd.s32 8, %v4505_v1  ;;  %v342_v13 = vand.u32 15, %v4505_v1  ;;  %4227 = vmatpush3.msra.mxu0 %v1854_v43 }
  0x13   : > { %s4328_s11 = smul.u32 28, %s300_s8  ;;  %s3764_s12 = sshll.u32 %s300_s8, 4  ;;  %v321_v34 = vadd.s32 24, %v4505_v1  ;;  %4228 = vmatprep.subr.mxu0 %v1853_v44  ;;  %v323_v57 = vadd.s32 40, %v4505_v1  ;;  %v324_v60 = vadd.s32 48, %v4505_v1 }
  0x14   : > { %s312_s13 = sadd.s32 %s3765_s10, %s3764_s12  ;;  %v356_v4 = vand.u32 15, %v320_v2  ;;  %v370_v8 = vand.u32 15, %v322_v3  ;;  %v349_v14 = vand.u32 15, %v319_v5  ;;  %vm4563_vm3 = vcmp.gt.s32.totalorder %v342_v13, 0  ;;  %s4422_s25 = smov 16   ;;  %4229 = vmatpush3.msra.mxu0 %v1853_v44 }
  0x15   : > { %s303_s14 = sadd.s32 %s4329_s9, %s4328_s11  ;;  %s3766_s15 = sshll.u32 %s312_s13, 3  ;;  %v363_v37 = vand.u32 15, %v321_v34  ;;  %4230 = vmatprep.subr.mxu0 %v1852_v46  ;;  %v377_v59 = vand.u32 15, %v323_v57  ;;  %v384_v0 = vand.u32 15, %v324_v60  ;;  %v325_v13 = vadd.s32 56, %v4505_v1 }
  0x16   : > { %s3763_s16 = sshll.u32 %s303_s14, 3  ;;  %s4513_s19 = scalar_lea.vmem %s6285_s7, %s3766_s15  ;;  %vm4528_vm1 = vcmp.gt.s32.totalorder %v356_v4, 0  ;;  %vm4542_vm2 = vcmp.gt.s32.totalorder %v370_v8, 0  ;;  %vm4567_vm4 = vcmp.lt.s32.totalorder %v349_v14, 15  ;;  %4231 = vmatpush3.msra.mxu0 %v1852_v46  ;;  %v6327_v4 = vmov 0 }
  0x17   : > { %s4518_s22 = scalar_lea.vmem %s6278_s0, %s3763_s16  ;;  %s4423_s8 = smov 24   ;;  %vm4608_vm5 = vcmp.lt.s32.totalorder %v363_v37, 15  ;;  %4232 = vmatprep.subr.mxu0 %v1851_v48  ;;  %vm4684_vm6 = vcmp.lt.s32.totalorder %v377_v59, 15  ;;  %vm4696_vm7 = vcmp.gt.s32.totalorder %v384_v0, 0  ;;  %v6333_v46 = vmov 0 }
  0x18   : > { %v761_v6 = vld [vmem:[%s4518_s22 + $0x20] sm:$0xff]  ;;  %v759_v7 = vld [vmem:[%s4518_s22 + $0x10] sm:$0xff]  ;;  %v762_v9 = vld [vmem:[%s4518_s22 + $0x28] sm:$0xff]  ;;  %s4424_s9 = smov 32   ;;  %s4425_s10 = smov 40   ;;  %4233 = vmatpush3.msra.mxu0 %v1851_v48  ;;  %v6328_v4 = vsel %vm4696_vm7, 4294967295, %v6327_v4 }
  0x19   : > { %803 = vrot.lane.b32.xlu1 %v761_v6, %s4421_s23  ;;  %799 = vrot.lane.b32.xlu0 %v759_v7, %s4421_s23  ;;  %v760_v10 = vld [vmem:[%s4518_s22 + $0x18] sm:$0xff]  ;;  %v1022_v15 = vld [vmem:[%s4518_s22 + $0x27] sm:$0xff]  ;;  %s4426_s15 = smov 48   ;;  %s4427_s14 = smov 56  }
  0x1a   : > { %v1021_v11 = vld [vmem:[%s4518_s22 + $0x1f] sm:$0xff]  ;;  %v4537_v17 = vld [vmem:[%s4518_s22 + $0x2f] sm:$0xff]  ;;  %v4540_v18 = vld [vmem:[%s4518_s22 + $0x37] sm:$0xff]  ;;  %742 = vst.msk [vmem:[#allocation2 + $0x18] sm:$0xff] %vm6287_vm0, %v1022_v15  ;;  %4234 = vmatprep.subr.mxu0 %v1850_v49  ;;  %s4428_s12 = smov 64   ;;  %p3789_p7 = scmp.ne.s32.totalorder %s4403_s24, 0 }
  0x1b   : > { %v720_v16 = vsel %vm4528_vm1, %v1021_v11, 0.0  ;;  %v722_v20 = vsel %vm4542_vm2, %v4537_v17, 0.0  ;;  %744 = vst.msk [vmem:[#allocation2 + $0x28] sm:$0xff] %vm6287_vm0, %v4540_v18  ;;  %v880_v21 = vld [vmem:[%s4518_s22 + $0x11] sm:$0xff]  ;;  %v4560_v23 = vld [vmem:[%s4518_s22 + $0x47] sm:$0xff]  ;;  %v881_v26 = vld [vmem:[%s4518_s22 + $0x19] sm:$0xff]  ;;  %4235 = vmatpush3.msra.mxu0 %v1850_v49 }
  0x1c   : > { %741 = vst.msk [vmem:[#allocation2 + $0x10] sm:$0xff] %vm6287_vm0, %v720_v16  ;;  %v4557_v22 = vld [vmem:[%s4518_s22 + $0x30] sm:$0xff]  ;;  %743 = vst.msk [vmem:[#allocation2 + $0x20] sm:$0xff] %vm6287_vm0, %v722_v20  ;;  %v1041_v28 = vsel %vm4563_vm3, %v1021_v11, 0.0  ;;  %v901_v29 = vsel %vm4567_vm4, %v881_v26, 0.0  ;;  %v4593_v33 = vld [vmem:[%s4518_s22 + $0x67] sm:$0xff]  ;;  %4236 = vmatprep.subr.mxu0 %v1849_v51 }
  0x1d   : > { %805 = vrot.lane.b32.xlu1 %v762_v9, %s4421_s23  ;;  %801 = vrot.lane.b32.xlu0 %v760_v10, %s4421_s23  ;;  %746 = vst.msk [vmem:[#allocation2 + $0x38] sm:$0xff] %vm6287_vm0, %v4560_v23  ;;  %v4575_v27 = vld [vmem:[%s4518_s22 + $0x57] sm:$0xff]  ;;  %v698_v30 = vld [vmem:[%s4518_s22 + $0xf] sm:$0xff]  ;;  %750 = vst.msk [vmem:[#allocation2 + $0x58] sm:$0xff] %vm6287_vm0, %v4593_v33  ;;  %v1444_v42 = vsel %vm4563_vm3, %v4537_v17, 0.0  ;;  %v1043_v45 = vsel %vm4528_vm1, %v4537_v17, 0.0 }
  0x1e   : > { %748 = vst.msk [vmem:[#allocation2 + $0x48] sm:$0xff] %vm6287_vm0, %v4575_v27  ;;  %v699_v31 = vld [vmem:[%s4518_s22 + $0x17] sm:$0xff]  ;;  %v718_v32 = vsel %vm4563_vm3, %v698_v30, 0.0  ;;  %v1283_v35 = vld [vmem:[%s4518_s22 + $0x21] sm:$0xff]  ;;  %v1284_v36 = vld [vmem:[%s4518_s22 + $0x29] sm:$0xff]  ;;  %4237 = vmatpush3.msra.mxu0 %v1849_v51  ;;  %v326_v16 = vadd.s32 64, %v4505_v1 }
  0x1f   : > { %740 = vst.msk [vmem:[#allocation2 + $0x8] sm:$0xff] %vm6287_vm0, %v699_v31  ;;  %739 = vst.msk [vmem:[#allocation2] sm:$0xff] %vm6287_vm0, %v718_v32  ;;  %v1304_v38 = vsel %vm4567_vm4, %v1284_v36, 0.0  ;;  %v903_v41 = vsel %vm4608_vm5, %v1284_v36, 0.0  ;;  %v4637_v47 = vld [vmem:[%s4518_s22 + $0x77] sm:$0xff]  ;;  %4238 = vmatprep.subr.mxu0 %v1848_v52  ;;  %v1426_v58 = vld [vmem:[%s4518_s22 + $0x3f] sm:$0xff] }
  0x20   : > { %752 = vst.msk [vmem:[#allocation2 + $0x68] sm:$0xff] %vm6287_vm0, %v4637_v47  ;;  %v1566_v50 = vld [vmem:[%s4518_s22 + $0x38] sm:$0xff]  ;;  %4239 = vmatpush3.msra.mxu0 %v1848_v52  ;;  %v1446_v61 = vsel %vm4528_vm1, %v1426_v58, 0.0  ;;  %v1045_v2 = vsel %vm4542_vm2, %v1426_v58, 0.0  ;;  %v1567_v5 = vld [vmem:[%s4518_s22 + $0x40] sm:$0xff]  ;;  %v1689_v10 = vld [vmem:[%s4518_s22 + $0x49] sm:$0xff] }
  0x21   : > { %940 = vrot.lane.b32.xlu1 %v880_v21, %s4422_s25  ;;  %807 = vrot.lane.b32.xlu0 %v4557_v22, %s4421_s23  ;;  %v1686_v53 = vld [vmem:[%s4518_s22 + $0x31] sm:$0xff]  ;;  %v1687_v54 = vld [vmem:[%s4518_s22 + $0x39] sm:$0xff]  ;;  %v1709_v11 = vsel %vm4608_vm5, %v1689_v10, 0.0  ;;  %v6329_v20 = vmov 0  ;;  %v398_v21 = vand.u32 15, %v326_v16  ;;  %v6331_v26 = vmov 0 }
  0x22   : > { %v1707_v56 = vsel %vm4567_vm4, %v1687_v54, 0.0  ;;  %4240 = vmatprep.subr.mxu0 %v1847_v55  ;;  %v1306_v62 = vsel %vm4608_vm5, %v1687_v54, 0.0  ;;  %v905_v3 = vsel %vm4684_vm6, %v1687_v54, 0.0  ;;  %v4705_v7 = vld [vmem:[%s4518_s22 + $0x87] sm:$0xff]  ;;  %v1428_v14 = vld [vmem:[%s4518_s22 + $0x4f] sm:$0xff]  ;;  %v4756_v30 = vld [vmem:[%s4518_s22 + $0x97] sm:$0xff] }
  0x23   : > { %4241 = vmatpush3.msra.mxu0 %v1847_v55  ;;  %754 = vst.msk [vmem:[#allocation2 + $0x78] sm:$0xff] %vm6287_vm0, %v4705_v7  ;;  %v1688_v8 = vld [vmem:[%s4518_s22 + $0x41] sm:$0xff]  ;;  %v1448_v17 = vsel %vm4542_vm2, %v1428_v14, 0.0  ;;  %vm4747_vm9 = vcmp.gt.s32.totalorder %v398_v21, 0  ;;  %756 = vst.msk [vmem:[#allocation2 + $0x88] sm:$0xff] %vm6287_vm0, %v4756_v30  ;;  %v1690_v31 = vld [vmem:[%s4518_s22 + $0x51] sm:$0xff] }
  0x24   : > { %v6332_v26 = vsel %vm4747_vm9, 4294967295, %v6331_v26  ;;  %v1570_v32 = vld [vmem:[%s4518_s22 + $0x58] sm:$0xff]  ;;  %v327_v36 = vadd.s32 72, %v4505_v1  ;;  %v1571_v54 = vld [vmem:[%s4518_s22 + $0x60] sm:$0xff]  ;;  %v330_v16 = vadd.s32 96, %v4505_v1 }
  0x25   : > { %1081 = vrot.lane.b32.xlu1 %v1041_v28, %s4423_s8  ;;  %942 = vrot.lane.b32.xlu0 %v901_v29, %s4422_s25  ;;  %v1569_v28 = vld [vmem:[%s4518_s22 + $0x50] sm:$0xff]  ;;  %v726_v29 = vsel %vm4747_vm9, %v1428_v14, 0.0  ;;  %v1691_v34 = vld [vmem:[%s4518_s22 + $0x59] sm:$0xff] }
  0x26   : > { %747 = vst.msk [vmem:[#allocation2 + $0x40] sm:$0xff] %vm6287_vm0, %v726_v29  ;;  %v405_v40 = vand.u32 15, %v327_v36  ;;  %v1573_v36 = vld [vmem:[%s4518_s22 + $0x70] sm:$0xff] }
  0x28   : > { %vm4788_vm11 = vcmp.lt.s32.totalorder %v405_v40, 15 }
  0x29   : > { %1202 = vrot.lane.b32.xlu1 %v761_v6, %s4424_s9  ;;  %1083 = vrot.lane.b32.xlu0 %v1022_v15, %s4423_s8  ;;  %v724_v6 = vsel %vm4696_vm7, %v1426_v58, 0.0  ;;  %v391_v15 = vand.u32 15, %v325_v13  ;;  %v6334_v46 = vsel %vm4788_vm11, 4294967295, %v6333_v46  ;;  %v4815_v58 = vld [vmem:[%s4518_s22 + $0xa7] sm:$0xff] }
  0x2a   : > { %745 = vst.msk [vmem:[#allocation2 + $0x30] sm:$0xff] %vm6287_vm0, %v724_v6  ;;  %758 = vst.msk [vmem:[#allocation2 + $0x98] sm:$0xff] %vm6287_vm0, %v4815_v58  ;;  %v1693_v6 = vld [vmem:[%s4518_s22 + $0x69] sm:$0xff] }
  0x2b   : > { %vm4735_vm8 = vcmp.lt.s32.totalorder %v391_v15, 15 }
  0x2c   : > { %v6330_v20 = vsel %vm4735_vm8, 4294967295, %v6329_v20  ;;  %v1310_v43 = vsel %vm4735_vm8, %v1691_v34, 0.0 }
  0x2d   : > { %1343 = vrot.lane.b32.xlu1 %v1283_v35, %s4425_s10  ;;  %1204 = vrot.lane.b32.xlu0 %v762_v9, %s4424_s9  ;;  %v1568_v9 = vld [vmem:[%s4518_s22 + $0x48] sm:$0xff] }
  0x31   : > { %1345 = vrot.lane.b32.xlu1 %v1304_v38, %s4425_s10  ;;  %944 = vrot.lane.b32.xlu0 %v1283_v35, %s4422_s25  ;;  %v1711_v35 = vsel %vm4684_vm6, %v1691_v34, 0.0  ;;  %v1430_v38 = vld [vmem:[%s4518_s22 + $0x5f] sm:$0xff] }
  0x32   : > { %v1049_v49 = vsel %vm4747_vm9, %v1430_v38, 0.0 }
  0x35   : > { %946 = vrot.lane.b32.xlu1 %v903_v41, %s4422_s25  ;;  %1484 = vrot.lane.b32.xlu0 %v1444_v42, %s4426_s15  ;;  %v328_v41 = vadd.s32 80, %v4505_v1  ;;  %v1450_v42 = vsel %vm4696_vm7, %v1430_v38, 0.0 }
  0x37   : > { %v412_v48 = vand.u32 15, %v328_v41 }
  0x39   : > { %1486 = vrot.lane.b32.xlu1 %v4540_v18, %s4426_s15  ;;  %1085 = vrot.lane.b32.xlu0 %v1043_v45, %s4423_s8  ;;  %vm4804_vm14 = vcmp.gt.s32.totalorder %v412_v48, 0 }
  0x3a   : > { %v728_v55 = vsel %vm4804_vm14, %v1430_v38, 0.0 }
  0x3b   : > { %749 = vst.msk [vmem:[#allocation2 + $0x50] sm:$0xff] %vm6287_vm0, %v728_v55  ;;  %vm6291_vm0 = vcmask 458112  }
  0x3d   : > { %1087 = vrot.lane.b32.xlu1 %v4540_v18, %s4423_s8  ;;  %1605 = vrot.lane.b32.xlu0 %v4557_v22, %s4427_s14  ;;  %v1308_v18 = vsel %vm4684_vm6, %v1689_v10, 0.0 }
  0x41   : > { %1607 = vrot.lane.b32.xlu1 %v1566_v50, %s4427_s14  ;;  %1206 = vrot.lane.b32.xlu0 %v4557_v22, %s4424_s9  ;;  %v1047_v22 = vsel %vm4696_vm7, %v1428_v14, 0.0  ;;  %v1432_v14 = vld [vmem:[%s4518_s22 + $0x6f] sm:$0xff]  ;;  %vm6363_vm7 = vcmask 588800  }
  0x42   : > { %v1051_v29 = vsel %vm4804_vm14, %v1432_v14, 0.0 }
  0x45   : > { %1208 = vrot.lane.b32.xlu1 %v1566_v50, %s4424_s9  ;;  %1746 = vrot.lane.b32.xlu0 %v1686_v53, %s4428_s12 }
  0x49   : > { %1748 = vrot.lane.b32.xlu1 %v1707_v56, %s4428_s12  ;;  %1347 = vrot.lane.b32.xlu0 %v1686_v53, %s4425_s10 }
  0x4d   : > { %948 = vrot.lane.b32.xlu1 %v1686_v53, %s4422_s25  ;;  %809 = vrot.lane.b32.xlu0 %v1566_v50, %s4421_s23  ;;  %v909_v50 = vsel %vm4788_vm11, %v1691_v34, 0.0  ;;  %v6335_v53 = vmov 0 }
  0x4e   : > { %v6336_v53 = vsel %vm4804_vm14, 4294967295, %v6335_v53 }
  0x51   : > { %1488 = vrot.lane.b32.xlu1 %v1446_v61, %s4426_s15  ;;  %1349 = vrot.lane.b32.xlu0 %v1306_v62, %s4425_s10  ;;  %v1692_v61 = vld [vmem:[%s4518_s22 + $0x61] sm:$0xff] }
  0x52   : > { %v1572_v62 = vld [vmem:[%s4518_s22 + $0x68] sm:$0xff] }
  0x55   : > { %1089 = vrot.lane.b32.xlu1 %v1045_v2, %s4423_s8  ;;  %950 = vrot.lane.b32.xlu0 %v905_v3, %s4422_s25 }
  0x59   : > { %1609 = vrot.lane.b32.xlu1 %v1567_v5, %s4427_s14  ;;  %1490 = vrot.lane.b32.xlu0 %v4560_v23, %s4426_s15 }
  0x5d   : > { %1210 = vrot.lane.b32.xlu1 %v1567_v5, %s4424_s9  ;;  %1091 = vrot.lane.b32.xlu0 %v4560_v23, %s4423_s8  ;;  %v907_v23 = vsel %vm4735_vm8, %v1689_v10, 0.0  ;;  %v329_v10 = vadd.s32 88, %v4505_v1 }
  0x5f   : > { %v419_v15 = vand.u32 15, %v329_v10 }
  0x61   : > { %1750 = vrot.lane.b32.xlu1 %v1688_v8, %s4428_s12  ;;  %1611 = vrot.lane.b32.xlu0 %v1568_v9, %s4427_s14 }
  0x65   : > { %1212 = vrot.lane.b32.xlu1 %v1568_v9, %s4424_s9  ;;  %811 = vrot.lane.b32.xlu0 %v1567_v5, %s4421_s23 }
  0x69   : > { %1752 = vrot.lane.b32.xlu1 %v1709_v11, %s4428_s12  ;;  %1351 = vrot.lane.b32.xlu0 %v1688_v8, %s4425_s10 }
  0x6d   : > { %952 = vrot.lane.b32.xlu1 %v1688_v8, %s4422_s25  ;;  %813 = vrot.lane.b32.xlu0 %v1568_v9, %s4421_s23 }
  0x71   : > { %1492 = vrot.lane.b32.xlu1 %v1448_v17, %s4426_s15  ;;  %1353 = vrot.lane.b32.xlu0 %v1308_v18, %s4425_s10  ;;  %v1452_v17 = vsel %vm4747_vm9, %v1432_v14, 0.0  ;;  %v1312_v18 = vsel %vm4788_vm11, %v1693_v6, 0.0  ;;  %vm6342_vm9 = vcmask 392512  }
  0x75   : > { %1093 = vrot.lane.b32.xlu1 %v1047_v22, %s4423_s8  ;;  %954 = vrot.lane.b32.xlu0 %v907_v23, %s4422_s25  ;;  %v6337_v23 = vmov 0 }
  0x79   : > { %1613 = vrot.lane.b32.xlu1 %v1569_v28, %s4427_s14  ;;  %1494 = vrot.lane.b32.xlu0 %v4575_v27, %s4426_s15 }
  0x7d   : > { %1214 = vrot.lane.b32.xlu1 %v1569_v28, %s4424_s9  ;;  %1095 = vrot.lane.b32.xlu0 %v4575_v27, %s4423_s8 }
  0x81   : > { %1754 = vrot.lane.b32.xlu1 %v1690_v31, %s4428_s12  ;;  %1615 = vrot.lane.b32.xlu0 %v1570_v32, %s4427_s14 }
  0x85   : > { %1216 = vrot.lane.b32.xlu1 %v1570_v32, %s4424_s9  ;;  %815 = vrot.lane.b32.xlu0 %v1569_v28, %s4421_s23  ;;  %v426_v28 = vand.u32 15, %v330_v16 }
  0x89   : > { %1756 = vrot.lane.b32.xlu1 %v1711_v35, %s4428_s12  ;;  %1355 = vrot.lane.b32.xlu0 %v1690_v31, %s4425_s10  ;;  %v6339_v35 = vmov 0 }
  0x8b   : > { %v804_v27 = vpop.permute.xlu1 %803  ;;  %v800_v37 = vpop.permute.xlu0 %799 }
  0x8c   : > { %862 = vst.msk [vmem:[#allocation2 + $0x10] sm:$0xff] %vm6286_vm10, %v804_v27  ;;  %860 = vst.msk [vmem:[#allocation2] sm:$0xff] %vm6286_vm10, %v800_v37 }
  0x8d   : > { %956 = vrot.lane.b32.xlu1 %v1690_v31, %s4422_s25  ;;  %817 = vrot.lane.b32.xlu0 %v1570_v32, %s4421_s23 }
  0x8f   : > { %v806_v44 = vpop.permute.xlu1 %805  ;;  %v802_v45 = vpop.permute.xlu0 %801 }
  0x90   : > { %863 = vst.msk [vmem:[#allocation2 + $0x18] sm:$0xff] %vm6286_vm10, %v806_v44  ;;  %861 = vst.msk [vmem:[#allocation2 + $0x8] sm:$0xff] %vm6286_vm10, %v802_v45 }
  0x91   : > { %1496 = vrot.lane.b32.xlu1 %v1450_v42, %s4426_s15  ;;  %1357 = vrot.lane.b32.xlu0 %v1310_v43, %s4425_s10  ;;  %v1694_v42 = vld [vmem:[%s4518_s22 + $0x71] sm:$0xff] }
  0x92   : > { %v1574_v43 = vld [vmem:[%s4518_s22 + $0x78] sm:$0xff] }
  0x93   : > { %v941_v51 = vpop.permute.xlu1 %940  ;;  %v808_v52 = vpop.permute.xlu0 %807 }
  0x94   : > { %1001 = vst.msk [vmem:[#allocation2] sm:$0xff] %vm6289_vm12, %v941_v51 }
  0x95   : > { %864 = vst.msk [vmem:[#allocation2 + $0x20] sm:$0xff] %vm6286_vm10, %v808_v52  ;;  %1097 = vrot.lane.b32.xlu1 %v1049_v49, %s4423_s8  ;;  %958 = vrot.lane.b32.xlu0 %v909_v50, %s4422_s25  ;;  %vm6288_vm10 = vcmask 392512  }
  0x97   : > { %v1082_v56 = vpop.permute.xlu1 %1081  ;;  %v943_v57 = vpop.permute.xlu0 %942 }
  0x98   : > { %1142 = vst.msk [vmem:[#allocation2] sm:$0xff] %vm6290_vm13, %v1082_v56  ;;  %v331_v56 = vadd.s32 104, %v4505_v1 }
  0x99   : > { %1002 = vst.msk [vmem:[#allocation2 + $0x8] sm:$0xff] %vm6289_vm12, %v943_v57  ;;  %1617 = vrot.lane.b32.xlu1 %v1571_v54, %s4427_s14  ;;  %1498 = vrot.lane.b32.xlu0 %v4593_v33, %s4426_s15 }
  0x9b   : > { %v1203_v59 = vpop.permute.xlu1 %1202  ;;  %v1084_v60 = vpop.permute.xlu0 %1083 }
  0x9c   : > { %1263 = vst.msk [vmem:[#allocation2] sm:$0xff] %vm6295_vm15, %v1203_v59 }
  0x9d   : > { %1143 = vst.msk [vmem:[#allocation2 + $0x8] sm:$0xff] %vm6290_vm13, %v1084_v60  ;;  %1218 = vrot.lane.b32.xlu1 %v1571_v54, %s4424_s9  ;;  %1099 = vrot.lane.b32.xlu0 %v4593_v33, %s4423_s8  ;;  %v1713_v33 = vsel %vm4735_vm8, %v1693_v6, 0.0  ;;  %vm6344_vm8 = vcmask 130112   ;;  %v1434_v60 = vld [vmem:[%s4518_s22 + $0x7f] sm:$0xff] }
  0x9f   : > { %v1344_v0 = vpop.permute.xlu1 %1343  ;;  %v1205_v2 = vpop.permute.xlu0 %1204 }
  0xa0   : > { %1404 = vst.msk [vmem:[#allocation2] sm:$0xff] %vm6288_vm10, %v1344_v0  ;;  %v1454_v0 = vsel %vm4804_vm14, %v1434_v60, 0.0  ;;  %vm6361_vm14 = vcmask 589312  }
  0xa1   : > { %1264 = vst.msk [vmem:[#allocation2 + $0x8] sm:$0xff] %vm6295_vm15, %v1205_v2  ;;  %1758 = vrot.lane.b32.xlu1 %v1692_v61, %s4428_s12  ;;  %1619 = vrot.lane.b32.xlu0 %v1572_v62, %s4427_s14 }
  0xa3   : > { %v1346_v3 = vpop.permute.xlu1 %1345  ;;  %v945_v5 = vpop.permute.xlu0 %944 }
  0xa4   : > { %1405 = vst.msk [vmem:[#allocation2 + $0x8] sm:$0xff] %vm6288_vm10, %v1346_v3  ;;  %vm6292_vm10 = vcmask 523712  }
  0xa5   : > { %1003 = vst.msk [vmem:[#allocation2 + $0x10] sm:$0xff] %vm6289_vm12, %v945_v5  ;;  %1220 = vrot.lane.b32.xlu1 %v1572_v62, %s4424_s9  ;;  %819 = vrot.lane.b32.xlu0 %v1571_v54, %s4421_s23 }
  0xa7   : > { %v947_v8 = vpop.permute.xlu1 %946  ;;  %v1485_v9 = vpop.permute.xlu0 %1484 }
  0xa8   : > { %1004 = vst.msk [vmem:[#allocation2 + $0x18] sm:$0xff] %vm6289_vm12, %v947_v8  ;;  %vm4855_vm12 = vcmp.lt.s32.totalorder %v419_v15, 15 }
  0xa9   : > { %1545 = vst.msk [vmem:[#allocation2] sm:$0xff] %vm6291_vm0, %v1485_v9  ;;  %1760 = vrot.lane.b32.xlu1 %v1713_v33, %s4428_s12  ;;  %1359 = vrot.lane.b32.xlu0 %v1692_v61, %s4425_s10  ;;  %v6338_v23 = vsel %vm4855_vm12, 4294967295, %v6337_v23  ;;  %v911_v31 = vsel %vm4855_vm12, %v1693_v6, 0.0  ;;  %v6349_v6 = vmov 0 }
  0xab   : > { %v1487_v11 = vpop.permute.xlu1 %1486  ;;  %v1086_v13 = vpop.permute.xlu0 %1085 }
  0xac   : > { %1546 = vst.msk [vmem:[#allocation2 + $0x8] sm:$0xff] %vm6291_vm0, %v1487_v11  ;;  %vm4871_vm0 = vcmp.gt.s32.totalorder %v426_v28, 0  ;;  %v1696_v28 = vld [vmem:[%s4518_s22 + $0x81] sm:$0xff] }
  0xad   : > { %1144 = vst.msk [vmem:[#allocation2 + $0x10] sm:$0xff] %vm6290_vm13, %v1086_v13  ;;  %960 = vrot.lane.b32.xlu1 %v1692_v61, %s4422_s25  ;;  %821 = vrot.lane.b32.xlu0 %v1572_v62, %s4421_s23  ;;  %v6340_v35 = vsel %vm4871_vm0, 4294967295, %v6339_v35  ;;  %v730_v27 = vsel %vm4871_vm0, %v1432_v14, 0.0  ;;  %v433_v61 = vand.u32 15, %v331_v56  ;;  %v332_v62 = vadd.s32 112, %v4505_v1  ;;  %v1575_v14 = vld [vmem:[%s4518_s22 + $0x80] sm:$0xff] }
  0xae   : > { %v1053_v8 = vsel %vm4871_vm0, %v1434_v60, 0.0  ;;  %v6355_v13 = vmov 0 }
  0xaf   : > { %v1088_v21 = vpop.permute.xlu1 %1087  ;;  %v1606_v22 = vpop.permute.xlu0 %1605  ;;  %v440_v33 = vand.u32 15, %v332_v62 }
  0xb0   : > { %1145 = vst.msk [vmem:[#allocation2 + $0x18] sm:$0xff] %vm6290_vm13, %v1088_v21  ;;  %vm6298_vm13 = vcmask 589312  }
  0xb1   : > { %1666 = vst.msk [vmem:[#allocation2] sm:$0xff] %vm6292_vm10, %v1606_v22  ;;  %1500 = vrot.lane.b32.xlu1 %v1452_v17, %s4426_s15  ;;  %1361 = vrot.lane.b32.xlu0 %v1312_v18, %s4425_s10 }
  0xb3   : > { %v1608_v32 = vpop.permute.xlu1 %1607  ;;  %v1207_v34 = vpop.permute.xlu0 %1206 }
  0xb4   : > { %1667 = vst.msk [vmem:[#allocation2 + $0x8] sm:$0xff] %vm6292_vm10, %v1608_v32  ;;  %vm6341_vm10 = vcmask 64512  }
  0xb5   : > { %1265 = vst.msk [vmem:[#allocation2 + $0x10] sm:$0xff] %vm6295_vm15, %v1207_v34  ;;  %1101 = vrot.lane.b32.xlu1 %v1051_v29, %s4423_s8  ;;  %962 = vrot.lane.b32.xlu0 %v911_v31, %s4422_s25  ;;  %v1576_v29 = vld [vmem:[%s4518_s22 + $0x88] sm:$0xff] }
  0xb6   : > { %751 = vst.msk [vmem:[#allocation2 + $0x60] sm:$0xff] %vm6341_vm10, %v730_v27  ;;  %vm6299_vm10 = vcmask 588800  }
  0xb7   : > { %v1209_v37 = vpop.permute.xlu1 %1208  ;;  %v1747_v38 = vpop.permute.xlu0 %1746 }
  0xb8   : > { %1266 = vst.msk [vmem:[#allocation2 + $0x18] sm:$0xff] %vm6295_vm15, %v1209_v37  ;;  %vm6343_vm15 = vcmask 195712   ;;  %v1697_v37 = vld [vmem:[%s4518_s22 + $0x89] sm:$0xff] }
  0xb9   : > { %1807 = vst.msk [vmem:[#allocation2] sm:$0xff] %vm6298_vm13, %v1747_v38  ;;  %1621 = vrot.lane.b32.xlu1 %v1573_v36, %s4427_s14  ;;  %1502 = vrot.lane.b32.xlu0 %v4637_v47, %s4426_s15 }
  0xbb   : > { %v1749_v40 = vpop.permute.xlu1 %1748  ;;  %v1348_v41 = vpop.permute.xlu0 %1347 }
  0xbc   : > { %1808 = vst.msk [vmem:[#allocation2 + $0x8] sm:$0xff] %vm6298_vm13, %v1749_v40  ;;  %vm6346_vm13 = vcmask 392512  }
  0xbd   : > { %1406 = vst.msk [vmem:[#allocation2 + $0x10] sm:$0xff] %vm6342_vm9, %v1348_v41  ;;  %1222 = vrot.lane.b32.xlu1 %v1573_v36, %s4424_s9  ;;  %1103 = vrot.lane.b32.xlu0 %v4637_v47, %s4423_s8  ;;  %v1695_v47 = vld [vmem:[%s4518_s22 + $0x79] sm:$0xff]  ;;  %vm6345_vm9 = vcmask 458112   ;;  %v333_v41 = vadd.s32 120, %v4505_v1 }
  0xbe   : > { %v1715_v52 = vsel %vm4788_vm11, %v1695_v47, 0.0  ;;  %v1314_v2 = vsel %vm4855_vm12, %v1695_v47, 0.0  ;;  %vm6362_vm11 = vcmask 392512  }
  0xbf   : > { %v949_v44 = vpop.permute.xlu1 %948  ;;  %v810_v45 = vpop.permute.xlu0 %809 }
  0xc0   : > { %v1827_v48 = vld [vmem:[#allocation2] sm:$0xff]  ;;  %1005 = vst.msk [vmem:[#allocation2 + $0x20] sm:$0xff] %vm6343_vm15, %v949_v44  ;;  %v1436_v44 = vld [vmem:[%s4518_s22 + $0x8f] sm:$0xff] }
  0xc1   : > { %865 = vst.msk [vmem:[#allocation2 + $0x28] sm:$0xff] %vm6344_vm8, %v810_v45  ;;  %4242 = vmatprep.mubr.msk.f32.mxu0 %vm6299_vm10, %v1827_v48  ;;  %1762 = vrot.lane.b32.xlu1 %v1694_v42, %s4428_s12  ;;  %vm6347_vm8 = vcmask 261312   ;;  %v447_v45 = vand.u32 15, %v333_v41  ;;  %v334_v48 = vadd.s32 128, %v4505_v1 }
  0xc2   : > { %1623 = vrot.lane.b32.xlu0 %v1574_v43, %s4427_s14 }
  0xc3   : > { %v1489_v49 = vpop.permute.xlu1 %1488  ;;  %v1350_v50 = vpop.permute.xlu0 %1349  ;;  %v1828_v51 = vld [vmem:[#allocation2 + $0x8] sm:$0xff] }
  0xc4   : > { %1547 = vst.msk [vmem:[#allocation2 + $0x10] sm:$0xff] %vm6345_vm9, %v1489_v49  ;;  %4243 = vmatmul.mubr.msk.f32.vlgmr.msra.gmra.mxu0 %vm6299_vm10, %v1828_v51  ;;  %vm6354_vm10 = vcmask 523712   ;;  %v1456_v49 = vsel %vm4871_vm0, %v1436_v44, 0.0  ;;  %vm6380_vm0 = vcmask 392512  }
  0xc5   : > { %1407 = vst.msk [vmem:[#allocation2 + $0x18] sm:$0xff] %vm6346_vm13, %v1350_v50  ;;  %1224 = vrot.lane.b32.xlu1 %v1574_v43, %s4424_s9  ;;  %vm6348_vm13 = vcmask 523712  }
  0xc6   : > { %823 = vrot.lane.b32.xlu0 %v1573_v36, %s4421_s23 }
  0xc7   : > { %v1090_v54 = vpop.permute.xlu1 %1089  ;;  %v951_v55 = vpop.permute.xlu0 %950 }
  0xc8   : > { %1146 = vst.msk [vmem:[#allocation2 + $0x20] sm:$0xff] %vm6347_vm8, %v1090_v54  ;;  %vm4919_vm8 = vcmp.lt.s32.totalorder %v433_v61, 15  ;;  %v454_v54 = vand.u32 15, %v334_v48  ;;  %v1577_v61 = vld [vmem:[%s4518_s22 + $0x90] sm:$0xff]  ;;  %v1579_v48 = vld [vmem:[%s4518_s22 + $0xa0] sm:$0xff] }
  0xc9   : > { %1006 = vst.msk [vmem:[#allocation2 + $0x28] sm:$0xff] %vm6343_vm15, %v951_v55  ;;  %1764 = vrot.lane.b32.xlu1 %v1715_v52, %s4428_s12  ;;  %v6350_v6 = vsel %vm4919_vm8, 4294967295, %v6349_v6  ;;  %vm6351_vm15 = vcmask 326912   ;;  %v913_v9 = vsel %vm4919_vm8, %v1695_v47, 0.0  ;;  %v1316_v50 = vsel %vm4919_vm8, %v1697_v37, 0.0 }
  0xca   : > { %1363 = vrot.lane.b32.xlu0 %v1694_v42, %s4425_s10 }
  0xcb   : > { %v1610_v57 = vpop.permute.xlu1 %1609  ;;  %v1491_v59 = vpop.permute.xlu0 %1490 }
  0xcc   : > { %1668 = vst.msk [vmem:[#allocation2 + $0x10] sm:$0xff] %vm6348_vm13, %v1610_v57  ;;  %vm6352_vm13 = vcmask 261312  }
  0xcd   : > { %1548 = vst.msk [vmem:[#allocation2 + $0x18] sm:$0xff] %vm6345_vm9, %v1491_v59  ;;  %964 = vrot.lane.b32.xlu1 %v1694_v42, %s4422_s25  ;;  %vm6353_vm9 = vcmask 589312  }
  0xce   : > { %825 = vrot.lane.b32.xlu0 %v1574_v43, %s4421_s23 }
  0xcf   : > { %v1211_v3 = vpop.permute.xlu1 %1210  ;;  %v1092_v5 = vpop.permute.xlu0 %1091 }
  0xd0   : > { %1267 = vst.msk [vmem:[#allocation2 + $0x20] sm:$0xff] %vm6351_vm15, %v1211_v3  ;;  %vm4935_vm15 = vcmp.gt.s32.totalorder %v440_v33, 0 }
  0xd1   : > { %1147 = vst.msk [vmem:[#allocation2 + $0x28] sm:$0xff] %vm6352_vm13, %v1092_v5  ;;  %1504 = vrot.lane.b32.xlu1 %v1454_v0, %s4426_s15  ;;  %v6356_v13 = vsel %vm4935_vm15, 4294967295, %v6355_v13  ;;  %v732_v15 = vsel %vm4935_vm15, %v1434_v60, 0.0  ;;  %vm6358_vm13 = vcmask 64512   ;;  %v1055_v55 = vsel %vm4935_vm15, %v1436_v44, 0.0 }
  0xd2   : > { %1365 = vrot.lane.b32.xlu0 %v1314_v2, %s4425_s10  ;;  %6357 = vst [vmem:[#allocation5_spill] sm:$0xff] %v6356_v13  ;;  %753 = vst.msk [vmem:[#allocation2 + $0x70] sm:$0xff] %vm6358_vm13, %v732_v15  ;;  %vm6364_vm13 = vcmask 195712  }
  0xd3   : > { %v1751_v10 = vpop.permute.xlu1 %1750  ;;  %v1612_v11 = vpop.permute.xlu0 %1611 }
  0xd4   : > { %1809 = vst.msk [vmem:[#allocation2 + $0x10] sm:$0xff] %vm6353_vm9, %v1751_v10  ;;  %vm6359_vm9 = vcmask 326912  }
  0xd5   : > { %1669 = vst.msk [vmem:[#allocation2 + $0x18] sm:$0xff] %vm6354_vm10, %v1612_v11  ;;  %1105 = vrot.lane.b32.xlu1 %v1053_v8, %s4423_s8  ;;  %vm6360_vm10 = vcmask 130112   ;;  %v1698_v8 = vld [vmem:[%s4518_s22 + $0x91] sm:$0xff] }
  0xd6   : > { %966 = vrot.lane.b32.xlu0 %v913_v9, %s4422_s25  ;;  %v1578_v9 = vld [vmem:[%s4518_s22 + $0x98] sm:$0xff] }
  0xd7   : > { %v1213_v16 = vpop.permute.xlu1 %1212  ;;  %v812_v17 = vpop.permute.xlu0 %811 }
  0xd8   : > { %1268 = vst.msk [vmem:[#allocation2 + $0x28] sm:$0xff] %vm6359_vm9, %v1213_v16  ;;  %vm6365_vm9 = vmmov %vm6360_vm10 }
  0xd9   : > { %866 = vst.msk [vmem:[#allocation2 + $0x30] sm:$0xff] %vm6360_vm10, %v812_v17  ;;  %1625 = vrot.lane.b32.xlu1 %v1575_v14, %s4427_s14  ;;  %vm6368_vm10 = vcmask 261312   ;;  %v1699_v17 = vld [vmem:[%s4518_s22 + $0x99] sm:$0xff] }
  0xda   : > { %1506 = vrot.lane.b32.xlu0 %v4705_v7, %s4426_s15 }
  0xdb   : > { %v1753_v18 = vpop.permute.xlu1 %1752  ;;  %v1352_v21 = vpop.permute.xlu0 %1351  ;;  %v1829_v22 = vld [vmem:[#allocation2 + $0x10] sm:$0xff] }
  0xdc   : > { %1810 = vst.msk [vmem:[#allocation2 + $0x18] sm:$0xff] %vm6361_vm14, %v1753_v18  ;;  %4245 = vmatprep.mubr.msk.f32.mxu0 %vm6363_vm7, %v1829_v22  ;;  %vm6366_vm7 = vcmask 458112   ;;  %vm6367_vm14 = vcmask 588800   ;;  %v335_v22 = vadd.s32 136, %v4505_v1 }
  0xdd   : > { %1408 = vst.msk [vmem:[#allocation2 + $0x20] sm:$0xff] %vm6362_vm11, %v1352_v21  ;;  %1226 = vrot.lane.b32.xlu1 %v1575_v14, %s4424_s9 }
  0xde   : > { %1107 = vrot.lane.b32.xlu0 %v4705_v7, %s4423_s8  ;;  %v1717_v7 = vsel %vm4855_vm12, %v1697_v37, 0.0  ;;  %vm6381_vm12 = vcmask 588800  }
  0xdf   : > { %v953_v31 = vpop.permute.xlu1 %952  ;;  %v814_v32 = vpop.permute.xlu0 %813 }
  0xe0   : > { %1007 = vst.msk [vmem:[#allocation2 + $0x30] sm:$0xff] %vm6364_vm13, %v953_v31  ;;  %v1438_v31 = vld [vmem:[%s4518_s22 + $0x9f] sm:$0xff] }
  0xe1   : > { %867 = vst.msk [vmem:[#allocation2 + $0x38] sm:$0xff] %vm6365_vm9, %v814_v32  ;;  %1766 = vrot.lane.b32.xlu1 %v1696_v28, %s4428_s12  ;;  %vm6369_vm9 = vcmask 523712   ;;  %v461_v32 = vand.u32 15, %v335_v22 }
  0xe2   : > { %1627 = vrot.lane.b32.xlu0 %v1576_v29, %s4427_s14 }
  0xe3   : > { %v1493_v34 = vpop.permute.xlu1 %1492  ;;  %v1354_v36 = vpop.permute.xlu0 %1353  ;;  %v1830_v27 = vld [vmem:[#allocation2 + $0x18] sm:$0xff] }
  0xe4   : > { %1549 = vst.msk [vmem:[#allocation2 + $0x20] sm:$0xff] %vm6366_vm7, %v1493_v34  ;;  %4246 = vmatmul.mubr.msk.f32.gmra.mxu0 %vm6367_vm14, %v1830_v27  ;;  %vm6372_vm14 = vcmask 326912   ;;  %v336_v34 = vadd.s32 144, %v4505_v1 }
  0xe5   : > { %1409 = vst.msk [vmem:[#allocation2 + $0x28] sm:$0xff] %vm6362_vm11, %v1354_v36  ;;  %1228 = vrot.lane.b32.xlu1 %v1576_v29, %s4424_s9  ;;  %vm4983_vm11 = vcmp.lt.s32.totalorder %v447_v45, 15  ;;  %v1458_v36 = vsel %vm4935_vm15, %v1438_v31, 0.0  ;;  %vm6399_vm15 = vcmask 392512   ;;  %v1704_v45 = vld [vmem:[%s4518_s22 + $0xc1] sm:$0xff] }
  0xe6   : > { %827 = vrot.lane.b32.xlu0 %v1575_v14, %s4421_s23  ;;  %v915_v56 = vsel %vm4983_vm11, %v1697_v37, 0.0  ;;  %v1318_v27 = vsel %vm4983_vm11, %v1699_v17, 0.0 }
  0xe7   : > { %v1094_v38 = vpop.permute.xlu1 %1093  ;;  %v955_v40 = vpop.permute.xlu0 %954 }
  0xe8   : > { %1148 = vst.msk [vmem:[#allocation2 + $0x30] sm:$0xff] %vm6368_vm10, %v1094_v38 }
  0xe9   : > { %1008 = vst.msk [vmem:[#allocation2 + $0x38] sm:$0xff] %vm6364_vm13, %v955_v40  ;;  %1768 = vrot.lane.b32.xlu1 %v1717_v7, %s4428_s12  ;;  %vm6373_vm13 = vcmask 589312   ;;  %v468_v40 = vand.u32 15, %v336_v34 }
  0xea   : > { %1367 = vrot.lane.b32.xlu0 %v1696_v28, %s4425_s10 }
  0xeb   : > { %v1614_v42 = vpop.permute.xlu1 %1613  ;;  %v1495_v43 = vpop.permute.xlu0 %1494 }
  0xec   : > { %1670 = vst.msk [vmem:[#allocation2 + $0x20] sm:$0xff] %vm6369_vm9, %v1614_v42 }
  0xed   : > { %1550 = vst.msk [vmem:[#allocation2 + $0x28] sm:$0xff] %vm6366_vm7, %v1495_v43  ;;  %968 = vrot.lane.b32.xlu1 %v1696_v28, %s4422_s25  ;;  %vm4999_vm7 = vcmp.gt.s32.totalorder %v454_v54, 0 }
  0xee   : > { %829 = vrot.lane.b32.xlu0 %v1576_v29, %s4421_s23  ;;  %v734_v62 = vsel %vm4999_vm7, %v1436_v44, 0.0  ;;  %v1057_v41 = vsel %vm4999_vm7, %v1438_v31, 0.0 }
  0xef   : > { %v1215_v51 = vpop.permute.xlu1 %1214  ;;  %v1096_v47 = vpop.permute.xlu0 %1095 }
  0xf0   : > { %1269 = vst.msk [vmem:[#allocation2 + $0x30] sm:$0xff] %vm6372_vm14, %v1215_v51  ;;  %vm6376_vm14 = vcmask 64512  }
  0xf1   : > { %1149 = vst.msk [vmem:[#allocation2 + $0x38] sm:$0xff] %vm6368_vm10, %v1096_v47  ;;  %1508 = vrot.lane.b32.xlu1 %v1456_v49, %s4426_s15  ;;  %vm6377_vm10 = vcmask 326912  }
  0xf2   : > { %1369 = vrot.lane.b32.xlu0 %v1316_v50, %s4425_s10  ;;  %755 = vst.msk [vmem:[#allocation2 + $0x80] sm:$0xff] %vm6376_vm14, %v734_v62  ;;  %vm6382_vm14 = vcmask 195712  }
  0xf3   : > { %v1755_v57 = vpop.permute.xlu1 %1754  ;;  %v1616_v59 = vpop.permute.xlu0 %1615 }
  0xf4   : > { %1811 = vst.msk [vmem:[#allocation2 + $0x20] sm:$0xff] %vm6373_vm13, %v1755_v57  ;;  %vm6378_vm13 = vcmask 130112   ;;  %v1580_v57 = vld [vmem:[%s4518_s22 + $0xa8] sm:$0xff] }
  0xf5   : > { %1671 = vst.msk [vmem:[#allocation2 + $0x28] sm:$0xff] %vm6369_vm9, %v1616_v59  ;;  %1109 = vrot.lane.b32.xlu1 %v1055_v55, %s4423_s8  ;;  %vm6379_vm9 = vcmask 589312  }
  0xf6   : > { %970 = vrot.lane.b32.xlu0 %v915_v56, %s4422_s25  ;;  %v1700_v56 = vld [vmem:[%s4518_s22 + $0xa1] sm:$0xff] }
  0xf7   : > { %v1217_v0 = vpop.permute.xlu1 %1216  ;;  %v816_v2 = vpop.permute.xlu0 %815 }
  0xf8   : > { %1270 = vst.msk [vmem:[#allocation2 + $0x38] sm:$0xff] %vm6377_vm10, %v1217_v0  ;;  %vm6383_vm10 = vmmov %vm6378_vm13 }
  0xf9   : > { %868 = vst.msk [vmem:[#allocation2 + $0x40] sm:$0xff] %vm6378_vm13, %v816_v2  ;;  %1629 = vrot.lane.b32.xlu1 %v1577_v61, %s4427_s14  ;;  %vm6386_vm13 = vcmask 588800  }
  0xfa   : > { %1510 = vrot.lane.b32.xlu0 %v4756_v30, %s4426_s15 }
  0xfb   : > { %v1757_v3 = vpop.permute.xlu1 %1756  ;;  %v1356_v5 = vpop.permute.xlu0 %1355  ;;  %v1831_v33 = vld [vmem:[#allocation2 + $0x20] sm:$0xff] }
  0xfc   : > { %1812 = vst.msk [vmem:[#allocation2 + $0x28] sm:$0xff] %vm6379_vm9, %v1757_v3  ;;  %4248 = vmatprep.mubr.msk.f32.mxu0 %vm6381_vm12, %v1831_v33  ;;  %vm6385_vm12 = vcmask 392512   ;;  %vm6387_vm9 = vcmask 261312   ;;  %v1701_v3 = vld [vmem:[%s4518_s22 + $0xa9] sm:$0xff] }
  0xfd   : > { %1410 = vst.msk [vmem:[#allocation2 + $0x30] sm:$0xff] %vm6380_vm0, %v1356_v5  ;;  %1230 = vrot.lane.b32.xlu1 %v1577_v61, %s4424_s9  ;;  %vm6384_vm0 = vcmask 458112  }
  0xfe   : > { %1111 = vrot.lane.b32.xlu0 %v4756_v30, %s4423_s8  ;;  %v1719_v30 = vsel %vm4919_vm8, %v1699_v17, 0.0  ;;  %vm6400_vm8 = vcmask 588800  }
  0xff   : > { %v957_v10 = vpop.permute.xlu1 %956  ;;  %v818_v11 = vpop.permute.xlu0 %817 }
 0x100   : > { %1009 = vst.msk [vmem:[#allocation2 + $0x40] sm:$0xff] %vm6382_vm14, %v957_v10 }
 0x101   : > { %869 = vst.msk [vmem:[#allocation2 + $0x48] sm:$0xff] %vm6383_vm10, %v818_v11  ;;  %1770 = vrot.lane.b32.xlu1 %v1698_v8, %s4428_s12  ;;  %vm6388_vm10 = vcmask 523712   ;;  %v1440_v11 = vld [vmem:[%s4518_s22 + $0xaf] sm:$0xff] }
 0x102   : > { %1631 = vrot.lane.b32.xlu0 %v1578_v9, %s4427_s14 }
 0x103   : > { %v1497_v14 = vpop.permute.xlu1 %1496  ;;  %v1358_v15 = vpop.permute.xlu0 %1357  ;;  %v1832_v16 = vld [vmem:[#allocation2 + $0x28] sm:$0xff] }
 0x104   : > { %1551 = vst.msk [vmem:[#allocation2 + $0x30] sm:$0xff] %vm6384_vm0, %v1497_v14  ;;  %4249 = vmatmul.mubr.msk.f32.gmra.mxu0 %vm6386_vm13, %v1832_v16  ;;  %vm6391_vm13 = vcmask 326912  }
 0x105   : > { %1411 = vst.msk [vmem:[#allocation2 + $0x38] sm:$0xff] %vm6385_vm12, %v1358_v15  ;;  %1232 = vrot.lane.b32.xlu1 %v1578_v9, %s4424_s9  ;;  %vm5047_vm12 = vcmp.lt.s32.totalorder %v461_v32, 15  ;;  %v1460_v15 = vsel %vm4999_vm7, %v1440_v11, 0.0  ;;  %vm6410_vm7 = vcmask 589312  }
 0x106   : > { %831 = vrot.lane.b32.xlu0 %v1577_v61, %s4421_s23  ;;  %v917_v42 = vsel %vm5047_vm12, %v1699_v17, 0.0 }
 0x107   : > { %v1098_v18 = vpop.permute.xlu1 %1097  ;;  %v959_v21 = vpop.permute.xlu0 %958 }
 0x108   : > { %1150 = vst.msk [vmem:[#allocation2 + $0x40] sm:$0xff] %vm6387_vm9, %v1098_v18 }
 0x109   : > { %1010 = vst.msk [vmem:[#allocation2 + $0x48] sm:$0xff] %vm6382_vm14, %v959_v21  ;;  %1772 = vrot.lane.b32.xlu1 %v1719_v30, %s4428_s12  ;;  %vm6392_vm14 = vcmask 589312  }
 0x10a   : > { %1371 = vrot.lane.b32.xlu0 %v1698_v8, %s4425_s10 }
 0x10b   : > { %v1618_v28 = vpop.permute.xlu1 %1617  ;;  %v1499_v29 = vpop.permute.xlu0 %1498 }
 0x10c   : > { %1672 = vst.msk [vmem:[#allocation2 + $0x30] sm:$0xff] %vm6388_vm10, %v1618_v28  ;;  %v1441_v28 = vld [vmem:[%s4518_s22 + $0xb7] sm:$0xff] }
 0x10d   : > { %1552 = vst.msk [vmem:[#allocation2 + $0x38] sm:$0xff] %vm6384_vm0, %v1499_v29  ;;  %972 = vrot.lane.b32.xlu1 %v1698_v8, %s4422_s25  ;;  %vm5063_vm0 = vcmp.gt.s32.totalorder %v468_v40, 0  ;;  %v337_v8 = vadd.s32 152, %v4505_v1  ;;  %v1320_v1 = vsel %vm5047_vm12, %v1701_v3, 0.0  ;;  %v1581_v29 = vld [vmem:[%s4518_s22 + $0xb0] sm:$0xff] }
 0x10e   : > { %833 = vrot.lane.b32.xlu0 %v1578_v9, %s4421_s23  ;;  %v736_v49 = vsel %vm5063_vm0, %v1438_v31, 0.0  ;;  %v1059_v18 = vsel %vm5063_vm0, %v1440_v11, 0.0 }
 0x10f   : > { %v1219_v37 = vpop.permute.xlu1 %1218  ;;  %v1100_v7 = vpop.permute.xlu0 %1099  ;;  %v475_v14 = vand.u32 15, %v337_v8 }
 0x110   : > { %1271 = vst.msk [vmem:[#allocation2 + $0x40] sm:$0xff] %vm6391_vm13, %v1219_v37  ;;  %vm6395_vm13 = vcmask 64512   ;;  %v1582_v37 = vld [vmem:[%s4518_s22 + $0xb8] sm:$0xff] }
 0x111   : > { %1151 = vst.msk [vmem:[#allocation2 + $0x48] sm:$0xff] %vm6387_vm9, %v1100_v7  ;;  %1512 = vrot.lane.b32.xlu1 %v1458_v36, %s4426_s15  ;;  %vm6396_vm9 = vcmask 326912   ;;  %v1702_v7 = vld [vmem:[%s4518_s22 + $0xb1] sm:$0xff] }
 0x112   : > { %1373 = vrot.lane.b32.xlu0 %v1318_v27, %s4425_s10  ;;  %757 = vst.msk [vmem:[#allocation2 + $0x90] sm:$0xff] %vm6395_vm13, %v736_v49  ;;  %vm6401_vm13 = vcmask 195712  }
 0x113   : > { %v1759_v43 = vpop.permute.xlu1 %1758  ;;  %v1620_v44 = vpop.permute.xlu0 %1619 }
 0x114   : > { %1813 = vst.msk [vmem:[#allocation2 + $0x30] sm:$0xff] %vm6392_vm14, %v1759_v43  ;;  %vm6397_vm14 = vcmask 130112  }
 0x115   : > { %1673 = vst.msk [vmem:[#allocation2 + $0x38] sm:$0xff] %vm6388_vm10, %v1620_v44  ;;  %1113 = vrot.lane.b32.xlu1 %v1057_v41, %s4423_s8  ;;  %vm6398_vm10 = vcmask 589312  }
 0x116   : > { %974 = vrot.lane.b32.xlu0 %v917_v42, %s4422_s25 }
 0x117   : > { %v1221_v50 = vpop.permute.xlu1 %1220  ;;  %v820_v51 = vpop.permute.xlu0 %819 }
 0x118   : > { %1272 = vst.msk [vmem:[#allocation2 + $0x48] sm:$0xff] %vm6396_vm9, %v1221_v50  ;;  %vm6402_vm9 = vmmov %vm6397_vm14 }
 0x119   : > { %870 = vst.msk [vmem:[#allocation2 + $0x50] sm:$0xff] %vm6397_vm14, %v820_v51  ;;  %1633 = vrot.lane.b32.xlu1 %v1579_v48, %s4427_s14  ;;  %vm6404_vm14 = vcmask 588800  }
 0x11a   : > { %1514 = vrot.lane.b32.xlu0 %v4815_v58, %s4426_s15 }
 0x11b   : > { %v1761_v47 = vpop.permute.xlu1 %1760  ;;  %v1360_v54 = vpop.permute.xlu0 %1359  ;;  %v1833_v55 = vld [vmem:[#allocation2 + $0x30] sm:$0xff] }
 0x11c   : > { %1814 = vst.msk [vmem:[#allocation2 + $0x38] sm:$0xff] %vm6398_vm10, %v1761_v47  ;;  %4251 = vmatprep.mubr.msk.f32.mxu0 %vm6400_vm8, %v1833_v55  ;;  %vm6403_vm8 = vcmask 458112   ;;  %vm6405_vm10 = vcmask 261312   ;;  %v1443_v55 = vld [vmem:[%s4518_s22 + $0xc7] sm:$0xff] }
 0x11d   : > { %1412 = vst.msk [vmem:[#allocation2 + $0x40] sm:$0xff] %vm6399_vm15, %v1360_v54  ;;  %1234 = vrot.lane.b32.xlu1 %v1579_v48, %s4424_s9  ;;  %v1442_v54 = vld [vmem:[%s4518_s22 + $0xbf] sm:$0xff] }
 0x11e   : > { %1115 = vrot.lane.b32.xlu0 %v4815_v58, %s4423_s8  ;;  %v1721_v58 = vsel %vm4983_vm11, %v1701_v3, 0.0  ;;  %v1462_v38 = vsel %vm5063_vm0, %v1442_v54, 0.0 }
 0x11f   : > { %v961_v59 = vpop.permute.xlu1 %960  ;;  %v822_v61 = vpop.permute.xlu0 %821 }
 0x120   : > { %1011 = vst.msk [vmem:[#allocation2 + $0x50] sm:$0xff] %vm6401_vm13, %v961_v59  ;;  %v1583_v59 = vld [vmem:[%s4518_s22 + $0xc0] sm:$0xff] }
 0x121   : > { %871 = vst.msk [vmem:[#allocation2 + $0x58] sm:$0xff] %vm6402_vm9, %v822_v61  ;;  %1774 = vrot.lane.b32.xlu1 %v1700_v56, %s4428_s12  ;;  %vm6406_vm9 = vcmask 523712   ;;  %v1584_v61 = vld [vmem:[%s4518_s22 + $0xc8] sm:$0xff] }
 0x122   : > { %1635 = vrot.lane.b32.xlu0 %v1580_v57, %s4427_s14 }
 0x123   : > { %v1501_v62 = vpop.permute.xlu1 %1500  ;;  %v1362_v0 = vpop.permute.xlu0 %1361  ;;  %v1834_v2 = vld [vmem:[#allocation2 + $0x38] sm:$0xff] }
 0x124   : > { %1553 = vst.msk [vmem:[#allocation2 + $0x40] sm:$0xff] %vm6403_vm8, %v1501_v62  ;;  %4252 = vmatmul.mubr.msk.f32.gmra.mxu0 %vm6404_vm14, %v1834_v2  ;;  %vm6409_vm14 = vcmask 326912   ;;  %v1705_v2 = vld [vmem:[%s4518_s22 + $0xc9] sm:$0xff] }
 0x125   : > { %1413 = vst.msk [vmem:[#allocation2 + $0x48] sm:$0xff] %vm6399_vm15, %v1362_v0  ;;  %1236 = vrot.lane.b32.xlu1 %v1580_v57, %s4424_s9  ;;  %vm5110_vm15 = vcmp.lt.s32.totalorder %v475_v14, 15 }
 0x126   : > { %835 = vrot.lane.b32.xlu0 %v1579_v48, %s4421_s23  ;;  %v919_v60 = vsel %vm5110_vm15, %v1701_v3, 0.0  ;;  %v1703_v48 = vld [vmem:[%s4518_s22 + $0xb9] sm:$0xff]  ;;  %v1725_v3 = vsel %vm5110_vm15, %v1705_v2, 0.0 }
 0x127   : > { %v1102_v5 = vpop.permute.xlu1 %1101  ;;  %v963_v33 = vpop.permute.xlu0 %962  ;;  %v1723_v49 = vsel %vm5047_vm12, %v1703_v48, 0.0  ;;  %v1322_v50 = vsel %vm5110_vm15, %v1703_v48, 0.0  ;;  %vm6423_vm12 = vcmask 523712   ;;  %v5214_v48 = vld [vmem:[%s6281_s3] ss:$0 sm:$0xff] }
 0x128   : > { %1152 = vst.msk [vmem:[#allocation2 + $0x50] sm:$0xff] %vm6405_vm10, %v1102_v5 }
 0x129   : > { %1012 = vst.msk [vmem:[#allocation2 + $0x58] sm:$0xff] %vm6401_vm13, %v963_v33  ;;  %1776 = vrot.lane.b32.xlu1 %v1721_v58, %s4428_s12  ;;  %vm6411_vm13 = vmmov %vm6406_vm9 }
 0x12a   : > { %1375 = vrot.lane.b32.xlu0 %v1700_v56, %s4425_s10 }
 0x12b   : > { %v1622_v9 = vpop.permute.xlu1 %1621  ;;  %v1503_v10 = vpop.permute.xlu0 %1502 }
 0x12c   : > { %1674 = vst.msk [vmem:[#allocation2 + $0x40] sm:$0xff] %vm6406_vm9, %v1622_v9  ;;  %vm6412_vm9 = vmmov %vm6409_vm14 }
 0x12d   : > { %1554 = vst.msk [vmem:[#allocation2 + $0x48] sm:$0xff] %vm6403_vm8, %v1503_v10  ;;  %976 = vrot.lane.b32.xlu1 %v1700_v56, %s4422_s25  ;;  %vm6413_vm8 = vcmask 130112  }
 0x12e   : > { %837 = vrot.lane.b32.xlu0 %v1580_v57, %s4421_s23 }
 0x12f   : > { %v1223_v16 = vpop.permute.xlu1 %1222  ;;  %v1104_v17 = vpop.permute.xlu0 %1103 }
 0x130   : > { %1273 = vst.msk [vmem:[#allocation2 + $0x50] sm:$0xff] %vm6409_vm14, %v1223_v16  ;;  %vm6414_vm14 = vmmov %vm6410_vm7 }
 0x131   : > { %1153 = vst.msk [vmem:[#allocation2 + $0x58] sm:$0xff] %vm6405_vm10, %v1104_v17  ;;  %1516 = vrot.lane.b32.xlu1 %v1460_v15, %s4426_s15  ;;  %vm6415_vm10 = vcmask 392512  }
 0x132   : > { %1377 = vrot.lane.b32.xlu0 %v1320_v1, %s4425_s10 }
 0x133   : > { %v1763_v21 = vpop.permute.xlu1 %1762 }
 0x134   : > { %v1624_v22 = vpop.permute.xlu0 %1623  ;;  %1815 = vst.msk [vmem:[#allocation2 + $0x40] sm:$0xff] %vm6410_vm7, %v1763_v21  ;;  %vm6416_vm7 = vcmask 588800  }
 0x135   : > { %1675 = vst.msk [vmem:[#allocation2 + $0x48] sm:$0xff] %vm6411_vm13, %v1624_v22  ;;  %1117 = vrot.lane.b32.xlu1 %v1059_v18, %s4423_s8  ;;  %vm6417_vm13 = vcmask 195712  }
 0x136   : > { %978 = vrot.lane.b32.xlu0 %v919_v60, %s4422_s25 }
 0x137   : > { %v1225_v31 = vpop.permute.xlu1 %1224 }
 0x138   : > { %v824_v32 = vpop.permute.xlu0 %823  ;;  %1274 = vst.msk [vmem:[#allocation2 + $0x58] sm:$0xff] %vm6412_vm9, %v1225_v31  ;;  %vm6418_vm9 = vmmov %vm6413_vm8 }
 0x139   : > { %872 = vst.msk [vmem:[#allocation2 + $0x60] sm:$0xff] %vm6413_vm8, %v824_v32  ;;  %1637 = vrot.lane.b32.xlu1 %v1581_v29, %s4427_s14  ;;  %vm6419_vm8 = vcmask 458112  }
 0x13a   : > { %1518 = vrot.lane.b32.xlu0 %v1441_v28, %s4426_s15 }
 0x13b   : > { %v1765_v34 = vpop.permute.xlu1 %1764  ;;  %v1835_v27 = vld [vmem:[#allocation2 + $0x40] sm:$0xff] }
 0x13c   : > { %v1364_v36 = vpop.permute.xlu0 %1363  ;;  %1816 = vst.msk [vmem:[#allocation2 + $0x48] sm:$0xff] %vm6414_vm14, %v1765_v34  ;;  %4254 = vmatprep.mubr.msk.f32.mxu0 %vm6416_vm7, %v1835_v27  ;;  %vm6420_vm14 = vmmov %vm6415_vm10 }
 0x13d   : > { %1414 = vst.msk [vmem:[#allocation2 + $0x50] sm:$0xff] %vm6415_vm10, %v1364_v36  ;;  %1238 = vrot.lane.b32.xlu1 %v1581_v29, %s4424_s9  ;;  %vm6421_vm10 = vmmov %vm6416_vm7  ;;  %vm6422_vm7 = vcmask 261312  }
 0x13e   : > { %1119 = vrot.lane.b32.xlu0 %v1441_v28, %s4423_s8  ;;  %vm6426_vm0 = vmmov %vm6422_vm7 }
 0x13f   : > { %v965_v40 = vpop.permute.xlu1 %964 }
 0x140   : > { %v826_v41 = vpop.permute.xlu0 %825  ;;  %1013 = vst.msk [vmem:[#allocation2 + $0x60] sm:$0xff] %vm6417_vm13, %v965_v40 }
 0x141   : > { %873 = vst.msk [vmem:[#allocation2 + $0x68] sm:$0xff] %vm6418_vm9, %v826_v41  ;;  %1778 = vrot.lane.b32.xlu1 %v1702_v7, %s4428_s12  ;;  %vm6424_vm9 = vmmov %vm6419_vm8  ;;  %v5207_v41 = vld [vmem:[%s6280_s2] ss:$0 sm:$0xff] }
 0x142   : > { %1639 = vrot.lane.b32.xlu0 %v1582_v37, %s4427_s14 }
 0x143   : > { %v1505_v42 = vpop.permute.xlu1 %1504  ;;  %v1836_v44 = vld [vmem:[#allocation2 + $0x48] sm:$0xff] }
 0x144   : > { %v1366_v43 = vpop.permute.xlu0 %1365  ;;  %1555 = vst.msk [vmem:[#allocation2 + $0x50] sm:$0xff] %vm6419_vm8, %v1505_v42  ;;  %4255 = vmatmul.mubr.msk.f32.gmra.mxu0 %vm6421_vm10, %v1836_v44  ;;  %vm6425_vm8 = vcmask 326912   ;;  %vm6428_vm10 = vmmov %vm6423_vm12 }
 0x145   : > { %1415 = vst.msk [vmem:[#allocation2 + $0x58] sm:$0xff] %vm6420_vm14, %v1366_v43  ;;  %1379 = vrot.lane.b32.xlu1 %v1702_v7, %s4425_s10  ;;  %vm6427_vm14 = vcmask 589312  }
 0x146   : > { %1240 = vrot.lane.b32.xlu0 %v1582_v37, %s4424_s9  ;;  %vm6431_vm15 = vmmov %vm6427_vm14 }
 0x147   : > { %v1106_v51 = vpop.permute.xlu1 %1105 }
 0x148   : > { %v967_v47 = vpop.permute.xlu0 %966  ;;  %1154 = vst.msk [vmem:[#allocation2 + $0x60] sm:$0xff] %vm6422_vm7, %v1106_v51  ;;  %vm6429_vm7 = vmmov %vm6425_vm8 }
 0x149   : > { %1014 = vst.msk [vmem:[#allocation2 + $0x68] sm:$0xff] %vm6417_vm13, %v967_v47  ;;  %1381 = vrot.lane.b32.xlu1 %v1322_v50, %s4425_s10  ;;  %vm6430_vm13 = vcmask 130112  }
 0x14a   : > { %1780 = vrot.lane.b32.xlu0 %v1723_v49, %s4428_s12 }
 0x14b   : > { %v1626_v56 = vpop.permute.xlu1 %1625 }
 0x14c   : > { %v1507_v57 = vpop.permute.xlu0 %1506  ;;  %1676 = vst.msk [vmem:[#allocation2 + $0x50] sm:$0xff] %vm6423_vm12, %v1626_v56  ;;  %vm6432_vm12 = vcmask 392512  }
 0x14d   : > { %1556 = vst.msk [vmem:[#allocation2 + $0x58] sm:$0xff] %vm6424_vm9, %v1507_v57  ;;  %1522 = vrot.lane.b32.xlu1 %v1443_v55, %s4426_s15  ;;  %vm6433_vm9 = vcmask 588800  }
 0x14e   : > { %1520 = vrot.lane.b32.xlu0 %v1462_v38, %s4426_s15 }
 0x14f   : > { %v1227_v62 = vpop.permute.xlu1 %1226 }
 0x150   : > { %v1108_v0 = vpop.permute.xlu0 %1107  ;;  %1275 = vst.msk [vmem:[#allocation2 + $0x60] sm:$0xff] %vm6425_vm8, %v1227_v62  ;;  %vm6434_vm8 = vcmask 195712  }
 0x151   : > { %1155 = vst.msk [vmem:[#allocation2 + $0x68] sm:$0xff] %vm6426_vm0, %v1108_v0  ;;  %1643 = vrot.lane.b32.xlu1 %v1584_v61, %s4427_s14  ;;  %vm6435_vm0 = vmmov %vm6430_vm13 }
 0x152   : > { %1641 = vrot.lane.b32.xlu0 %v1583_v59, %s4427_s14 }
 0x153   : > { %v1767_v58 = vpop.permute.xlu1 %1766 }
 0x154   : > { %v1628_v5 = vpop.permute.xlu0 %1627  ;;  %1817 = vst.msk [vmem:[#allocation2 + $0x50] sm:$0xff] %vm6427_vm14, %v1767_v58  ;;  %vm6436_vm14 = vcmask 458112  }
 0x155   : > { %1677 = vst.msk [vmem:[#allocation2 + $0x58] sm:$0xff] %vm6428_vm10, %v1628_v5  ;;  %1784 = vrot.lane.b32.xlu1 %v1725_v3, %s4428_s12  ;;  %vm6437_vm10 = vmmov %vm6432_vm12 }
 0x156   : > { %1782 = vrot.lane.b32.xlu0 %v1704_v45, %s4428_s12 }
 0x157   : > { %v1229_v33 = vpop.permute.xlu1 %1228 }
 0x158   : > { %v828_v8 = vpop.permute.xlu0 %827  ;;  %1276 = vst.msk [vmem:[#allocation2 + $0x68] sm:$0xff] %vm6429_vm7, %v1229_v33  ;;  %vm6438_vm7 = vmmov %vm6433_vm9 }
 0x159   : > { %874 = vst.msk [vmem:[#allocation2 + $0x70] sm:$0xff] %vm6430_vm13, %v828_v8  ;;  %vm6439_vm13 = vcmask 261312  }
 0x15b   : > { %v1769_v9 = vpop.permute.xlu1 %1768  ;;  %v1837_v11 = vld [vmem:[#allocation2 + $0x50] sm:$0xff] }
 0x15c   : > { %v1368_v10 = vpop.permute.xlu0 %1367  ;;  %1818 = vst.msk [vmem:[#allocation2 + $0x58] sm:$0xff] %vm6431_vm15, %v1769_v9  ;;  %4257 = vmatprep.mubr.msk.f32.mxu0 %vm6433_vm9, %v1837_v11  ;;  %vm6440_vm15 = vmmov %vm6434_vm8 }
 0x15d   : > { %1416 = vst.msk [vmem:[#allocation2 + $0x60] sm:$0xff] %vm6432_vm12, %v1368_v10  ;;  %vm6441_vm12 = vcmask 523712   ;;  %vm6442_vm9 = vmmov %vm6436_vm14 }
 0x15f   : > { %v969_v14 = vpop.permute.xlu1 %968 }
 0x160   : > { %v830_v1 = vpop.permute.xlu0 %829  ;;  %1015 = vst.msk [vmem:[#allocation2 + $0x70] sm:$0xff] %vm6434_vm8, %v969_v14  ;;  %vm6443_vm8 = vcmask 326912  }
 0x161   : > { %875 = vst.msk [vmem:[#allocation2 + $0x78] sm:$0xff] %vm6435_vm0, %v830_v1  ;;  %vm6444_vm0 = vmmov %vm6439_vm13 }
 0x163   : > { %v1509_v15 = vpop.permute.xlu1 %1508  ;;  %v1838_v17 = vld [vmem:[#allocation2 + $0x58] sm:$0xff] }
 0x164   : > { %v1370_v16 = vpop.permute.xlu0 %1369  ;;  %1557 = vst.msk [vmem:[#allocation2 + $0x60] sm:$0xff] %vm6436_vm14, %v1509_v15  ;;  %4258 = vmatmul.mubr.msk.f32.gmra.mxu0 %vm6438_vm7, %v1838_v17  ;;  %vm6445_vm14 = vcmask 589312   ;;  %vm6447_vm7 = vmmov %vm6443_vm8 }
 0x165   : > { %1417 = vst.msk [vmem:[#allocation2 + $0x68] sm:$0xff] %vm6437_vm10, %v1370_v16  ;;  %vm6446_vm10 = vmmov %vm6441_vm12 }
 0x167   : > { %v1110_v30 = vpop.permute.xlu1 %1109 }
 0x168   : > { %v971_v60 = vpop.permute.xlu0 %970  ;;  %1156 = vst.msk [vmem:[#allocation2 + $0x70] sm:$0xff] %vm6439_vm13, %v1110_v30  ;;  %vm6448_vm13 = vcmask 130112  }
 0x169   : > { %1016 = vst.msk [vmem:[#allocation2 + $0x78] sm:$0xff] %vm6440_vm15, %v971_v60  ;;  %vm6449_vm15 = vmmov %vm6445_vm14 }
 0x16b   : > { %v1630_v18 = vpop.permute.xlu1 %1629 }
 0x16c   : > { %v1511_v21 = vpop.permute.xlu0 %1510  ;;  %1678 = vst.msk [vmem:[#allocation2 + $0x60] sm:$0xff] %vm6441_vm12, %v1630_v18  ;;  %vm6450_vm12 = vcmask 392512  }
 0x16d   : > { %1558 = vst.msk [vmem:[#allocation2 + $0x68] sm:$0xff] %vm6442_vm9, %v1511_v21  ;;  %vm6451_vm9 = vcmask 588800  }
 0x16f   : > { %v1231_v22 = vpop.permute.xlu1 %1230 }
 0x170   : > { %v1112_v28 = vpop.permute.xlu0 %1111  ;;  %1277 = vst.msk [vmem:[#allocation2 + $0x70] sm:$0xff] %vm6443_vm8, %v1231_v22  ;;  %vm6452_vm8 = vcmask 195712  }
 0x171   : > { %1157 = vst.msk [vmem:[#allocation2 + $0x78] sm:$0xff] %vm6444_vm0, %v1112_v28  ;;  %vm6453_vm0 = vmmov %vm6448_vm13 }
 0x173   : > { %v1771_v29 = vpop.permute.xlu1 %1770 }
 0x174   : > { %v1632_v31 = vpop.permute.xlu0 %1631  ;;  %1819 = vst.msk [vmem:[#allocation2 + $0x60] sm:$0xff] %vm6445_vm14, %v1771_v29  ;;  %vm6454_vm14 = vcmask 458112  }
 0x175   : > { %1679 = vst.msk [vmem:[#allocation2 + $0x68] sm:$0xff] %vm6446_vm10, %v1632_v31  ;;  %vm6455_vm10 = vmmov %vm6450_vm12 }
 0x177   : > { %v1233_v32 = vpop.permute.xlu1 %1232 }
 0x178   : > { %v832_v34 = vpop.permute.xlu0 %831  ;;  %1278 = vst.msk [vmem:[#allocation2 + $0x78] sm:$0xff] %vm6447_vm7, %v1233_v32  ;;  %vm6456_vm7 = vmmov %vm6451_vm9 }
 0x179   : > { %876 = vst.msk [vmem:[#allocation2 + $0x80] sm:$0xff] %vm6448_vm13, %v832_v34  ;;  %vm6457_vm13 = vcmask 261312  }
 0x17b   : > { %v1773_v36 = vpop.permute.xlu1 %1772  ;;  %v1839_v37 = vld [vmem:[#allocation2 + $0x60] sm:$0xff] }
 0x17c   : > { %v1372_v27 = vpop.permute.xlu0 %1371  ;;  %1820 = vst.msk [vmem:[#allocation2 + $0x68] sm:$0xff] %vm6449_vm15, %v1773_v36  ;;  %4260 = vmatprep.mubr.msk.f32.mxu0 %vm6451_vm9, %v1839_v37  ;;  %vm6458_vm15 = vmmov %vm6452_vm8 }
 0x17d   : > { %1418 = vst.msk [vmem:[#allocation2 + $0x70] sm:$0xff] %vm6450_vm12, %v1372_v27  ;;  %vm6459_vm12 = vcmask 523712   ;;  %vm6460_vm9 = vmmov %vm6454_vm14 }
 0x17f   : > { %v973_v7 = vpop.permute.xlu1 %972 }
 0x180   : > { %v834_v40 = vpop.permute.xlu0 %833  ;;  %1017 = vst.msk [vmem:[#allocation2 + $0x80] sm:$0xff] %vm6452_vm8, %v973_v7  ;;  %vm6461_vm8 = vcmask 326912  }
 0x181   : > { %877 = vst.msk [vmem:[#allocation2 + $0x88] sm:$0xff] %vm6453_vm0, %v834_v40  ;;  %vm6462_vm0 = vmmov %vm6457_vm13 }
 0x183   : > { %v1513_v42 = vpop.permute.xlu1 %1512  ;;  %v1840_v44 = vld [vmem:[#allocation2 + $0x68] sm:$0xff] }
 0x184   : > { %v1374_v43 = vpop.permute.xlu0 %1373  ;;  %1559 = vst.msk [vmem:[#allocation2 + $0x70] sm:$0xff] %vm6454_vm14, %v1513_v42  ;;  %v4244_v49 = vpop.f32.mrf.mxu0  ;;  %4261 = vmatmul.mubr.msk.f32.gmra.mxu0 %vm6456_vm7, %v1840_v44  ;;  %vm6463_vm14 = vcmask 589312   ;;  %vm6465_vm7 = vmmov %vm6461_vm8 }
 0x185   : > { %1419 = vst.msk [vmem:[#allocation2 + $0x78] sm:$0xff] %vm6455_vm10, %v1374_v43  ;;  %v2089_v50 = vmul.f32 %v4244_v49, %v5207_v41  ;;  %vm6464_vm10 = vmmov %vm6459_vm12 }
 0x186   : > { %v1983_v51 = vpop.f32.mrf.mxu0 }
 0x187   : > { %v2115_v47 = vadd.f32 %v5214_v48, %v2089_v50  ;;  %v2088_v54 = vmul.f32 %v5207_v41, %v1983_v51  ;;  %v1114_v38 = vpop.permute.xlu1 %1113 }
 0x188   : > { %v975_v55 = vpop.permute.xlu0 %974  ;;  %1158 = vst.msk [vmem:[#allocation2 + $0x80] sm:$0xff] %vm6457_vm13, %v1114_v38  ;;  %vm6466_vm13 = vcmask 130112  }
 0x189   : > { %1018 = vst.msk [vmem:[#allocation2 + $0x88] sm:$0xff] %vm6458_vm15, %v975_v55  ;;  %v2135_v56 = vmax.f32 %v2115_v47, 0.0  ;;  %v2114_v57 = vadd.f32 %v5214_v48, %v2088_v54  ;;  %vm6467_vm15 = vmmov %vm6463_vm14 }
 0x18b   : > { %2157 = vst [vmem:[#allocation3 + $0x10] sm:$0xff] %v2135_v56  ;;  %v2134_v59 = vmax.f32 %v2114_v57, 0.0  ;;  %v1634_v61 = vpop.permute.xlu1 %1633 }
 0x18c   : > { %v1515_v62 = vpop.permute.xlu0 %1514  ;;  %1680 = vst.msk [vmem:[#allocation2 + $0x70] sm:$0xff] %vm6459_vm12, %v1634_v61  ;;  %vm6468_vm12 = vcmask 392512  }
 0x18d   : > { %1560 = vst.msk [vmem:[#allocation2 + $0x78] sm:$0xff] %vm6460_vm9, %v1515_v62  ;;  %2156 = vst [vmem:[#allocation3 + $0x8] sm:$0xff] %v2134_v59  ;;  %vm6469_vm9 = vcmask 588800  }
 0x18f   : > { %v1235_v0 = vpop.permute.xlu1 %1234 }
 0x190   : > { %v1116_v2 = vpop.permute.xlu0 %1115  ;;  %1279 = vst.msk [vmem:[#allocation2 + $0x80] sm:$0xff] %vm6461_vm8, %v1235_v0  ;;  %vm6470_vm8 = vmmov %vm6466_vm13 }
 0x191   : > { %1159 = vst.msk [vmem:[#allocation2 + $0x88] sm:$0xff] %vm6462_vm0, %v1116_v2  ;;  %vm6471_vm0 = vcmask 195712  }
 0x193   : > { %v1775_v45 = vpop.permute.xlu1 %1774 }
 0x194   : > { %v1636_v3 = vpop.permute.xlu0 %1635  ;;  %1821 = vst.msk [vmem:[#allocation2 + $0x70] sm:$0xff] %vm6463_vm14, %v1775_v45  ;;  %vm6472_vm14 = vmmov %vm6468_vm12 }
 0x195   : > { %1681 = vst.msk [vmem:[#allocation2 + $0x78] sm:$0xff] %vm6464_vm10, %v1636_v3  ;;  %vm6473_vm10 = vcmask 458112  }
 0x197   : > { %v1237_v58 = vpop.permute.xlu1 %1236 }
 0x198   : > { %v836_v5 = vpop.permute.xlu0 %835  ;;  %1280 = vst.msk [vmem:[#allocation2 + $0x88] sm:$0xff] %vm6465_vm7, %v1237_v58  ;;  %vm6474_vm7 = vmmov %vm6469_vm9 }
 0x199   : > { %878 = vst.msk [vmem:[#allocation2 + $0x90] sm:$0xff] %vm6466_vm13, %v836_v5  ;;  %vm6475_vm13 = vmmov %vm6471_vm0 }
 0x19b   : > { %v1777_v33 = vpop.permute.xlu1 %1776  ;;  %v1841_v9 = vld [vmem:[#allocation2 + $0x70] sm:$0xff] }
 0x19c   : > { %v1376_v8 = vpop.permute.xlu0 %1375  ;;  %1822 = vst.msk [vmem:[#allocation2 + $0x78] sm:$0xff] %vm6467_vm15, %v1777_v33  ;;  %4263 = vmatprep.mubr.msk.f32.mxu0 %vm6469_vm9, %v1841_v9  ;;  %vm6476_vm15 = vcmask 261312   ;;  %vm6478_vm9 = vcmask 523712  }
 0x19d   : > { %1420 = vst.msk [vmem:[#allocation2 + $0x80] sm:$0xff] %vm6468_vm12, %v1376_v8  ;;  %vm6477_vm12 = vmmov %vm6473_vm10 }
 0x19f   : > { %v977_v11 = vpop.permute.xlu1 %976 }
 0x1a0   : > { %v838_v10 = vpop.permute.xlu0 %837  ;;  %1019 = vst.msk [vmem:[#allocation2 + $0x90] sm:$0xff] %vm6471_vm0, %v977_v11  ;;  %vm6480_vm0 = vcmask 326912  }
 0x1a1   : > { %879 = vst.msk [vmem:[#allocation2 + $0x98] sm:$0xff] %vm6470_vm8, %v838_v10  ;;  %vm6479_vm8 = vmmov %vm6476_vm15 }
 0x1a3   : > { %v1517_v1 = vpop.permute.xlu1 %1516  ;;  %v1842_v15 = vld [vmem:[#allocation2 + $0x78] sm:$0xff] }
 0x1a4   : > { %v1378_v14 = vpop.permute.xlu0 %1377  ;;  %1561 = vst.msk [vmem:[#allocation2 + $0x80] sm:$0xff] %vm6473_vm10, %v1517_v1  ;;  %v4247_v16 = vpop.f32.mrf.mxu0  ;;  %4264 = vmatmul.mubr.msk.f32.gmra.mxu0 %vm6474_vm7, %v1842_v15  ;;  %vm6482_vm10 = vcmask 589312   ;;  %vm6483_vm7 = vmmov %vm6480_vm0 }
 0x1a5   : > { %1421 = vst.msk [vmem:[#allocation2 + $0x88] sm:$0xff] %vm6472_vm14, %v1378_v14  ;;  %v2091_v17 = vmul.f32 %v4247_v16, %v5207_v41  ;;  %vm6481_vm14 = vmmov %vm6478_vm9 }
 0x1a6   : > { %v1993_v30 = vpop.f32.mrf.mxu0 }
 0x1a7   : > { %v2117_v60 = vadd.f32 %v5214_v48, %v2091_v17  ;;  %v2090_v18 = vmul.f32 %v5207_v41, %v1993_v30  ;;  %v1118_v22 = vpop.permute.xlu1 %1117 }
 0x1a8   : > { %v979_v21 = vpop.permute.xlu0 %978  ;;  %1160 = vst.msk [vmem:[#allocation2 + $0x90] sm:$0xff] %vm6476_vm15, %v1118_v22  ;;  %vm6485_vm15 = vmmov %vm6482_vm10 }
 0x1a9   : > { %1020 = vst.msk [vmem:[#allocation2 + $0x98] sm:$0xff] %vm6475_vm13, %v979_v21  ;;  %v2137_v28 = vmax.f32 %v2117_v60, 0.0  ;;  %v2116_v29 = vadd.f32 %v5214_v48, %v2090_v18  ;;  %vm6484_vm13 = vcmask 392512  }
 0x1ab   : > { %2159 = vst [vmem:[#allocation3 + $0x20] sm:$0xff] %v2137_v28  ;;  %v2136_v31 = vmax.f32 %v2116_v29, 0.0  ;;  %v1638_v34 = vpop.permute.xlu1 %1637  ;;  %v4429_v29 = vmov 0.0  }
 0x1ac   : > { %v1519_v32 = vpop.permute.xlu0 %1518  ;;  %1682 = vst.msk [vmem:[#allocation2 + $0x80] sm:$0xff] %vm6478_vm9, %v1638_v34  ;;  %vm6487_vm9 = vcmask 588800   ;;  %2154 = vst [vmem:[#allocation3] sm:$0xff] %v4429_v29 }
 0x1ad   : > { %1562 = vst.msk [vmem:[#allocation2 + $0x88] sm:$0xff] %vm6477_vm12, %v1519_v32  ;;  %2158 = vst [vmem:[#allocation3 + $0x18] sm:$0xff] %v2136_v31 }
 0x1ae   : > { %vm6486_vm12 = vmmov %vm6484_vm13  ;;  %2155 = vst [vmem:[#allocation3 + $0xa8] sm:$0xff] %v4429_v29 }
 0x1af   : > { %v1239_v27 = vpop.permute.xlu1 %1238 }
 0x1b0   : > { %v1120_v36 = vpop.permute.xlu0 %1119  ;;  %1281 = vst.msk [vmem:[#allocation2 + $0x90] sm:$0xff] %vm6480_vm0, %v1239_v27 }
 0x1b1   : > { %1161 = vst.msk [vmem:[#allocation2 + $0x98] sm:$0xff] %vm6479_vm8, %v1120_v36  ;;  %vm6488_vm8 = vcmask 458112  }
 0x1b2   : > { %vm6489_vm0 = vmmov %vm6488_vm8 }
 0x1b3   : > { %v1779_v7 = vpop.permute.xlu1 %1778 }
 0x1b4   : > { %v1640_v37 = vpop.permute.xlu0 %1639  ;;  %1823 = vst.msk [vmem:[#allocation2 + $0x80] sm:$0xff] %vm6482_vm10, %v1779_v7  ;;  %vm6490_vm10 = vmmov %vm6481_vm14 }
 0x1b5   : > { %1683 = vst.msk [vmem:[#allocation2 + $0x88] sm:$0xff] %vm6481_vm14, %v1640_v37 }
 0x1b7   : > { %v1380_v42 = vpop.permute.xlu1 %1379 }
 0x1b8   : > { %v1241_v40 = vpop.permute.xlu0 %1240  ;;  %1422 = vst.msk [vmem:[#allocation2 + $0x90] sm:$0xff] %vm6484_vm13, %v1380_v42  ;;  %vm6492_vm13 = vmmov %vm6485_vm15 }
 0x1b9   : > { %1282 = vst.msk [vmem:[#allocation2 + $0x98] sm:$0xff] %vm6483_vm7, %v1241_v40  ;;  %vm6491_vm7 = vmmov %vm6487_vm9 }
 0x1bb   : > { %v1382_v44 = vpop.permute.xlu1 %1381  ;;  %v1843_v49 = vld [vmem:[#allocation2 + $0x80] sm:$0xff] }
 0x1bc   : > { %v1781_v43 = vpop.permute.xlu0 %1780  ;;  %1423 = vst.msk [vmem:[#allocation2 + $0x98] sm:$0xff] %vm6486_vm12, %v1382_v44  ;;  %4266 = vmatprep.mubr.msk.f32.mxu0 %vm6487_vm9, %v1843_v49  ;;  %vm6494_vm12 = vmmov %vm6491_vm7 }
 0x1bd   : > { %1824 = vst.msk [vmem:[#allocation2 + $0x88] sm:$0xff] %vm6485_vm15, %v1781_v43  ;;  %vm6493_vm15 = vmmov %vm6492_vm13 }
 0x1be   : > { %vm6495_vm9 = vmmov %vm6491_vm7 }
 0x1bf   : > { %v1523_v51 = vpop.permute.xlu1 %1522 }
 0x1c0   : > { %v1521_v50 = vpop.permute.xlu0 %1520  ;;  %1564 = vst.msk [vmem:[#allocation2 + $0x98] sm:$0xff] %vm6489_vm0, %v1523_v51 }
 0x1c1   : > { %1563 = vst.msk [vmem:[#allocation2 + $0x90] sm:$0xff] %vm6488_vm8, %v1521_v50 }
 0x1c3   : > { %v1644_v54 = vpop.permute.xlu1 %1643 }
 0x1c4   : > { %v1642_v47 = vpop.permute.xlu0 %1641  ;;  %v1844_v38 = vld [vmem:[#allocation2 + $0x88] sm:$0xff]  ;;  %1685 = vst.msk [vmem:[#allocation2 + $0x98] sm:$0xff] %vm6490_vm10, %v1644_v54  ;;  %v4250_v55 = vpop.f32.mrf.mxu0 }
 0x1c5   : > { %1684 = vst.msk [vmem:[#allocation2 + $0x90] sm:$0xff] %vm6481_vm14, %v1642_v47  ;;  %4267 = vmatmul.mubr.msk.f32.gmra.mxu0 %vm6491_vm7, %v1844_v38  ;;  %v2093_v56 = vmul.f32 %v4250_v55, %v5207_v41 }
 0x1c6   : > { %v2003_v57 = vpop.f32.mrf.mxu0 }
 0x1c7   : > { %v2119_v59 = vadd.f32 %v5214_v48, %v2093_v56  ;;  %v2092_v61 = vmul.f32 %v5207_v41, %v2003_v57  ;;  %v1785_v0 = vpop.permute.xlu1 %1784 }
 0x1c8   : > { %v1783_v62 = vpop.permute.xlu0 %1782  ;;  %1826 = vst.msk [vmem:[#allocation2 + $0x98] sm:$0xff] %vm6493_vm15, %v1785_v0 }
 0x1c9   : > { %1825 = vst.msk [vmem:[#allocation2 + $0x90] sm:$0xff] %vm6492_vm13, %v1783_v62  ;;  %v2139_v2 = vmax.f32 %v2119_v59, 0.0  ;;  %v2118_v45 = vadd.f32 %v5214_v48, %v2092_v61 }
 0x1cb   : > { %2161 = vst [vmem:[#allocation3 + $0x30] sm:$0xff] %v2139_v2  ;;  %v2138_v3 = vmax.f32 %v2118_v45, 0.0 }
 0x1cd   : > { %2160 = vst [vmem:[#allocation3 + $0x28] sm:$0xff] %v2138_v3 }
 0x1cf   : > { %v1846_v5 = vld [vmem:[#allocation2 + $0x98] sm:$0xff] }
 0x1d0   : > { %v1845_v58 = vld [vmem:[#allocation2 + $0x90] sm:$0xff] }
 0x1d1   : > { %4269 = vmatprep.mubr.msk.f32.mxu0 %vm6494_vm12, %v1845_v58 }
 0x1d2   : > { %4270 = vmatmul.mubr.msk.f32.gmra.mxu0 %vm6495_vm9, %v1846_v5 }
 0x1e4   : > { %v4253_v33 = vpop.f32.mrf.mxu0 }
 0x1e5   : > { %v2095_v8 = vmul.f32 %v4253_v33, %v5207_v41 }
 0x1e6   : > { %v2013_v9 = vpop.f32.mrf.mxu0 }
 0x1e7   : > { %v2121_v10 = vadd.f32 %v5214_v48, %v2095_v8  ;;  %v2094_v11 = vmul.f32 %v5207_v41, %v2013_v9 }
 0x1e9   : > { %v2141_v14 = vmax.f32 %v2121_v10, 0.0  ;;  %v2120_v1 = vadd.f32 %v5214_v48, %v2094_v11 }
 0x1eb   : > { %2163 = vst [vmem:[#allocation3 + $0x40] sm:$0xff] %v2141_v14  ;;  %v2140_v15 = vmax.f32 %v2120_v1, 0.0 }
 0x1ed   : > { %2162 = vst [vmem:[#allocation3 + $0x38] sm:$0xff] %v2140_v15 }
 0x204   : > { %v4256_v16 = vpop.f32.mrf.mxu0 }
 0x205   : > { %v2097_v17 = vmul.f32 %v4256_v16, %v5207_v41 }
 0x206   : > { %v2023_v30 = vpop.f32.mrf.mxu0 }
 0x207   : > { %v2123_v60 = vadd.f32 %v5214_v48, %v2097_v17  ;;  %v2096_v18 = vmul.f32 %v5207_v41, %v2023_v30 }
 0x209   : > { %v2143_v21 = vmax.f32 %v2123_v60, 0.0  ;;  %v2122_v22 = vadd.f32 %v5214_v48, %v2096_v18 }
 0x20b   : > { %2165 = vst [vmem:[#allocation3 + $0x50] sm:$0xff] %v2143_v21  ;;  %v2142_v28 = vmax.f32 %v2122_v22, 0.0 }
 0x20d   : > { %2164 = vst [vmem:[#allocation3 + $0x48] sm:$0xff] %v2142_v28 }
 0x224   : > { %v4259_v31 = vpop.f32.mrf.mxu0 }
 0x225   : > { %v2099_v32 = vmul.f32 %v4259_v31, %v5207_v41 }
 0x226   : > { %v2033_v34 = vpop.f32.mrf.mxu0 }
 0x227   : > { %v2125_v36 = vadd.f32 %v5214_v48, %v2099_v32  ;;  %v2098_v27 = vmul.f32 %v5207_v41, %v2033_v34 }
 0x229   : > { %v2145_v37 = vmax.f32 %v2125_v36, 0.0  ;;  %v2124_v7 = vadd.f32 %v5214_v48, %v2098_v27 }
 0x22b   : > { %2167 = vst [vmem:[#allocation3 + $0x60] sm:$0xff] %v2145_v37  ;;  %v2144_v40 = vmax.f32 %v2124_v7, 0.0 }
 0x22d   : > { %2166 = vst [vmem:[#allocation3 + $0x58] sm:$0xff] %v2144_v40 }
 0x244   : > { %v4262_v42 = vpop.f32.mrf.mxu0 }
 0x245   : > { %v2101_v43 = vmul.f32 %v4262_v42, %v5207_v41 }
 0x246   : > { %v2043_v44 = vpop.f32.mrf.mxu0 }
 0x247   : > { %v2127_v49 = vadd.f32 %v5214_v48, %v2101_v43  ;;  %v2100_v50 = vmul.f32 %v5207_v41, %v2043_v44 }
 0x249   : > { %v2147_v51 = vmax.f32 %v2127_v49, 0.0  ;;  %v2126_v47 = vadd.f32 %v5214_v48, %v2100_v50 }
 0x24b   : > { %2169 = vst [vmem:[#allocation3 + $0x70] sm:$0xff] %v2147_v51  ;;  %v2146_v54 = vmax.f32 %v2126_v47, 0.0 }
 0x24d   : > { %2168 = vst [vmem:[#allocation3 + $0x68] sm:$0xff] %v2146_v54 }
 0x264   : > { %v4265_v38 = vpop.f32.mrf.mxu0 }
 0x265   : > { %v2103_v55 = vmul.f32 %v4265_v38, %v5207_v41 }
 0x266   : > { %v2053_v56 = vpop.f32.mrf.mxu0 }
 0x267   : > { %v2129_v57 = vadd.f32 %v5214_v48, %v2103_v55  ;;  %v2102_v59 = vmul.f32 %v5207_v41, %v2053_v56 }
 0x269   : > { %v2149_v61 = vmax.f32 %v2129_v57, 0.0  ;;  %v2128_v62 = vadd.f32 %v5214_v48, %v2102_v59 }
 0x26b   : > { %2171 = vst [vmem:[#allocation3 + $0x80] sm:$0xff] %v2149_v61  ;;  %v2148_v0 = vmax.f32 %v2128_v62, 0.0 }
 0x26d   : > { %2170 = vst [vmem:[#allocation3 + $0x78] sm:$0xff] %v2148_v0 }
 0x285   : > { %v4268_v2 = vpop.f32.mrf.mxu0 }
 0x286   : > { %v2105_v45 = vmul.f32 %v4268_v2, %v5207_v41 }
 0x287   : > { %v2063_v3 = vpop.f32.mrf.mxu0 }
 0x288   : > { %v2131_v58 = vadd.f32 %v5214_v48, %v2105_v45  ;;  %v2104_v5 = vmul.f32 %v5207_v41, %v2063_v3 }
 0x28a   : > { %v2151_v33 = vmax.f32 %v2131_v58, 0.0  ;;  %v2130_v8 = vadd.f32 %v5214_v48, %v2104_v5 }
 0x28c   : > { %2173 = vst [vmem:[#allocation3 + $0x90] sm:$0xff] %v2151_v33  ;;  %v2150_v9 = vmax.f32 %v2130_v8, 0.0 }
 0x28e   : > { %2172 = vst [vmem:[#allocation3 + $0x88] sm:$0xff] %v2150_v9 }
 0x292   : > { %v4271_v10 = vpop.f32.mrf.mxu0 }
 0x293   : > { %v2107_v11 = vmul.f32 %v4271_v10, %v5207_v41 }
 0x294   : > { %v2073_v14 = vpop.f32.mrf.mxu0 }
 0x295   : > { %v2133_v1 = vadd.f32 %v5214_v48, %v2107_v11  ;;  %v2106_v15 = vmul.f32 %v5207_v41, %v2073_v14 }
 0x297   : > { %v2153_v16 = vmax.f32 %v2133_v1, 0.0  ;;  %v2132_v17 = vadd.f32 %v5214_v48, %v2106_v15  ;;  %2179 = sbr.rel (%p3789_p7) target bundleno = 670 (0x29e), region = 52 }
 0x299   : > { %2175 = vst [vmem:[#allocation3 + $0xa0] sm:$0xff] %v2153_v16  ;;  %v2152_v30 = vmax.f32 %v2132_v17, 0.0 }
 0x29b   : > { %2174 = vst [vmem:[#allocation3 + $0x98] sm:$0xff] %v2152_v30 }
 0x29c   : > { %v4430_v60 = vmov 0.0  }
 0x29d   : > { %2180 = vst [vmem:[#allocation3 + $0x8] sm:$0xff] %v4430_v60  ;;  %2181 = vst [vmem:[#allocation3 + $0x10] sm:$0xff] %v4430_v60 }
 0x29e PF: > { %p3790_p8 = scmp.ne.s32.totalorder %s4403_s24, 1 }
 0x2a0   : > { %2185 = sbr.rel (%p3790_p8) target bundleno = 679 (0x2a7), region = 56 }
 0x2a5   : > { %v4431_v18 = vmov 0.0  }
 0x2a6   : > { %2186 = vst [vmem:[#allocation3 + $0x98] sm:$0xff] %v4431_v18  ;;  %2187 = vst [vmem:[#allocation3 + $0xa0] sm:$0xff] %v4431_v18 }
 0x2a7 PF: > { %v2749_v41 = vld [vmem:[%s6282_s4 + $0xf8] sm:$0xff]  ;;  %v2748_v28 = vld [vmem:[%s6282_s4 + $0xf0] sm:$0xff]  ;;  %v2747_v34 = vld [vmem:[%s6282_s4 + $0xe8] sm:$0xff]  ;;  %vm6496_vm8 = vnez %v6328_v4  ;;  %vm6497_vm0 = vnez %v6330_v20  ;;  %vm6498_vm14 = vnez %v6332_v26  ;;  %vm6499_vm10 = vnez %v6334_v46 }
 0x2a8   : > { %v2781_v48 = vld [vmem:[%s6282_s4 + $0x1f8] sm:$0xff]  ;;  %3872 = vmatprep.subr.mxu1 %v2749_v41  ;;  %v2780_v29 = vld [vmem:[%s6282_s4 + $0x1f0] sm:$0xff]  ;;  %v2779_v36 = vld [vmem:[%s6282_s4 + $0x1e8] sm:$0xff]  ;;  %vm6500_vm7 = vnez %v6336_v53  ;;  %vm6501_vm13 = vnez %v6338_v23  ;;  %vm6502_vm15 = vnez %v6340_v35  ;;  %vm6503_vm12 = vnez %v6350_v6 }
 0x2a9   : > { %v2733_v21 = vld [vmem:[%s6282_s4 + $0x78] sm:$0xff]  ;;  %3952 = vmatprep.subr.mxu0 %v2781_v48  ;;  %v2732_v31 = vld [vmem:[%s6282_s4 + $0x70] sm:$0xff]  ;;  %v2731_v27 = vld [vmem:[%s6282_s4 + $0x68] sm:$0xff]  ;;  %vm6504_vm9 = vnez %v6356_v13 }
 0x2aa   : > { %v2765_v22 = vld [vmem:[%s6282_s4 + $0x178] sm:$0xff]  ;;  %3873 = vmatpush3.msra.mxu1 %v2733_v21  ;;  %v2764_v32 = vld [vmem:[%s6282_s4 + $0x170] sm:$0xff]  ;;  %v2763_v37 = vld [vmem:[%s6282_s4 + $0x168] sm:$0xff] }
 0x2ab   : > { %3953 = vmatpush3.msra.mxu0 %v2765_v22  ;;  %3874 = vmatprep.subr.mxu1 %v2748_v28  ;;  %v2746_v7 = vld [vmem:[%s6282_s4 + $0xe0] sm:$0xff]  ;;  %v2745_v44 = vld [vmem:[%s6282_s4 + $0xd8] sm:$0xff]  ;;  %v2744_v47 = vld [vmem:[%s6282_s4 + $0xd0] sm:$0xff] }
 0x2ac   : > { %3954 = vmatprep.subr.mxu0 %v2780_v29  ;;  %3875 = vmatpush3.msra.mxu1 %v2732_v31  ;;  %v2778_v40 = vld [vmem:[%s6282_s4 + $0x1e0] sm:$0xff]  ;;  %v2777_v49 = vld [vmem:[%s6282_s4 + $0x1d8] sm:$0xff]  ;;  %v2776_v54 = vld [vmem:[%s6282_s4 + $0x1d0] sm:$0xff] }
 0x2ad   : > { %3955 = vmatpush3.msra.mxu0 %v2764_v32  ;;  %3876 = vmatprep.subr.mxu1 %v2747_v34  ;;  %v2730_v42 = vld [vmem:[%s6282_s4 + $0x60] sm:$0xff]  ;;  %v2729_v50 = vld [vmem:[%s6282_s4 + $0x58] sm:$0xff]  ;;  %v2728_v38 = vld [vmem:[%s6282_s4 + $0x50] sm:$0xff] }
 0x2ae   : > { %3956 = vmatprep.subr.mxu0 %v2779_v36  ;;  %v2762_v43 = vld [vmem:[%s6282_s4 + $0x160] sm:$0xff]  ;;  %3877 = vmatpush3.msra.mxu1 %v2731_v27  ;;  %v2761_v51 = vld [vmem:[%s6282_s4 + $0x158] sm:$0xff]  ;;  %v2760_v55 = vld [vmem:[%s6282_s4 + $0x150] sm:$0xff] }
 0x2af   : > { %3957 = vmatpush3.msra.mxu0 %v2763_v37  ;;  %3878 = vmatprep.subr.mxu1 %v2746_v7  ;;  %v2743_v56 = vld [vmem:[%s6282_s4 + $0xc8] sm:$0xff]  ;;  %v2742_v62 = vld [vmem:[%s6282_s4 + $0xc0] sm:$0xff]  ;;  %v2741_v3 = vld [vmem:[%s6282_s4 + $0xb8] sm:$0xff] }
 0x2b0   : > { %3958 = vmatprep.subr.mxu0 %v2778_v40  ;;  %3879 = vmatpush3.msra.mxu1 %v2730_v42  ;;  %v2775_v57 = vld [vmem:[%s6282_s4 + $0x1c8] sm:$0xff]  ;;  %v2774_v0 = vld [vmem:[%s6282_s4 + $0x1c0] sm:$0xff]  ;;  %v2773_v58 = vld [vmem:[%s6282_s4 + $0x1b8] sm:$0xff] }
 0x2b1   : > { %3959 = vmatpush3.msra.mxu0 %v2762_v43  ;;  %3880 = vmatprep.subr.mxu1 %v2745_v44  ;;  %v2727_v59 = vld [vmem:[%s6282_s4 + $0x48] sm:$0xff]  ;;  %v2726_v2 = vld [vmem:[%s6282_s4 + $0x40] sm:$0xff]  ;;  %v2725_v5 = vld [vmem:[%s6282_s4 + $0x38] sm:$0xff] }
 0x2b2   : > { %3960 = vmatprep.subr.mxu0 %v2777_v49  ;;  %3881 = vmatpush3.msra.mxu1 %v2729_v50  ;;  %v2759_v61 = vld [vmem:[%s6282_s4 + $0x148] sm:$0xff]  ;;  %v2758_v45 = vld [vmem:[%s6282_s4 + $0x140] sm:$0xff]  ;;  %v2757_v33 = vld [vmem:[%s6282_s4 + $0x138] sm:$0xff] }
 0x2b3   : > { %3961 = vmatpush3.msra.mxu0 %v2761_v51  ;;  %3882 = vmatprep.subr.mxu1 %v2744_v47  ;;  %v2740_v8 = vld [vmem:[%s6282_s4 + $0xb0] sm:$0xff]  ;;  %v2739_v14 = vld [vmem:[%s6282_s4 + $0xa8] sm:$0xff]  ;;  %v2738_v17 = vld [vmem:[%s6282_s4 + $0xa0] sm:$0xff] }
 0x2b4   : > { %3962 = vmatprep.subr.mxu0 %v2776_v54  ;;  %3883 = vmatpush3.msra.mxu1 %v2728_v38  ;;  %v2772_v9 = vld [vmem:[%s6282_s4 + $0x1b0] sm:$0xff]  ;;  %v2771_v1 = vld [vmem:[%s6282_s4 + $0x1a8] sm:$0xff]  ;;  %v2770_v30 = vld [vmem:[%s6282_s4 + $0x1a0] sm:$0xff] }
 0x2b5   : > { %3963 = vmatpush3.msra.mxu0 %v2760_v55  ;;  %3884 = vmatprep.subr.mxu1 %v2743_v56  ;;  %v2724_v10 = vld [vmem:[%s6282_s4 + $0x30] sm:$0xff]  ;;  %v2723_v15 = vld [vmem:[%s6282_s4 + $0x28] sm:$0xff]  ;;  %v2722_v60 = vld [vmem:[%s6282_s4 + $0x20] sm:$0xff] }
 0x2b6   : > { %3964 = vmatprep.subr.mxu0 %v2775_v57  ;;  %3885 = vmatpush3.msra.mxu1 %v2727_v59  ;;  %v2756_v11 = vld [vmem:[%s6282_s4 + $0x130] sm:$0xff]  ;;  %v2755_v16 = vld [vmem:[%s6282_s4 + $0x128] sm:$0xff]  ;;  %v2754_v18 = vld [vmem:[%s6282_s4 + $0x120] sm:$0xff] }
 0x2b7   : > { %3965 = vmatpush3.msra.mxu0 %v2759_v61  ;;  %3886 = vmatprep.subr.mxu1 %v2742_v62  ;;  %v2737_v41 = vld [vmem:[%s6282_s4 + $0x98] sm:$0xff]  ;;  %v2736_v28 = vld [vmem:[%s6282_s4 + $0x90] sm:$0xff]  ;;  %v2735_v34 = vld [vmem:[%s6282_s4 + $0x88] sm:$0xff] }
 0x2b8   : > { %3966 = vmatprep.subr.mxu0 %v2774_v0  ;;  %3887 = vmatpush3.msra.mxu1 %v2726_v2  ;;  %v2769_v48 = vld [vmem:[%s6282_s4 + $0x198] sm:$0xff]  ;;  %v2768_v29 = vld [vmem:[%s6282_s4 + $0x190] sm:$0xff]  ;;  %v2767_v36 = vld [vmem:[%s6282_s4 + $0x188] sm:$0xff] }
 0x2b9   : > { %3967 = vmatpush3.msra.mxu0 %v2758_v45  ;;  %3888 = vmatprep.subr.mxu1 %v2741_v3  ;;  %v2721_v21 = vld [vmem:[%s6282_s4 + $0x18] sm:$0xff]  ;;  %v2720_v31 = vld [vmem:[%s6282_s4 + $0x10] sm:$0xff]  ;;  %v2719_v27 = vld [vmem:[%s6282_s4 + $0x8] sm:$0xff] }
 0x2ba   : > { %3968 = vmatprep.subr.mxu0 %v2773_v58  ;;  %3889 = vmatpush3.msra.mxu1 %v2725_v5  ;;  %v2753_v22 = vld [vmem:[%s6282_s4 + $0x118] sm:$0xff]  ;;  %v2752_v32 = vld [vmem:[%s6282_s4 + $0x110] sm:$0xff]  ;;  %v2751_v37 = vld [vmem:[%s6282_s4 + $0x108] sm:$0xff] }
 0x2bb   : > { %3969 = vmatpush3.msra.mxu0 %v2757_v33  ;;  %3890 = vmatprep.subr.mxu1 %v2740_v8  ;;  %v2734_v7 = vld [vmem:[%s6282_s4 + $0x80] sm:$0xff]  ;;  %v2238_v43 = vld [vmem:[#allocation3 + $0x8] sm:$0xff]  ;;  %v2318_v49 = vld [vmem:[#allocation3 + $0x17] sm:$0xff] }
 0x2bc   : > { %3970 = vmatprep.subr.mxu0 %v2772_v9  ;;  %3891 = vmatpush3.msra.mxu1 %v2724_v10  ;;  %v2766_v40 = vld [vmem:[%s6282_s4 + $0x180] sm:$0xff]  ;;  %v2270_v51 = vld [vmem:[#allocation3 + $0x9] sm:$0xff]  ;;  %v2813_v47 = vld [vmem:[%s6282_s4 + $0x2f8] sm:$0xff] }
 0x2bd   : > { %3971 = vmatpush3.msra.mxu0 %v2756_v11  ;;  %3892 = vmatprep.subr.mxu1 %v2739_v14  ;;  %v2718_v42 = vld [vmem:[%s6282_s4] sm:$0xff]  ;;  %v2239_v54 = vld [vmem:[#allocation3 + $0x10] sm:$0xff]  ;;  %v2797_v38 = vld [vmem:[%s6282_s4 + $0x278] sm:$0xff] }
 0x2be   : > { %3972 = vmatprep.subr.mxu0 %v2771_v1  ;;  %3893 = vmatpush3.msra.mxu1 %v2723_v15  ;;  %v2750_v44 = vld [vmem:[%s6282_s4 + $0x100] sm:$0xff]  ;;  %v2812_v56 = vld [vmem:[%s6282_s4 + $0x2f0] sm:$0xff]  ;;  %v2845_v61 = vld [vmem:[%s6282_s4 + $0x3f8] sm:$0xff] }
 0x2bf   : > { %3973 = vmatpush3.msra.mxu0 %v2755_v16  ;;  %3894 = vmatprep.subr.mxu1 %v2738_v17  ;;  %v2190_v50 = vld [vmem:[#allocation3 + $0x7] sm:$0xff]  ;;  %v2319_v55 = vld [vmem:[#allocation3 + $0x1f] sm:$0xff]  ;;  %v2191_v57 = vld [vmem:[#allocation3 + $0xf] sm:$0xff] }
 0x2c0   : > { %3974 = vmatprep.subr.mxu0 %v2770_v30  ;;  %3895 = vmatpush3.msra.mxu1 %v2722_v60  ;;  %v2271_v59 = vld [vmem:[#allocation3 + $0x11] sm:$0xff]  ;;  %v5512_v2 = vld [vmem:[#allocation3 + $0x27] sm:$0xff]  ;;  %v5526_v5 = vld [vmem:[#allocation3 + $0x19] sm:$0xff] }
 0x2c1   : > { %3975 = vmatpush3.msra.mxu0 %v2754_v18  ;;  %3896 = vmatprep.subr.mxu1 %v2737_v41  ;;  %v2796_v62 = vld [vmem:[%s6282_s4 + $0x270] sm:$0xff]  ;;  %v5510_v0 = vld [vmem:[#allocation3 + $0x18] sm:$0xff]  ;;  %v2811_v45 = vld [vmem:[%s6282_s4 + $0x2e8] sm:$0xff] }
 0x2c2   : > { %3976 = vmatprep.subr.mxu0 %v2769_v48  ;;  %3897 = vmatpush3.msra.mxu1 %v2721_v21  ;;  %v2795_v3 = vld [vmem:[%s6282_s4 + $0x268] sm:$0xff]  ;;  %v2829_v58 = vld [vmem:[%s6282_s4 + $0x378] sm:$0xff]  ;;  %v5531_v33 = vld [vmem:[#allocation3 + $0x20] sm:$0xff] }
 0x2c3   : > { %3977 = vmatpush3.msra.mxu0 %v2753_v22  ;;  %3898 = vmatprep.subr.mxu1 %v2736_v28  ;;  %v5533_v8 = vld [vmem:[#allocation3 + $0x2f] sm:$0xff]  ;;  %v2810_v9 = vld [vmem:[%s6282_s4 + $0x2e0] sm:$0xff]  ;;  %v5556_v16 = vld [vmem:[#allocation3 + $0x37] sm:$0xff] }
 0x2c4   : > { %3978 = vmatprep.subr.mxu0 %v2768_v29  ;;  %3899 = vmatpush3.msra.mxu1 %v2720_v31  ;;  %v2844_v10 = vld [vmem:[%s6282_s4 + $0x3f0] sm:$0xff]  ;;  %v2794_v11 = vld [vmem:[%s6282_s4 + $0x260] sm:$0xff]  ;;  %v5554_v15 = vld [vmem:[#allocation3 + $0x28] sm:$0xff] }
 0x2c5   : > { %3979 = vmatpush3.msra.mxu0 %v2752_v32  ;;  %3900 = vmatprep.subr.mxu1 %v2735_v34  ;;  %v2828_v14 = vld [vmem:[%s6282_s4 + $0x370] sm:$0xff]  ;;  %v5552_v1 = vld [vmem:[#allocation3 + $0x21] sm:$0xff]  ;;  %v2809_v17 = vld [vmem:[%s6282_s4 + $0x2d8] sm:$0xff] }
 0x2c6   : > { %3980 = vmatprep.subr.mxu0 %v2767_v36  ;;  %3901 = vmatpush3.msra.mxu1 %v2719_v27  ;;  %v2843_v30 = vld [vmem:[%s6282_s4 + $0x3e8] sm:$0xff]  ;;  %v2793_v60 = vld [vmem:[%s6282_s4 + $0x258] sm:$0xff]  ;;  %v5579_v48 = vld [vmem:[#allocation3 + $0x30] sm:$0xff] }
 0x2c7   : > { %3981 = vmatpush3.msra.mxu0 %v2751_v37  ;;  %3902 = vmatprep.subr.mxu1 %v2734_v7  ;;  %v2827_v18 = vld [vmem:[%s6282_s4 + $0x368] sm:$0xff]  ;;  %v5581_v21 = vld [vmem:[#allocation3 + $0x3f] sm:$0xff]  ;;  %v2808_v22 = vld [vmem:[%s6282_s4 + $0x2d0] sm:$0xff] }
 0x2c8   : > { %3982 = vmatprep.subr.mxu0 %v2766_v40  ;;  %3903 = vmatpush3.msra.mxu1 %v2718_v42  ;;  %v5577_v41 = vld [vmem:[#allocation3 + $0x29] sm:$0xff]  ;;  %v2842_v28 = vld [vmem:[%s6282_s4 + $0x3e0] sm:$0xff]  ;;  %v5601_v32 = vld [vmem:[#allocation3 + $0x31] sm:$0xff] }
 0x2c9   : > { %2926 = vmatprep.mubr.f32.mxu1 %v2238_v43  ;;  %3983 = vmatpush3.msra.mxu0 %v2750_v44  ;;  %v2792_v29 = vld [vmem:[%s6282_s4 + $0x250] sm:$0xff]  ;;  %v2826_v31 = vld [vmem:[%s6282_s4 + $0x360] sm:$0xff]  ;;  %v5603_v34 = vld [vmem:[#allocation3 + $0x38] sm:$0xff] }
 0x2ca   : > { %3803 = vmatprep.mubr.msk.f32.mxu0 %vm4563_vm3, %v2318_v49  ;;  %3795 = vmatmul.mubr.msk.f32.vlgmr.msra.gmra.mxu1 %vm4563_vm3, %v2190_v50  ;;  %v5605_v36 = vld [vmem:[#allocation3 + $0x47] sm:$0xff]  ;;  %v2841_v37 = vld [vmem:[%s6282_s4 + $0x3d8] sm:$0xff]  ;;  %v5631_v44 = vld [vmem:[#allocation3 + $0x4f] sm:$0xff] }
 0x2cb   : > { %3072 = vmatmul.mubr.f32.vlgmr.msra.gmra.mxu0 %v2270_v51  ;;  %4032 = vmatprep.subr.mxu1 %v2813_v47  ;;  %v2807_v27 = vld [vmem:[%s6282_s4 + $0x2c8] sm:$0xff]  ;;  %v2825_v40 = vld [vmem:[%s6282_s4 + $0x358] sm:$0xff]  ;;  %v5629_v43 = vld [vmem:[#allocation3 + $0x40] sm:$0xff] }
 0x2cc   : > { %2931 = vmatprep.mubr.f32.mxu1 %v2239_v54  ;;  %4033 = vmatpush3.msra.mxu1 %v2797_v38  ;;  %v2791_v7 = vld [vmem:[%s6282_s4 + $0x248] sm:$0xff]  ;;  %v5627_v42 = vld [vmem:[#allocation3 + $0x39] sm:$0xff]  ;;  %v2840_v50 = vld [vmem:[%s6282_s4 + $0x3d0] sm:$0xff] }
 0x2cd   : > { %3076 = vmatprep.mubr.f32.mxu0 %v2319_v55  ;;  %4034 = vmatprep.subr.mxu1 %v2812_v56  ;;  %v2790_v51 = vld [vmem:[%s6282_s4 + $0x240] sm:$0xff]  ;;  %v2824_v47 = vld [vmem:[%s6282_s4 + $0x350] sm:$0xff]  ;;  %v5653_v38 = vld [vmem:[#allocation3 + $0x48] sm:$0xff] }
 0x2ce   : > { %4112 = vmatprep.subr.mxu0 %v2845_v61  ;;  %2932 = vmatmul.mubr.f32.gmra.mxu1 %v2191_v57  ;;  %v5651_v54 = vld [vmem:[#allocation3 + $0x41] sm:$0xff]  ;;  %v2805_v56 = vld [vmem:[%s6282_s4 + $0x2b8] sm:$0xff]  ;;  %v2507_v53 = vld [vmem:[#allocation3 + $0x90] sm:$0xff] }
 0x2cf   : > { %3804 = vmatmul.mubr.msk.f32.gmra.mxu0 %vm4567_vm4, %v2271_v59  ;;  %4035 = vmatpush3.msra.mxu1 %v2796_v62  ;;  %v2839_v57 = vld [vmem:[%s6282_s4 + $0x3c8] sm:$0xff]  ;;  %v2789_v59 = vld [vmem:[%s6282_s4 + $0x238] sm:$0xff]  ;;  %v2858_v24 = vld [vmem:[%s6282_s4 + $0x460] sm:$0xff] }
 0x2d0   : > { %2936 = vmatprep.mubr.f32.mxu1 %v5510_v0  ;;  %3805 = vmatprep.mubr.msk.f32.mxu0 %vm4528_vm1, %v5512_v2  ;;  %v2823_v61 = vld [vmem:[%s6282_s4 + $0x348] sm:$0xff]  ;;  %v2861_v13 = vld [vmem:[%s6282_s4 + $0x478] sm:$0xff] }
 0x2d1   : > { %4036 = vmatprep.subr.mxu1 %v2811_v45  ;;  %4113 = vmatpush3.msra.mxu0 %v2829_v58  ;;  %v5677_v62 = vld [vmem:[#allocation3 + $0x49] sm:$0xff]  ;;  %v2853_v19 = vld [vmem:[%s6282_s4 + $0x438] sm:$0xff]  ;;  %v2541_v39 = vld [vmem:[#allocation3 + $0xa1] sm:$0xff] }
 0x2d2   : > { %4037 = vmatpush3.msra.mxu1 %v2795_v3  ;;  %4114 = vmatprep.subr.mxu0 %v2844_v10  ;;  %v5679_v45 = vld [vmem:[#allocation3 + $0x50] sm:$0xff]  ;;  %v5681_v3 = vld [vmem:[#allocation3 + $0x5f] sm:$0xff]  ;;  %v2855_v12 = vld [vmem:[%s6282_s4 + $0x448] sm:$0xff] }
 0x2d3   : > { %3796 = vmatmul.mubr.msk.f32.gmra.mxu1 %vm4528_vm1, %v2318_v49  ;;  %3082 = vmatmul.mubr.f32.gmra.mxu0 %v5526_v5  ;;  %v2806_v49 = vld [vmem:[%s6282_s4 + $0x2c0] sm:$0xff]  ;;  %v2804_v58 = vld [vmem:[%s6282_s4 + $0x2b0] sm:$0xff]  ;;  %v2851_v4 = vld [vmem:[%s6282_s4 + $0x428] sm:$0xff] }
 0x2d4   : > { %2941 = vmatprep.mubr.f32.mxu1 %v5531_v33  ;;  %3086 = vmatprep.mubr.f32.mxu0 %v5533_v8  ;;  %v2788_v10 = vld [vmem:[%s6282_s4 + $0x230] sm:$0xff]  ;;  %v2849_v26 = vld [vmem:[%s6282_s4 + $0x418] sm:$0xff] }
 0x2d5   : > { %4038 = vmatprep.subr.mxu1 %v2810_v9  ;;  %4115 = vmatpush3.msra.mxu0 %v2828_v14  ;;  %v2838_v9 = vld [vmem:[%s6282_s4 + $0x3c0] sm:$0xff]  ;;  %v5701_v14 = vld [vmem:[#allocation3 + $0x51] sm:$0xff] }
 0x2d6   : > { %4039 = vmatpush3.msra.mxu1 %v2794_v11  ;;  %4116 = vmatprep.subr.mxu0 %v2843_v30  ;;  %v2822_v11 = vld [vmem:[%s6282_s4 + $0x340] sm:$0xff]  ;;  %v2460_v35 = vld [vmem:[#allocation3 + $0x97] sm:$0xff] }
 0x2d7   : > { %2942 = vmatmul.mubr.f32.gmra.mxu1 %v2319_v55  ;;  %3806 = vmatmul.mubr.msk.f32.gmra.mxu0 %vm4608_vm5, %v5552_v1  ;;  %v5655_v55 = vld [vmem:[#allocation3 + $0x57] sm:$0xff]  ;;  %v5705_v30 = vld [vmem:[#allocation3 + $0x67] sm:$0xff] }
 0x2d8   : > { %2946 = vmatprep.mubr.f32.mxu1 %v5554_v15  ;;  %3807 = vmatprep.mubr.msk.f32.mxu0 %vm4542_vm2, %v5556_v16  ;;  %v2540_v25 = vld [vmem:[#allocation3 + $0x99] sm:$0xff] }
 0x2d9   : > { %4040 = vmatprep.subr.mxu1 %v2809_v17  ;;  %4117 = vmatpush3.msra.mxu0 %v2827_v18  ;;  %v5703_v17 = vld [vmem:[#allocation3 + $0x58] sm:$0xff] }
 0x2da   : > { %4041 = vmatpush3.msra.mxu1 %v2793_v60  ;;  %4118 = vmatprep.subr.mxu0 %v2842_v28  ;;  %v2803_v60 = vld [vmem:[%s6282_s4 + $0x2a8] sm:$0xff]  ;;  %v2837_v18 = vld [vmem:[%s6282_s4 + $0x3b8] sm:$0xff] }
 0x2db   : > { %3797 = vmatmul.mubr.msk.f32.gmra.mxu1 %vm4542_vm2, %v5512_v2  ;;  %3092 = vmatmul.mubr.f32.gmra.mxu0 %v5577_v41  ;;  %v2821_v28 = vld [vmem:[%s6282_s4 + $0x338] sm:$0xff] }
 0x2dc   : > { %2951 = vmatprep.mubr.f32.mxu1 %v5579_v48  ;;  %3096 = vmatprep.mubr.f32.mxu0 %v5581_v21 }
 0x2dd   : > { %4042 = vmatprep.subr.mxu1 %v2808_v22  ;;  %4119 = vmatpush3.msra.mxu0 %v2826_v31  ;;  %v2787_v22 = vld [vmem:[%s6282_s4 + $0x228] sm:$0xff]  ;;  %v5729_v31 = vld [vmem:[#allocation3 + $0x60] sm:$0xff] }
 0x2de   : > { %4043 = vmatpush3.msra.mxu1 %v2792_v29  ;;  %4120 = vmatprep.subr.mxu0 %v2841_v37  ;;  %v5727_v29 = vld [vmem:[#allocation3 + $0x59] sm:$0xff] }
 0x2df   : > { %2952 = vmatmul.mubr.f32.gmra.mxu1 %v5533_v8  ;;  %3808 = vmatmul.mubr.msk.f32.gmra.mxu0 %vm4684_vm6, %v5601_v32  ;;  %v2802_v37 = vld [vmem:[%s6282_s4 + $0x2a0] sm:$0xff] }
 0x2e0   : > { %2956 = vmatprep.mubr.f32.mxu1 %v5603_v34  ;;  %3809 = vmatprep.mubr.msk.f32.mxu0 %vm6496_vm8, %v5605_v36 }
 0x2e1   : > { %4044 = vmatprep.subr.mxu1 %v2807_v27  ;;  %4121 = vmatpush3.msra.mxu0 %v2825_v40  ;;  %v5731_v27 = vld [vmem:[#allocation3 + $0x6f] sm:$0xff]  ;;  %v2786_v40 = vld [vmem:[%s6282_s4 + $0x220] sm:$0xff] }
 0x2e2   : > { %4045 = vmatpush3.msra.mxu1 %v2791_v7  ;;  %4122 = vmatprep.subr.mxu0 %v2840_v50  ;;  %v2836_v7 = vld [vmem:[%s6282_s4 + $0x3b0] sm:$0xff]  ;;  %v5751_v50 = vld [vmem:[#allocation3 + $0x61] sm:$0xff] }
 0x2e3   : > { %3798 = vmatmul.mubr.msk.f32.gmra.mxu1 %vm6496_vm8, %v5556_v16  ;;  %3102 = vmatmul.mubr.f32.gmra.mxu0 %v5627_v42 }
 0x2e4   : > { %2961 = vmatprep.mubr.f32.mxu1 %v5629_v43  ;;  %3106 = vmatprep.mubr.f32.mxu0 %v5631_v44 }
 0x2e5   : > { %4046 = vmatprep.subr.mxu1 %v2806_v49  ;;  %4123 = vmatpush3.msra.mxu0 %v2824_v47  ;;  %v2820_v49 = vld [vmem:[%s6282_s4 + $0x330] sm:$0xff] }
 0x2e6   : > { %4047 = vmatpush3.msra.mxu1 %v2790_v51  ;;  %4124 = vmatprep.subr.mxu0 %v2839_v57  ;;  %v5753_v51 = vld [vmem:[#allocation3 + $0x68] sm:$0xff]  ;;  %v5755_v47 = vld [vmem:[#allocation3 + $0x77] sm:$0xff] }
 0x2e7   : > { %2962 = vmatmul.mubr.f32.gmra.mxu1 %v5581_v21  ;;  %3810 = vmatmul.mubr.msk.f32.gmra.mxu0 %vm6497_vm0, %v5651_v54  ;;  %v2835_v57 = vld [vmem:[%s6282_s4 + $0x3a8] sm:$0xff] }
 0x2e8   : > { %2966 = vmatprep.mubr.f32.mxu1 %v5653_v38  ;;  %3811 = vmatprep.mubr.msk.f32.mxu0 %vm6498_vm14, %v5655_v55 }
 0x2e9   : > { %4048 = vmatprep.subr.mxu1 %v2805_v56  ;;  %4125 = vmatpush3.msra.mxu0 %v2823_v61  ;;  %v2801_v56 = vld [vmem:[%s6282_s4 + $0x298] sm:$0xff]  ;;  %v2819_v61 = vld [vmem:[%s6282_s4 + $0x328] sm:$0xff] }
 0x2ea   : > { %4049 = vmatpush3.msra.mxu1 %v2789_v59  ;;  %4126 = vmatprep.subr.mxu0 %v2838_v9  ;;  %v2785_v59 = vld [vmem:[%s6282_s4 + $0x218] sm:$0xff]  ;;  %v5779_v9 = vld [vmem:[#allocation3 + $0x70] sm:$0xff] }
 0x2eb   : > { %3799 = vmatmul.mubr.msk.f32.gmra.mxu1 %vm6498_vm14, %v5605_v36  ;;  %3112 = vmatmul.mubr.f32.gmra.mxu0 %v5677_v62 }
 0x2ec   : > { %2971 = vmatprep.mubr.f32.mxu1 %v5679_v45  ;;  %3116 = vmatprep.mubr.f32.mxu0 %v5681_v3 }
 0x2ed   : > { %4050 = vmatprep.subr.mxu1 %v2804_v58  ;;  %4127 = vmatpush3.msra.mxu0 %v2822_v11  ;;  %v5777_v58 = vld [vmem:[#allocation3 + $0x69] sm:$0xff] }
 0x2ee   : > { %4051 = vmatpush3.msra.mxu1 %v2788_v10  ;;  %4128 = vmatprep.subr.mxu0 %v2837_v18  ;;  %v5781_v10 = vld [vmem:[#allocation3 + $0x7f] sm:$0xff]  ;;  %v2800_v11 = vld [vmem:[%s6282_s4 + $0x290] sm:$0xff] }
 0x2ef   : > { %2972 = vmatmul.mubr.f32.gmra.mxu1 %v5631_v44  ;;  %3812 = vmatmul.mubr.msk.f32.gmra.mxu0 %vm6499_vm10, %v5701_v14  ;;  %v2784_v18 = vld [vmem:[%s6282_s4 + $0x210] sm:$0xff] }
 0x2f0   : > { %2976 = vmatprep.mubr.f32.mxu1 %v5703_v17  ;;  %3813 = vmatprep.mubr.msk.f32.mxu0 %vm6500_vm7, %v5705_v30 }
 0x2f1   : > { %4052 = vmatprep.subr.mxu1 %v2803_v60  ;;  %4129 = vmatpush3.msra.mxu0 %v2821_v28  ;;  %v2834_v60 = vld [vmem:[%s6282_s4 + $0x3a0] sm:$0xff]  ;;  %v5801_v28 = vld [vmem:[#allocation3 + $0x71] sm:$0xff] }
 0x2f2   : > { %4053 = vmatpush3.msra.mxu1 %v2787_v22  ;;  %4130 = vmatprep.subr.mxu0 %v2836_v7  ;;  %v2818_v22 = vld [vmem:[%s6282_s4 + $0x320] sm:$0xff] }
 0x2f3   : > { %3800 = vmatmul.mubr.msk.f32.gmra.mxu1 %vm6500_vm7, %v5655_v55  ;;  %3122 = vmatmul.mubr.f32.gmra.mxu0 %v5727_v29  ;;  %v5805_v7 = vld [vmem:[#allocation3 + $0x87] sm:$0xff] }
 0x2f4   : > { %2981 = vmatprep.mubr.f32.mxu1 %v5729_v31  ;;  %3126 = vmatprep.mubr.f32.mxu0 %v5731_v27 }
 0x2f5   : > { %4054 = vmatprep.subr.mxu1 %v2802_v37  ;;  %4131 = vmatpush3.msra.mxu0 %v2820_v49  ;;  %v5803_v37 = vld [vmem:[#allocation3 + $0x78] sm:$0xff] }
 0x2f6   : > { %4055 = vmatpush3.msra.mxu1 %v2786_v40  ;;  %4132 = vmatprep.subr.mxu0 %v2835_v57  ;;  %v2799_v40 = vld [vmem:[%s6282_s4 + $0x288] sm:$0xff]  ;;  %v2833_v49 = vld [vmem:[%s6282_s4 + $0x398] sm:$0xff] }
 0x2f7   : > { %2982 = vmatmul.mubr.f32.gmra.mxu1 %v5681_v3  ;;  %3814 = vmatmul.mubr.msk.f32.gmra.mxu0 %vm6501_vm13, %v5751_v50  ;;  %v2817_v57 = vld [vmem:[%s6282_s4 + $0x318] sm:$0xff] }
 0x2f8   : > { %2986 = vmatprep.mubr.f32.mxu1 %v5753_v51  ;;  %3815 = vmatprep.mubr.msk.f32.mxu0 %vm6502_vm15, %v5755_v47 }
 0x2f9   : > { %4056 = vmatprep.subr.mxu1 %v2801_v56  ;;  %4133 = vmatpush3.msra.mxu0 %v2819_v61  ;;  %v2783_v56 = vld [vmem:[%s6282_s4 + $0x208] sm:$0xff]  ;;  %v5829_v61 = vld [vmem:[#allocation3 + $0x80] sm:$0xff] }
 0x2fa   : > { %4057 = vmatpush3.msra.mxu1 %v2785_v59  ;;  %4134 = vmatprep.subr.mxu0 %v2834_v60  ;;  %v5827_v59 = vld [vmem:[#allocation3 + $0x79] sm:$0xff] }
 0x2fb   : > { %3801 = vmatmul.mubr.msk.f32.gmra.mxu1 %vm6502_vm15, %v5705_v30  ;;  %3132 = vmatmul.mubr.f32.gmra.mxu0 %v5777_v58  ;;  %v2798_v60 = vld [vmem:[%s6282_s4 + $0x280] sm:$0xff] }
 0x2fc   : > { %2991 = vmatprep.mubr.f32.mxu1 %v5779_v9  ;;  %3136 = vmatprep.mubr.f32.mxu0 %v5781_v10 }
 0x2fd   : > { %4058 = vmatprep.subr.mxu1 %v2800_v11  ;;  %4135 = vmatpush3.msra.mxu0 %v2818_v22  ;;  %v5831_v11 = vld [vmem:[#allocation3 + $0x8f] sm:$0xff]  ;;  %v2782_v22 = vld [vmem:[%s6282_s4 + $0x200] sm:$0xff] }
 0x2fe   : > { %4059 = vmatpush3.msra.mxu1 %v2784_v18  ;;  %4136 = vmatprep.subr.mxu0 %v2833_v49  ;;  %v2832_v18 = vld [vmem:[%s6282_s4 + $0x390] sm:$0xff]  ;;  %v5851_v49 = vld [vmem:[#allocation3 + $0x81] sm:$0xff] }
 0x2ff   : > { %2992 = vmatmul.mubr.f32.gmra.mxu1 %v5731_v27  ;;  %3816 = vmatmul.mubr.msk.f32.gmra.mxu0 %vm6503_vm12, %v5801_v28 }
 0x300   : > { %2996 = vmatprep.mubr.f32.mxu1 %v5803_v37  ;;  %3817 = vmatprep.mubr.msk.f32.mxu0 %vm6504_vm9, %v5805_v7 }
 0x301   : > { %4060 = vmatprep.subr.mxu1 %v2799_v40  ;;  %4137 = vmatpush3.msra.mxu0 %v2817_v57  ;;  %v2816_v40 = vld [vmem:[%s6282_s4 + $0x310] sm:$0xff]  ;;  %v2815_v57 = vld [vmem:[%s6282_s4 + $0x308] sm:$0xff] }
 0x302   : > { %4061 = vmatpush3.msra.mxu1 %v2783_v56  ;;  %4138 = vmatprep.subr.mxu0 %v2832_v18  ;;  %v2831_v56 = vld [vmem:[%s6282_s4 + $0x388] sm:$0xff]  ;;  %v2814_v18 = vld [vmem:[%s6282_s4 + $0x300] sm:$0xff] }
 0x303   : > { %3802 = vmatmul.mubr.msk.f32.gmra.mxu1 %vm6504_vm9, %v5755_v47  ;;  %3142 = vmatmul.mubr.f32.gmra.mxu0 %v5827_v59 }
 0x304   : > { %3001 = vmatprep.mubr.f32.mxu1 %v5829_v61  ;;  %3146 = vmatprep.mubr.f32.mxu0 %v5831_v11 }
 0x305   : > { %4062 = vmatprep.subr.mxu1 %v2798_v60  ;;  %4139 = vmatpush3.msra.mxu0 %v2816_v40  ;;  %v2830_v60 = vld [vmem:[%s6282_s4 + $0x380] sm:$0xff] }
 0x306   : > { %4063 = vmatpush3.msra.mxu1 %v2782_v22  ;;  %4140 = vmatprep.subr.mxu0 %v2831_v56  ;;  %v2860_v22 = vld [vmem:[%s6282_s4 + $0x470] sm:$0xff] }
 0x307   : > { %3002 = vmatmul.mubr.f32.gmra.mxu1 %v5781_v10  ;;  %3818 = vmatmul.mubr.msk.f32.gmra.mxu0 %vm4983_vm11, %v5851_v49 }
 0x308   : > { %3216 = vmatprep.mubr.f32.mxu1 %v5526_v5  ;;  %4141 = vmatpush3.msra.mxu0 %v2815_v57  ;;  %v2859_v5 = vld [vmem:[%s6282_s4 + $0x468] sm:$0xff] }
 0x309   : > { %4272 = vmatprep.subr.mxu1 %v2861_v13  ;;  %4142 = vmatprep.subr.mxu0 %v2830_v60 }
 0x30a   : > { %3361 = vmatprep.mubr.f32.mxu0 %v5554_v15  ;;  %4143 = vmatpush3.msra.mxu0 %v2814_v18 }
 0x30b   : > { %3217 = vmatmul.mubr.f32.vlgmr.msra.gmra.mxu1 %v5510_v0  ;;  %3827 = vmatmul.mubr.msk.f32.vlgmr.msra.gmra.mxu0 %vm4563_vm3, %v5512_v2  ;;  %v2856_v0 = vld [vmem:[%s6282_s4 + $0x450] sm:$0xff]  ;;  %v2854_v2 = vld [vmem:[%s6282_s4 + $0x440] sm:$0xff] }
 0x30c   : > { %4273 = vmatpush3.msra.mxu1 %v2861_v13  ;;  %3819 = vmatprep.mubr.msk.f32.mxu1 %vm4567_vm4, %v5552_v1  ;;  %v2857_v13 = vld [vmem:[%s6282_s4 + $0x458] sm:$0xff]  ;;  %v2506_v1 = vld [vmem:[#allocation3 + $0x88] sm:$0xff] }
 0x30d   : > { %4274 = vmatprep.subr.mxu1 %v2860_v22  ;;  %3366 = vmatprep.mubr.f32.mxu0 %v5579_v48 }
 0x30e   : > { %4275 = vmatpush3.msra.mxu1 %v2860_v22 }
 0x30f   : > { %3222 = vmatmul.mubr.f32.gmra.mxu1 %v5531_v33  ;;  %4276 = vmatprep.subr.mxu1 %v2859_v5  ;;  %v2852_v33 = vld [vmem:[%s6282_s4 + $0x430] sm:$0xff] }
 0x310   : > { %3367 = vmatmul.mubr.f32.gmra.mxu0 %v5533_v8  ;;  %3226 = vmatprep.mubr.f32.mxu1 %v5577_v41  ;;  %v2850_v8 = vld [vmem:[%s6282_s4 + $0x420] sm:$0xff] }
 0x311   : > { %3371 = vmatprep.mubr.f32.mxu0 %v5603_v34  ;;  %4277 = vmatpush3.msra.mxu1 %v2859_v5 }
 0x312   : > { %4278 = vmatprep.subr.mxu1 %v2858_v24 }
 0x313   : > { %3227 = vmatmul.mubr.f32.gmra.mxu1 %v5554_v15  ;;  %v2848_v15 = vld [vmem:[%s6282_s4 + $0x410] sm:$0xff] }
 0x314   : > { %3828 = vmatmul.mubr.msk.f32.gmra.mxu0 %vm4528_vm1, %v5556_v16  ;;  %3820 = vmatprep.mubr.msk.f32.mxu1 %vm4608_vm5, %v5601_v32  ;;  %v2847_v16 = vld [vmem:[%s6282_s4 + $0x408] sm:$0xff] }
 0x315   : > { %3376 = vmatprep.mubr.f32.mxu0 %v5629_v43  ;;  %4279 = vmatpush3.msra.mxu1 %v2858_v24 }
 0x316   : > { %4280 = vmatprep.subr.mxu1 %v2857_v13 }
 0x317   : > { %3232 = vmatmul.mubr.f32.gmra.mxu1 %v5579_v48  ;;  %v2412_v48 = vld [vmem:[#allocation3 + $0x89] sm:$0xff] }
 0x318   : > { %3377 = vmatmul.mubr.f32.gmra.mxu0 %v5581_v21  ;;  %3236 = vmatprep.mubr.f32.mxu1 %v5627_v42  ;;  %v2508_v21 = vld [vmem:[#allocation3 + $0x98] sm:$0xff] }
 0x319   : > { %3381 = vmatprep.mubr.f32.mxu0 %v5653_v38  ;;  %4281 = vmatpush3.msra.mxu1 %v2857_v13 }
 0x31a   : > { %4282 = vmatprep.subr.mxu1 %v2856_v0 }
 0x31b   : > { %3237 = vmatmul.mubr.f32.gmra.mxu1 %v5603_v34  ;;  %v2846_v34 = vld [vmem:[%s6282_s4 + $0x400] sm:$0xff] }
 0x31c   : > { %3829 = vmatmul.mubr.msk.f32.gmra.mxu0 %vm4542_vm2, %v5605_v36  ;;  %3821 = vmatprep.mubr.msk.f32.mxu1 %vm4684_vm6, %v5651_v54  ;;  %v2413_v36 = vld [vmem:[#allocation3 + $0x91] sm:$0xff] }
 0x31d   : > { %3386 = vmatprep.mubr.f32.mxu0 %v5679_v45  ;;  %4283 = vmatpush3.msra.mxu1 %v2856_v0 }
 0x31e   : > { %4284 = vmatprep.subr.mxu1 %v2855_v12 }
 0x31f   : > { %3242 = vmatmul.mubr.f32.gmra.mxu1 %v5629_v43  ;;  %v2509_v43 = vld [vmem:[#allocation3 + $0xa0] sm:$0xff] }
 0x320   : > { %3387 = vmatmul.mubr.f32.gmra.mxu0 %v5631_v44  ;;  %3246 = vmatprep.mubr.f32.mxu1 %v5677_v62 }
 0x321   : > { %3391 = vmatprep.mubr.f32.mxu0 %v5703_v17  ;;  %4285 = vmatpush3.msra.mxu1 %v2855_v12 }
 0x322   : > { %4286 = vmatprep.subr.mxu1 %v2854_v2 }
 0x323   : > { %3247 = vmatmul.mubr.f32.gmra.mxu1 %v5653_v38  ;;  %v2461_v38 = vld [vmem:[#allocation3 + $0x9f] sm:$0xff] }
 0x324   : > { %3830 = vmatmul.mubr.msk.f32.gmra.mxu0 %vm6496_vm8, %v5655_v55  ;;  %3822 = vmatprep.mubr.msk.f32.mxu1 %vm6497_vm0, %v5701_v14 }
 0x325   : > { %3396 = vmatprep.mubr.f32.mxu0 %v5729_v31  ;;  %4287 = vmatpush3.msra.mxu1 %v2854_v2 }
 0x326   : > { %4288 = vmatprep.subr.mxu1 %v2853_v19 }
 0x327   : > { %3252 = vmatmul.mubr.f32.gmra.mxu1 %v5679_v45 }
 0x328   : > { %3397 = vmatmul.mubr.f32.gmra.mxu0 %v5681_v3  ;;  %3256 = vmatprep.mubr.f32.mxu1 %v5727_v29 }
 0x329   : > { %3401 = vmatprep.mubr.f32.mxu0 %v5753_v51  ;;  %4289 = vmatpush3.msra.mxu1 %v2853_v19 }
 0x32a   : > { %4290 = vmatprep.subr.mxu1 %v2852_v33 }
 0x32b   : > { %3257 = vmatmul.mubr.f32.gmra.mxu1 %v5703_v17 }
 0x32c   : > { %3831 = vmatmul.mubr.msk.f32.gmra.mxu0 %vm6498_vm14, %v5705_v30  ;;  %3823 = vmatprep.mubr.msk.f32.mxu1 %vm6499_vm10, %v5751_v50 }
 0x32d   : > { %3406 = vmatprep.mubr.f32.mxu0 %v5779_v9  ;;  %4291 = vmatpush3.msra.mxu1 %v2852_v33 }
 0x32e   : > { %4292 = vmatprep.subr.mxu1 %v2851_v4 }
 0x32f   : > { %3262 = vmatmul.mubr.f32.gmra.mxu1 %v5729_v31 }
 0x330   : > { %3407 = vmatmul.mubr.f32.gmra.mxu0 %v5731_v27  ;;  %3266 = vmatprep.mubr.f32.mxu1 %v5777_v58 }
 0x331   : > { %3411 = vmatprep.mubr.f32.mxu0 %v5803_v37  ;;  %4293 = vmatpush3.msra.mxu1 %v2851_v4 }
 0x332   : > { %4294 = vmatprep.subr.mxu1 %v2850_v8 }
 0x333   : > { %3267 = vmatmul.mubr.f32.gmra.mxu1 %v5753_v51 }
 0x334   : > { %3832 = vmatmul.mubr.msk.f32.gmra.mxu0 %vm6500_vm7, %v5755_v47  ;;  %3824 = vmatprep.mubr.msk.f32.mxu1 %vm6501_vm13, %v5801_v28 }
 0x335   : > { %3416 = vmatprep.mubr.f32.mxu0 %v5829_v61  ;;  %4295 = vmatpush3.msra.mxu1 %v2850_v8 }
 0x336   : > { %4296 = vmatprep.subr.mxu1 %v2849_v26 }
 0x337   : > { %3272 = vmatmul.mubr.f32.gmra.mxu1 %v5779_v9 }
 0x338   : > { %3417 = vmatmul.mubr.f32.gmra.mxu0 %v5781_v10  ;;  %3276 = vmatprep.mubr.f32.mxu1 %v5827_v59 }
 0x339   : > { %3421 = vmatprep.mubr.f32.mxu0 %v2506_v1  ;;  %4297 = vmatpush3.msra.mxu1 %v2849_v26 }
 0x33a   : > { %4298 = vmatprep.subr.mxu1 %v2848_v15 }
 0x33b   : > { %3277 = vmatmul.mubr.f32.gmra.mxu1 %v5803_v37 }
 0x33c   : > { %3833 = vmatmul.mubr.msk.f32.gmra.mxu0 %vm6502_vm15, %v5805_v7  ;;  %3825 = vmatprep.mubr.msk.f32.mxu1 %vm6503_vm12, %v5851_v49 }
 0x33d   : > { %3426 = vmatprep.mubr.f32.mxu0 %v2507_v53  ;;  %4299 = vmatpush3.msra.mxu1 %v2848_v15 }
 0x33e   : > { %4300 = vmatprep.subr.mxu1 %v2847_v16 }
 0x33f   : > { %3282 = vmatmul.mubr.f32.gmra.mxu1 %v5829_v61 }
 0x340   : > { %3427 = vmatmul.mubr.f32.gmra.mxu0 %v5831_v11  ;;  %3286 = vmatprep.mubr.f32.mxu1 %v2412_v48 }
 0x341   : > { %3431 = vmatprep.mubr.f32.mxu0 %v2508_v21  ;;  %4301 = vmatpush3.msra.mxu1 %v2847_v16 }
 0x342   : > { %4302 = vmatprep.subr.mxu1 %v2846_v34 }
 0x343   : > { %3287 = vmatmul.mubr.f32.gmra.mxu1 %v2506_v1 }
 0x344   : > { %3834 = vmatmul.mubr.msk.f32.gmra.mxu0 %vm6504_vm9, %v2460_v35  ;;  %3826 = vmatprep.mubr.msk.f32.mxu1 %vm4983_vm11, %v2413_v36 }
 0x345   : > { %3436 = vmatprep.mubr.f32.mxu0 %v2509_v43  ;;  %4303 = vmatpush3.msra.mxu1 %v2846_v34 }
 0x347   : > { %3292 = vmatmul.mubr.f32.gmra.mxu1 %v2507_v53 }
 0x348   : > { %3437 = vmatmul.mubr.f32.gmra.mxu0 %v2461_v38  ;;  %4304 = vmatprep.mubr.f32.mxu1 %v5577_v41 }
 0x34b   : > { %4305 = vmatmul.mubr.msk.f32.vlgmr.msra.gmra.mxu1 %vm4567_vm4, %v5601_v32 }
 0x34c   : > { %4307 = vmatprep.mubr.f32.mxu1 %v5627_v42 }
 0x34f   : > { %4308 = vmatmul.mubr.msk.f32.gmra.mxu1 %vm4608_vm5, %v5651_v54 }
 0x350   : > { %4310 = vmatprep.mubr.f32.mxu1 %v5677_v62 }
 0x353   : > { %4311 = vmatmul.mubr.msk.f32.gmra.mxu1 %vm4684_vm6, %v5701_v14 }
 0x354   : > { %4313 = vmatprep.mubr.f32.mxu1 %v5727_v29 }
 0x357   : > { %4314 = vmatmul.mubr.msk.f32.gmra.mxu1 %vm6497_vm0, %v5751_v50 }
 0x358   : > { %4316 = vmatprep.mubr.f32.mxu1 %v5777_v58 }
 0x35b   : > { %4317 = vmatmul.mubr.msk.f32.gmra.mxu1 %vm6499_vm10, %v5801_v28 }
 0x35c   : > { %4319 = vmatprep.mubr.f32.mxu1 %v5827_v59 }
 0x35f   : > { %4320 = vmatmul.mubr.msk.f32.gmra.mxu1 %vm6501_vm13, %v5851_v49 }
 0x360   : > { %4322 = vmatprep.mubr.f32.mxu1 %v2412_v48 }
 0x363   : > { %4323 = vmatmul.mubr.msk.f32.gmra.mxu1 %vm6503_vm12, %v2413_v36 }
 0x364   : > { %4325 = vmatprep.mubr.f32.mxu1 %v2540_v25 }
 0x367   : > { %4326 = vmatmul.mubr.msk.f32.gmra.mxu1 %vm4983_vm11, %v2541_v39 }
 0x38a   : > { %v3904_v63 = vpop.f32.mrf.mxu1 }
 0x38b   : > { %v3984_v20 = vpop.f32.mrf.mxu0 }
 0x38c   : > { %v3905_v46 = vpop.f32.mrf.mxu1 }
 0x38d   : > { %v3985_v41 = vpop.f32.mrf.mxu0  ;;  %v3906_v32 = vadd.f32 %v3905_v46, %v3904_v63 }
 0x38e   : > { %v3986_v42 = vadd.f32 %v3985_v41, %v3984_v20  ;;  %v3907_v54 = vpop.f32.mrf.mxu1 }
 0x38f   : > { %v3987_v55 = vpop.f32.mrf.mxu0 }
 0x390   : > { %v6031_v23 = vadd.f32 %v3986_v42, %v3906_v32  ;;  %v3908_v62 = vpop.f32.mrf.mxu1 }
 0x391   : > { %v3988_v45 = vpop.f32.mrf.mxu0  ;;  %v3909_v3 = vadd.f32 %v3908_v62, %v3907_v54 }
 0x392   : > { %v3989_v6 = vadd.f32 %v3988_v45, %v3987_v55 }
 0x393   : > { %v3910_v14 = vpop.f32.mrf.mxu1  ;;  %v3990_v17 = vpop.f32.mrf.mxu0 }
 0x394   : > { %v6033_v30 = vadd.f32 %v3989_v6, %v3909_v3 }
 0x395   : > { %v3911_v52 = vpop.f32.mrf.mxu1  ;;  %v3991_v29 = vpop.f32.mrf.mxu0 }
 0x396   : > { %v3912_v31 = vadd.f32 %v3911_v52, %v3910_v14  ;;  %v3992_v27 = vadd.f32 %v3991_v29, %v3990_v17 }
 0x397   : > { %v3913_v50 = vpop.f32.mrf.mxu1  ;;  %v3993_v51 = vpop.f32.mrf.mxu0 }
 0x398   : > { %v6035_v47 = vadd.f32 %v3992_v27, %v3912_v31 }
 0x399   : > { %v3914_v58 = vpop.f32.mrf.mxu1  ;;  %v3994_v9 = vpop.f32.mrf.mxu0 }
 0x39a   : > { %v3915_v10 = vadd.f32 %v3914_v58, %v3913_v50  ;;  %v3995_v28 = vadd.f32 %v3994_v9, %v3993_v51 }
 0x39b   : > { %v3916_v37 = vpop.f32.mrf.mxu1  ;;  %v3996_v7 = vpop.f32.mrf.mxu0 }
 0x39c   : > { %v6037_v59 = vadd.f32 %v3995_v28, %v3915_v10 }
 0x39d   : > { %v3917_v61 = vpop.f32.mrf.mxu1  ;;  %v3997_v11 = vpop.f32.mrf.mxu0 }
 0x39e   : > { %v3918_v40 = vadd.f32 %v3917_v61, %v3916_v37  ;;  %v3998_v49 = vadd.f32 %v3997_v11, %v3996_v7 }
 0x39f   : > { %v3919_v56 = vpop.f32.mrf.mxu1  ;;  %v3999_v57 = vpop.f32.mrf.mxu0 }
 0x3a0   : > { %v6039_v60 = vadd.f32 %v3998_v49, %v3918_v40 }
 0x3a1   : > { %v3920_v18 = vpop.f32.mrf.mxu1  ;;  %v4000_v22 = vpop.f32.mrf.mxu0 }
 0x3a2   : > { %v3921_v5 = vadd.f32 %v3920_v18, %v3919_v56  ;;  %v4001_v24 = vadd.f32 %v4000_v22, %v3999_v57 }
 0x3a3   : > { %v3922_v13 = vpop.f32.mrf.mxu1  ;;  %v4002_v0 = vpop.f32.mrf.mxu0 }
 0x3a4   : > { %v6041_v12 = vadd.f32 %v4001_v24, %v3921_v5 }
 0x3a5   : > { %v3923_v2 = vpop.f32.mrf.mxu1  ;;  %v4003_v19 = vpop.f32.mrf.mxu0 }
 0x3a6   : > { %v3924_v33 = vadd.f32 %v3923_v2, %v3922_v13  ;;  %v4004_v4 = vadd.f32 %v4003_v19, %v4002_v0 }
 0x3a7   : > { %v3925_v8 = vpop.f32.mrf.mxu1  ;;  %v4005_v26 = vpop.f32.mrf.mxu0 }
 0x3a8   : > { %v6043_v1 = vadd.f32 %v4004_v4, %v3924_v33 }
 0x3a9   : > { %v3926_v15 = vpop.f32.mrf.mxu1  ;;  %v4006_v53 = vpop.f32.mrf.mxu0 }
 0x3aa   : > { %v3927_v16 = vadd.f32 %v3926_v15, %v3925_v8  ;;  %v4007_v48 = vadd.f32 %v4006_v53, %v4005_v26 }
 0x3ab   : > { %v3928_v21 = vpop.f32.mrf.mxu1  ;;  %v4008_v34 = vpop.f32.mrf.mxu0 }
 0x3ac   : > { %v6045_v35 = vadd.f32 %v4007_v48, %v3927_v16 }
 0x3ad   : > { %v3929_v36 = vpop.f32.mrf.mxu1  ;;  %v4009_v43 = vpop.f32.mrf.mxu0 }
 0x3ae   : > { %v3930_v44 = vadd.f32 %v3929_v36, %v3928_v21  ;;  %v4010_v38 = vadd.f32 %v4009_v43, %v4008_v34 }
 0x3af   : > { %v3931_v25 = vpop.f32.mrf.mxu1  ;;  %v4011_v39 = vpop.f32.mrf.mxu0 }
 0x3b0   : > { %v6047_v63 = vadd.f32 %v4010_v38, %v3930_v44 }
 0x3b1   : > { %v3932_v20 = vpop.f32.mrf.mxu1  ;;  %v4012_v46 = vpop.f32.mrf.mxu0 }
 0x3b2   : > { %6506 = vst [vmem:[#allocation5_spill] sm:$0xff] %v6047_v63  ;;  %v3933_v41 = vadd.f32 %v3932_v20, %v3931_v25  ;;  %v4013_v32 = vadd.f32 %v4012_v46, %v4011_v39 }
 0x3b3   : > { %v3934_v42 = vpop.f32.mrf.mxu1  ;;  %v4014_v54 = vpop.f32.mrf.mxu0 }
 0x3b4   : > { %v6049_v55 = vadd.f32 %v4013_v32, %v3933_v41 }
 0x3b5   : > { %v3935_v62 = vpop.f32.mrf.mxu1  ;;  %v4015_v45 = vpop.f32.mrf.mxu0 }
 0x3b6   : > { %v3936_v3 = vadd.f32 %v3935_v62, %v3934_v42  ;;  %v4016_v6 = vadd.f32 %v4015_v45, %v4014_v54 }
 0x3b7   : > { %v3937_v14 = vpop.f32.mrf.mxu1  ;;  %v4017_v17 = vpop.f32.mrf.mxu0 }
 0x3b8   : > { %v6051_v52 = vadd.f32 %v4016_v6, %v3936_v3 }
 0x3b9   : > { %v3938_v29 = vpop.f32.mrf.mxu1  ;;  %v4018_v31 = vpop.f32.mrf.mxu0 }
 0x3ba   : > { %6507 = vst [vmem:[#allocation6_spill] sm:$0xff] %v6051_v52  ;;  %v3939_v27 = vadd.f32 %v3938_v29, %v3937_v14  ;;  %v4019_v50 = vadd.f32 %v4018_v31, %v4017_v17 }
 0x3bb   : > { %v3940_v51 = vpop.f32.mrf.mxu1  ;;  %v4020_v58 = vpop.f32.mrf.mxu0 }
 0x3bc   : > { %v6053_v9 = vadd.f32 %v4019_v50, %v3939_v27 }
 0x3bd   : > { %v3941_v10 = vpop.f32.mrf.mxu1  ;;  %v4021_v28 = vpop.f32.mrf.mxu0 }
 0x3be   : > { %6508 = vst [vmem:[#allocation7_spill] sm:$0xff] %v6053_v9  ;;  %v3942_v37 = vadd.f32 %v3941_v10, %v3940_v51  ;;  %v4022_v7 = vadd.f32 %v4021_v28, %v4020_v58 }
 0x3bf   : > { %v3943_v61 = vpop.f32.mrf.mxu1  ;;  %v4023_v11 = vpop.f32.mrf.mxu0 }
 0x3c0   : > { %v6055_v40 = vadd.f32 %v4022_v7, %v3942_v37 }
 0x3c1   : > { %v3944_v49 = vpop.f32.mrf.mxu1  ;;  %v4024_v56 = vpop.f32.mrf.mxu0 }
 0x3c2   : > { %6509 = vst [vmem:[#allocation8_spill] sm:$0xff] %v6055_v40  ;;  %v3945_v57 = vadd.f32 %v3944_v49, %v3943_v61  ;;  %v4025_v18 = vadd.f32 %v4024_v56, %v4023_v11 }
 0x3c3   : > { %v3946_v22 = vpop.f32.mrf.mxu1  ;;  %v4026_v5 = vpop.f32.mrf.mxu0 }
 0x3c4   : > { %v6057_v24 = vadd.f32 %v4025_v18, %v3945_v57 }
 0x3c5   : > { %v3947_v13 = vpop.f32.mrf.mxu1  ;;  %v4027_v0 = vpop.f32.mrf.mxu0 }
 0x3c6   : > { %6510 = vst [vmem:[#allocation9_spill] sm:$0xff] %v6057_v24  ;;  %v3948_v2 = vadd.f32 %v3947_v13, %v3946_v22  ;;  %v4028_v19 = vadd.f32 %v4027_v0, %v4026_v5 }
 0x3c7   : > { %v3949_v33 = vpop.f32.mrf.mxu1  ;;  %v6059_v4 = vpop.f32.mrf.mxu0 }
 0x3c8   : > { %v6061_v8 = vadd.f32 %v4028_v19, %v3948_v2 }
 0x3c9   : > { %v3950_v26 = vpop.f32.mrf.mxu1  ;;  %v6065_v53 = vpop.f32.mrf.mxu0 }
 0x3ca   : > { %6511 = vst [vmem:[#allocation10_spill] sm:$0xff] %v6061_v8  ;;  %v6063_v15 = vadd.f32 %v3950_v26, %v3949_v33 }
 0x3cb   : > { %v4064_v16 = vpop.f32.mrf.mxu1  ;;  %v4144_v48 = vpop.f32.mrf.mxu0 }
 0x3cd   : > { %v4065_v21 = vpop.f32.mrf.mxu1  ;;  %v4145_v34 = vpop.f32.mrf.mxu0 }
 0x3cf   : > { %v4067_v36 = vpop.f32.mrf.mxu1 }
 0x3d0   : > { %v4147_v43 = vpop.f32.mrf.mxu0 }
 0x3d1   : > { %v4068_v44 = vpop.f32.mrf.mxu1 }
 0x3d2   : > { %v4148_v38 = vpop.f32.mrf.mxu0 }
 0x3d3   : > { %v4070_v25 = vpop.f32.mrf.mxu1  ;;  %v4149_v63 = vadd.f32 %v4148_v38, %v4147_v43  ;;  %v6147_v38 = vld [vmem:[%s6283_s5] ss:$0 sm:$0xff] }
 0x3d4   : > { %v6067_v39 = vpop.f32.mrf.mxu0 }
 0x3d5   : > { %v4071_v20 = vpop.f32.mrf.mxu1 }
 0x3d6   : > { %v6069_v46 = vpop.f32.mrf.mxu0 }
 0x3d7   : > { %v4073_v41 = vpop.f32.mrf.mxu1 }
 0x3d8   : > { %v4153_v32 = vpop.f32.mrf.mxu0 }
 0x3d9   : > { %v4074_v42 = vpop.f32.mrf.mxu1 }
 0x3da   : > { %v4154_v54 = vpop.f32.mrf.mxu0 }
 0x3db   : > { %v4076_v62 = vpop.f32.mrf.mxu1 }
 0x3dc   : > { %v6071_v45 = vpop.f32.mrf.mxu0 }
 0x3dd   : > { %v4077_v3 = vpop.f32.mrf.mxu1 }
 0x3de   : > { %v6073_v6 = vpop.f32.mrf.mxu0  ;;  %v4078_v43 = vadd.f32 %v4077_v3, %v4076_v62 }
 0x3df   : > { %v4079_v14 = vpop.f32.mrf.mxu1 }
 0x3e0   : > { %v4159_v17 = vpop.f32.mrf.mxu0 }
 0x3e1   : > { %v4080_v29 = vpop.f32.mrf.mxu1 }
 0x3e2   : > { %v4160_v31 = vpop.f32.mrf.mxu0 }
 0x3e3   : > { %v6075_v27 = vpop.f32.mrf.mxu1 }
 0x3e4   : > { %v6077_v50 = vpop.f32.mrf.mxu0 }
 0x3e5   : > { %v6079_v51 = vpop.f32.mrf.mxu1 }
 0x3e6   : > { %v6081_v58 = vpop.f32.mrf.mxu0 }
 0x3e7   : > { %v4085_v10 = vpop.f32.mrf.mxu1 }
 0x3e8   : > { %v6083_v28 = vpop.f32.mrf.mxu0 }
 0x3e9   : > { %v4086_v37 = vpop.f32.mrf.mxu1 }
 0x3ea   : > { %v6085_v7 = vpop.f32.mrf.mxu0 }
 0x3eb   : > { %v6087_v61 = vpop.f32.mrf.mxu1 }
 0x3ec   : > { %v6089_v11 = vpop.f32.mrf.mxu0 }
 0x3ed   : > { %6512 = vst [vmem:[#allocation11_spill] sm:$0xff] %v6089_v11  ;;  %v6091_v49 = vpop.f32.mrf.mxu1 }
 0x3ee   : > { %v6093_v56 = vpop.f32.mrf.mxu0 }
 0x3ef   : > { %6513 = vst [vmem:[#allocation12_spill] sm:$0xff] %v6093_v56  ;;  %v6095_v57 = vpop.f32.mrf.mxu1  ;;  %v4066_v56 = vadd.f32 %v4065_v21, %v4064_v16  ;;  %v4155_v16 = vadd.f32 %v4154_v54, %v4153_v32 }
 0x3f0   : > { %v6097_v18 = vpop.f32.mrf.mxu0 }
 0x3f1   : > { %v4092_v22 = vpop.f32.mrf.mxu1 }
 0x3f2   : > { %v6099_v5 = vpop.f32.mrf.mxu0 }
 0x3f3   : > { %v6101_v13 = vpop.f32.mrf.mxu1 }
 0x3f4   : > { %6514 = vst [vmem:[#allocation13_spill] sm:$0xff] %v6101_v13  ;;  %v6103_v0 = vpop.f32.mrf.mxu0 }
 0x3f5   : > { %6515 = vst [vmem:[#allocation14_spill] sm:$0xff] %v6103_v0  ;;  %v6105_v2 = vpop.f32.mrf.mxu1  ;;  %v4069_v0 = vadd.f32 %v4068_v44, %v4067_v36  ;;  %v4081_v36 = vadd.f32 %v4080_v29, %v4079_v14 }
 0x3f6   : > { %6516 = vst [vmem:[#allocation15_spill] sm:$0xff] %v6105_v2  ;;  %v6107_v19 = vpop.f32.mrf.mxu0 }
 0x3f7   : > { %6517 = vst [vmem:[#allocation16_spill] sm:$0xff] %v6107_v19  ;;  %v6109_v33 = vpop.f32.mrf.mxu1 }
 0x3f8   : > { %v6113_v8 = vpop.f32.mrf.mxu0 }
 0x3f9   : > { %v6111_v26 = vpop.f32.mrf.mxu1  ;;  %6519 = vst [vmem:[#allocation18_spill] sm:$0xff] %v6113_v8  ;;  %v3224_v8 = vadd.f32 %v4069_v0, %v6033_v30  ;;  %v4031_v30 = vadd.f32 %v6065_v53, %v6059_v4  ;;  %v6156_v4 = vld [vmem:[%s6284_s6] ss:$0 sm:$0xff] }
 0x3fa   : > { %6518 = vst [vmem:[#allocation17_spill] sm:$0xff] %v6111_v26  ;;  %v6119_v52 = vpop.f32.mrf.mxu0 }
 0x3fb   : > { %v6115_v40 = vpop.f32.mrf.mxu1  ;;  %6522 = vst [vmem:[#allocation21_spill] sm:$0xff] %v6119_v52  ;;  %v4146_v52 = vadd.f32 %v4145_v34, %v4144_v48  ;;  %v4152_v34 = vadd.f32 %v6069_v46, %v6067_v39  ;;  %v6162_v39 = vadd.f32 %v4031_v30, %v6063_v15  ;;  %v4167_v15 = vadd.f32 %v6085_v7, %v6083_v28 }
 0x3fc   : > { %6520 = vst [vmem:[#allocation19_spill] sm:$0xff] %v6115_v40  ;;  %v6125_v2 = vpop.f32.mrf.mxu0  ;;  %v4075_v40 = vadd.f32 %v4074_v42, %v4073_v41  ;;  %v4090_v28 = vadd.f32 %v6091_v49, %v6087_v61 }
 0x3fd   : > { %v6117_v24 = vpop.f32.mrf.mxu1 }
 0x3fe   : > { %6521 = vst [vmem:[#allocation20_spill] sm:$0xff] %v6117_v24  ;;  %v6132_v26 = vpop.f32.mrf.mxu0 }
 0x3ff   : > { %v6121_v9 = vpop.f32.mrf.mxu1 }
 0x400   : > { %6523 = vst [vmem:[#allocation22_spill] sm:$0xff] %v6121_v9  ;;  %v3219_v9 = vadd.f32 %v4066_v56, %v6031_v23  ;;  %v6140_v21 = vpop.f32.mrf.mxu0 }
 0x401   : > { %v6123_v13 = vpop.f32.mrf.mxu1 }
 0x402   : > { %6524 = vst [vmem:[#allocation23_spill] sm:$0xff] %v6123_v13  ;;  %v4072_v13 = vadd.f32 %v4071_v20, %v4070_v25  ;;  %v3244_v25 = vadd.f32 %v4081_v36, %v6041_v12  ;;  %v6158_v20 = vpop.f32.mrf.mxu0  ;;  %v4158_v12 = vadd.f32 %v6073_v6, %v6071_v45 }
 0x403   : > { %v6127_v19 = vpop.f32.mrf.mxu1 }
 0x404   : > { %6525 = vst [vmem:[#allocation24_spill] sm:$0xff] %v6127_v19  ;;  %v3234_v19 = vadd.f32 %v4075_v40, %v6037_v59  ;;  %v3229_v48 = vadd.f32 %v4072_v13, %v6035_v47  ;;  %v3364_v40 = vadd.f32 %v4146_v52, %v3219_v9  ;;  %v3239_v52 = vadd.f32 %v4078_v43, %v6039_v60  ;;  %v6175_v6 = vpop.f32.mrf.mxu0  ;;  %v6528_v43 = vld [vmem:[#allocation5_spill] sm:$0xff] }
 0x405   : > { %v6129_v11 = vpop.f32.mrf.mxu1  ;;  %v4084_v9 = vadd.f32 %v6079_v51, %v6075_v27  ;;  %v4093_v60 = vadd.f32 %v4092_v22, %v6095_v57 }
 0x406   : > { %6526 = vst [vmem:[#allocation25_spill] sm:$0xff] %v6129_v11  ;;  %v3369_v11 = vadd.f32 %v4149_v63, %v3224_v8  ;;  %v4161_v63 = vadd.f32 %v4160_v31, %v4159_v17  ;;  %v4087_v8 = vadd.f32 %v4086_v37, %v4085_v10  ;;  %v3379_v32 = vadd.f32 %v4155_v16, %v3234_v19  ;;  %v6192_v49 = vpop.f32.mrf.mxu0 }
 0x407   : > { %v6134_v24 = vpop.f32.mrf.mxu1  ;;  %v3374_v3 = vadd.f32 %v4152_v34, %v3229_v48  ;;  %v3249_v10 = vadd.f32 %v4084_v9, %v6043_v1  ;;  %v3384_v7 = vadd.f32 %v4158_v12, %v3239_v52  ;;  %v3264_v13 = vadd.f32 %v4093_v60, %v6049_v55  ;;  %v6530_v48 = vld [vmem:[#allocation12_spill] sm:$0xff]  ;;  %v6532_v34 = vld [vmem:[#allocation15_spill] sm:$0xff]  ;;  %v6535_v52 = vld [vmem:[#allocation21_spill] sm:$0xff] }
 0x408   : > { %v3254_v14 = vadd.f32 %v4087_v8, %v6045_v35  ;;  %v3389_v45 = vadd.f32 %v4161_v63, %v3244_v25  ;;  %v4164_v35 = vadd.f32 %v6081_v58, %v6077_v50  ;;  %v4173_v1 = vadd.f32 %v6099_v5, %v6097_v18  ;;  %v6527_v50 = vld [vmem:[#allocation17_spill] sm:$0xff]  ;;  %v6536_v9 = vld [vmem:[#allocation22_spill] sm:$0xff] }
 0x409   : > { %v6137_v44 = vpop.f32.mrf.mxu1  ;;  %v4099_v58 = vadd.f32 %v6527_v50, %v6109_v33  ;;  %v3259_v55 = vadd.f32 %v4090_v28, %v6528_v43  ;;  %v6531_v5 = vld [vmem:[#allocation13_spill] sm:$0xff]  ;;  %v4185_v50 = vadd.f32 %v6158_v20, %v6140_v21 }
 0x40a   : > { %v3399_v61 = vadd.f32 %v4167_v15, %v3254_v14  ;;  %v4096_v33 = vadd.f32 %v6532_v34, %v6531_v5 }
 0x40b   : > { %v4306_v23 = vpop.f32.mrf.mxu1  ;;  %v6545_v21 = vld [vmem:[#allocation24_spill] sm:$0xff] }
 0x40c   : > { %v3514_v59 = vadd.f32 %v4306_v23, %v3369_v11  ;;  %v6529_v23 = vld [vmem:[#allocation11_spill] sm:$0xff] }
 0x40d   : > { %v3508_v53 = vpop.f32.mrf.mxu1  ;;  %v4170_v18 = vadd.f32 %v6530_v48, %v6529_v23  ;;  %v4182_v48 = vadd.f32 %v6132_v26, %v6125_v2  ;;  %v6546_v20 = vld [vmem:[#allocation25_spill] sm:$0xff] }
 0x40e   : > { %v3594_v41 = vmul.f32 %v6147_v38, %v3514_v59  ;;  %v3509_v47 = vadd.f32 %v3508_v53, %v3364_v40  ;;  %v3394_v40 = vadd.f32 %v4164_v35, %v3249_v10  ;;  %v6541_v10 = vld [vmem:[#allocation19_spill] sm:$0xff]  ;;  %v6542_v35 = vld [vmem:[#allocation20_spill] sm:$0xff] }
 0x40f   : > { %v4309_v46 = vpop.f32.mrf.mxu1  ;;  %v4102_v28 = vadd.f32 %v6542_v35, %v6541_v10 }
 0x410   : > { %v3616_v42 = vadd.f32 %v6156_v4, %v3594_v41  ;;  %v3593_v54 = vmul.f32 %v6147_v38, %v3509_v47  ;;  %v3524_v62 = vadd.f32 %v4309_v46, %v3379_v32  ;;  %v6533_v41 = vld [vmem:[#allocation7_spill] sm:$0xff]  ;;  %v6534_v32 = vld [vmem:[#allocation18_spill] sm:$0xff] }
 0x411   : > { %v3518_v17 = vpop.f32.mrf.mxu1  ;;  %v3274_v47 = vadd.f32 %v4099_v58, %v6533_v41  ;;  %v4179_v12 = vadd.f32 %v6535_v52, %v6534_v32  ;;  %v6537_v46 = vld [vmem:[#allocation23_spill] sm:$0xff]  ;;  %v4111_v58 = vadd.f32 %v6137_v44, %v6134_v24  ;;  %v4188_v52 = vadd.f32 %v6192_v49, %v6175_v6 }
 0x412   : > { %v3632_v29 = vmax.f32 %v3616_v42, 0.0  ;;  %v3615_v31 = vadd.f32 %v6156_v4, %v3593_v54  ;;  %v3596_v27 = vmul.f32 %v6147_v38, %v3524_v62  ;;  %v3519_v51 = vadd.f32 %v3518_v17, %v3374_v3  ;;  %v4189_v3 = vpop.f32.mrf.mxu0 }
 0x413   : > { %v4312_v37 = vpop.f32.mrf.mxu1  ;;  %v4105_v42 = vadd.f32 %v6537_v46, %v6536_v9  ;;  %v3409_v62 = vadd.f32 %v4173_v1, %v3264_v13  ;;  %v6543_v13 = vld [vmem:[#allocation9_spill] sm:$0xff] }
 0x414   : > { %3648 = vst [vmem:[%s4513_s19 + $0x8] sm:$0xff] %v3632_v29  ;;  %v3631_v11 = vmax.f32 %v3615_v31, 0.0  ;;  %v3618_v56 = vadd.f32 %v6156_v4, %v3596_v27  ;;  %v3595_v57 = vmul.f32 %v6147_v38, %v3519_v51  ;;  %v3534_v22 = vadd.f32 %v4312_v37, %v3389_v45  ;;  %v6538_v45 = vld [vmem:[#allocation6_spill] sm:$0xff]  ;;  %v6540_v27 = vld [vmem:[#allocation16_spill] sm:$0xff] }
 0x415   : > { %v3528_v0 = vpop.f32.mrf.mxu1  ;;  %v3269_v29 = vadd.f32 %v4096_v33, %v6538_v45  ;;  %v6539_v31 = vld [vmem:[#allocation14_spill] sm:$0xff]  ;;  %v3284_v1 = vadd.f32 %v4105_v42, %v6543_v13 }
 0x416   : > { %3647 = vst [vmem:[%s4513_s19] sm:$0xff] %v3631_v11  ;;  %v3634_v19 = vmax.f32 %v3618_v56, 0.0  ;;  %v3617_v36 = vadd.f32 %v6156_v4, %v3595_v57  ;;  %v3598_v16 = vmul.f32 %v6147_v38, %v3534_v22  ;;  %v3529_v30 = vadd.f32 %v3528_v0, %v3384_v7 }
 0x417   : > { %v4315_v59 = vpop.f32.mrf.mxu1  ;;  %v4176_v51 = vadd.f32 %v6540_v27, %v6539_v31  ;;  %v3404_v7 = vadd.f32 %v4170_v18, %v3259_v55  ;;  %v6544_v55 = vld [vmem:[#allocation8_spill] sm:$0xff]  ;;  %v4108_v18 = vadd.f32 %v6546_v20, %v6545_v21 }
 0x418   : > { %3650 = vst [vmem:[%s4513_s19 + $0x18] sm:$0xff] %v3634_v19  ;;  %v3633_v25 = vmax.f32 %v3617_v36, 0.0  ;;  %v3620_v63 = vadd.f32 %v6156_v4, %v3598_v16  ;;  %v3597_v8 = vmul.f32 %v6147_v38, %v3529_v30  ;;  %v3544_v53 = vadd.f32 %v4315_v59, %v3399_v61  ;;  %v4190_v19 = vpop.f32.mrf.mxu0 }
 0x419   : > { %v3538_v54 = vpop.f32.mrf.mxu1  ;;  %v3419_v61 = vadd.f32 %v4179_v12, %v3274_v47  ;;  %v3279_v23 = vadd.f32 %v4102_v28, %v6544_v55  ;;  %v3414_v44 = vadd.f32 %v4176_v51, %v3269_v29  ;;  %v6547_v47 = vld [vmem:[#allocation10_spill] sm:$0xff] }
 0x41a   : > { %3649 = vst [vmem:[%s4513_s19 + $0x10] sm:$0xff] %v3633_v25  ;;  %v3636_v14 = vmax.f32 %v3620_v63, 0.0  ;;  %v3619_v15 = vadd.f32 %v6156_v4, %v3597_v8  ;;  %v3600_v60 = vmul.f32 %v6147_v38, %v3544_v53  ;;  %v3539_v17 = vadd.f32 %v3538_v54, %v3394_v40 }
 0x41b   : > { %v4318_v37 = vpop.f32.mrf.mxu1  ;;  %v3294_v40 = vadd.f32 %v4111_v58, %v6162_v39  ;;  %v4191_v25 = vadd.f32 %v4190_v19, %v4189_v3  ;;  %v3429_v8 = vadd.f32 %v4185_v50, %v3284_v1  ;;  %v3289_v32 = vadd.f32 %v4108_v18, %v6547_v47 }
 0x41c   : > { %3652 = vst [vmem:[%s4513_s19 + $0x28] sm:$0xff] %v3636_v14  ;;  %v3635_v11 = vmax.f32 %v3619_v15, 0.0  ;;  %v3622_v56 = vadd.f32 %v6156_v4, %v3600_v60  ;;  %v3599_v57 = vmul.f32 %v6147_v38, %v3539_v17  ;;  %v3554_v22 = vadd.f32 %v4318_v37, %v3409_v62 }
 0x41d   : > { %v3548_v0 = vpop.f32.mrf.mxu1  ;;  %v3424_v9 = vadd.f32 %v4182_v48, %v3279_v23  ;;  %v3439_v3 = vadd.f32 %v4191_v25, %v3294_v40  ;;  %v3434_v17 = vadd.f32 %v4188_v52, %v3289_v32 }
 0x41e   : > { %3651 = vst [vmem:[%s4513_s19 + $0x20] sm:$0xff] %v3635_v11  ;;  %v3638_v36 = vmax.f32 %v3622_v56, 0.0  ;;  %v3621_v16 = vadd.f32 %v6156_v4, %v3599_v57  ;;  %v3602_v30 = vmul.f32 %v6147_v38, %v3554_v22  ;;  %v3549_v43 = vadd.f32 %v3548_v0, %v3404_v7 }
 0x41f   : > { %v4321_v24 = vpop.f32.mrf.mxu1 }
 0x420   : > { %3654 = vst [vmem:[%s4513_s19 + $0x38] sm:$0xff] %v3638_v36  ;;  %v3637_v5 = vmax.f32 %v3621_v16, 0.0  ;;  %v3624_v34 = vadd.f32 %v6156_v4, %v3602_v30  ;;  %v3601_v33 = vmul.f32 %v6147_v38, %v3549_v43  ;;  %v3564_v59 = vadd.f32 %v4321_v24, %v3419_v61 }
 0x421   : > { %v3558_v63 = vpop.f32.mrf.mxu1 }
 0x422   : > { %3653 = vst [vmem:[%s4513_s19 + $0x30] sm:$0xff] %v3637_v5  ;;  %v3640_v2 = vmax.f32 %v3624_v34, 0.0  ;;  %v3623_v26 = vadd.f32 %v6156_v4, %v3601_v33  ;;  %v3604_v53 = vmul.f32 %v6147_v38, %v3564_v59  ;;  %v3559_v41 = vadd.f32 %v3558_v63, %v3414_v44 }
 0x423   : > { %v4324_v12 = vpop.f32.mrf.mxu1 }
 0x424   : > { %3656 = vst [vmem:[%s4513_s19 + $0x48] sm:$0xff] %v3640_v2  ;;  %v3639_v39 = vmax.f32 %v3623_v26, 0.0  ;;  %v3626_v46 = vadd.f32 %v6156_v4, %v3604_v53  ;;  %v3603_v42 = vmul.f32 %v6147_v38, %v3559_v41  ;;  %v3574_v54 = vadd.f32 %v4324_v12, %v3429_v8 }
 0x425   : > { %v3568_v62 = vpop.f32.mrf.mxu1 }
 0x426   : > { %3655 = vst [vmem:[%s4513_s19 + $0x40] sm:$0xff] %v3639_v39  ;;  %v3642_v14 = vmax.f32 %v3626_v46, 0.0  ;;  %v3625_v15 = vadd.f32 %v6156_v4, %v3603_v42  ;;  %v3606_v6 = vmul.f32 %v6147_v38, %v3574_v54  ;;  %v3569_v49 = vadd.f32 %v3568_v62, %v3424_v9 }
 0x427   : > { %v4327_v60 = vpop.f32.mrf.mxu1 }
 0x428   : > { %3658 = vst [vmem:[%s4513_s19 + $0x58] sm:$0xff] %v3642_v14  ;;  %v3641_v45 = vmax.f32 %v3625_v15, 0.0  ;;  %v3628_v29 = vadd.f32 %v6156_v4, %v3606_v6  ;;  %v3605_v31 = vmul.f32 %v6147_v38, %v3569_v49  ;;  %v3584_v27 = vadd.f32 %v4327_v60, %v3439_v3 }
 0x429   : > { %v3578_v51 = vpop.f32.mrf.mxu1 }
 0x42a   : > { %3657 = vst [vmem:[%s4513_s19 + $0x50] sm:$0xff] %v3641_v45  ;;  %v3644_v10 = vmax.f32 %v3628_v29, 0.0  ;;  %v3627_v35 = vadd.f32 %v6156_v4, %v3605_v31  ;;  %v3608_v28 = vmul.f32 %v6147_v38, %v3584_v27  ;;  %v3579_v37 = vadd.f32 %v3578_v51, %v3434_v17 }
 0x42c   : > { %3660 = vst [vmem:[%s4513_s19 + $0x68] sm:$0xff] %v3644_v10  ;;  %v3643_v7 = vmax.f32 %v3627_v35, 0.0  ;;  %v3630_v11 = vadd.f32 %v6156_v4, %v3608_v28  ;;  %v3607_v56 = vmul.f32 %v6147_v38, %v3579_v37 }
 0x42e   : > { %3659 = vst [vmem:[%s4513_s19 + $0x60] sm:$0xff] %v3643_v7  ;;  %v3646_v57 = vmax.f32 %v3630_v11, 0.0  ;;  %v3629_v22 = vadd.f32 %v6156_v4, %v3607_v56 }
 0x430   : > { %3662 = vst [vmem:[%s4513_s19 + $0x78] sm:$0xff] %v3646_v57  ;;  %v3645_v13 = vmax.f32 %v3629_v22, 0.0 }
 0x432   : > { %3661 = vst [vmem:[%s4513_s19 + $0x70] sm:$0xff] %v3645_v13 }
 0x433 PF: > { %s17_s28 = sadd.s32 1, %s4419_s28   ;;  %s6548_s24 = smov %s4411_s26 }
 0x434   : > { %p14_p9 = scmp.ge.s32.totalorder %s17_s28, 6   ;;  %s6549_s25 = smov %s4415_s27 }
 0x435   : > { %s6550_s26 = smov %s6553_s29  ;;  %s6551_s27 = smov %s6557_s30 }
 0x436   :  { %16 = sbr.rel (!%p14_p9) target bundleno = 3 (0x3), region = 86 }

</bundles_post_ra>
